<compile_context>
chip_gen: v5e
topology: v5e:2x2
jax: 0.10.0
libtpu: 0.0.40
codegen_flags: <defaults>
</compile_context>

<pallas_src>
import functools
import jax
import jax.numpy as jnp
from jax.experimental import pallas as pl
from jax.experimental.pallas import tpu as pltpu

# ----------------------------- configuration -----------------------------
B = 2                 # batch
C = 3                 # image channels
IMG = 16              # image size
PATCH = 4             # encoder_patch_size
NPATCH = (IMG // PATCH) ** 2          # 16 patches
PATCH_DIM = C * PATCH * PATCH         # 48
D = 32                # encoder_embed_dim
HEADS = 4             # encoder_num_heads
DH = D // HEADS       # head dim
DEPTH = 2             # transformer depth
HID = 4 * D           # MLP hidden
CAM_DIM = 16          # camera params (flattened 4x4)
R = 2                 # TensoRF rank (components)
G = 8                 # feature grid resolution
NR = 64               # rays per batch element
S = 16                # samples per ray
NEAR, FAR = 2.0, 6.0
OUTF = 3 * R * G * G + 3 * R * G      # 432 (matrices || vectors)
AABB = jnp.array([[-1.5, -1.5, -1.5], [1.5, 1.5, 1.5]], jnp.float32)


# ===========================================================================
# Kernel 1: fused encoder + decoder (one grid step per batch element)
# ===========================================================================
def _encoder_decoder_kernel(patches_ref, cam_ref, patch_w_ref, patch_b_ref, pos_ref,
                            ln1_g_ref, ln1_b_ref, qw_ref, qb_ref, kw_ref, kb_ref,
                            vw_ref, vb_ref, pw_ref, pb_ref, ln2_g_ref, ln2_b_ref,
                            fc1_w_ref, fc1_b_ref, fc2_w_ref, fc2_b_ref,
                            norm_g_ref, norm_b_ref, dwl_ref, dwc_ref, db_ref,
                            out_ref):
    def layer_norm(v, g, b):
        mu = jnp.mean(v, axis=-1, keepdims=True)
        var = jnp.mean(jnp.square(v - mu), axis=-1, keepdims=True)
        return (v - mu) * jax.lax.rsqrt(var + 1e-5) * g + b   # eps matches nn.LayerNorm

    # patch embed + positional embedding
    x = jnp.dot(patches_ref[0], patch_w_ref[...], preferred_element_type=jnp.float32)
    x = x + patch_b_ref[...] + pos_ref[...]                    # [NPATCH, D]

    scale = 1.0 / (DH ** 0.5)
    for l in range(DEPTH):                                     # unrolled (DEPTH = 2)
        h = layer_norm(x, ln1_g_ref[l], ln1_b_ref[l])
        attn = jnp.zeros((NPATCH, D), jnp.float32)
        for hd in range(HEADS):                                # unrolled (HEADS = 4)
            q = jnp.dot(h, qw_ref[l, hd], preferred_element_type=jnp.float32) + qb_ref[l, hd]
            k = jnp.dot(h, kw_ref[l, hd], preferred_element_type=jnp.float32) + kb_ref[l, hd]
            v = jnp.dot(h, vw_ref[l, hd], preferred_element_type=jnp.float32) + vb_ref[l, hd]
            s = jax.lax.dot_general(q, k, (((1,), (1,)), ((), ())),
                                    preferred_element_type=jnp.float32) * scale
            m = jnp.max(s, axis=-1, keepdims=True)
            p = jnp.exp(s - m)
            p = p / jnp.sum(p, axis=-1, keepdims=True)
            ah = jnp.dot(p, v, preferred_element_type=jnp.float32)          # [NPATCH, DH]
            attn = attn + jnp.dot(ah, pw_ref[l, hd],
                                  preferred_element_type=jnp.float32)       # [NPATCH, D]
        x = x + attn + pb_ref[l]                                # attention proj bias + residual

        h = layer_norm(x, ln2_g_ref[l], ln2_b_ref[l])
        h = jnp.dot(h, fc1_w_ref[l], preferred_element_type=jnp.float32) + fc1_b_ref[l]
        h = jax.nn.gelu(h, approximate=True)
        h = jnp.dot(h, fc2_w_ref[l], preferred_element_type=jnp.float32) + fc2_b_ref[l]
        x = x + h

    x = layer_norm(x, norm_g_ref[...], norm_b_ref[...])         # final encoder LN
    pooled = jnp.mean(x, axis=0, keepdims=True)                 # [1, D]
    # decoder: (pooled || camera) @ [mat_w | vec_w]  -- split to avoid in-kernel concat
    dec = (jnp.dot(pooled, dwl_ref[...], preferred_element_type=jnp.float32)
           + jnp.dot(cam_ref[0], dwc_ref[...], preferred_element_type=jnp.float32)
           + db_ref[...])                                       # [1, OUTF]
    out_ref[0] = dec


def _full_spec(arr):
    nd = arr.ndim
    return pl.BlockSpec(arr.shape, lambda i, _nd=nd: (0,) * _nd)


_ENC_WEIGHT_NAMES = ('patch_w', 'patch_b', 'pos', 'ln1_g', 'ln1_b', 'qw', 'qb', 'kw', 'kb',
                     'vw', 'vb', 'pw', 'pb', 'ln2_g', 'ln2_b', 'fc1_w', 'fc1_b', 'fc2_w',
                     'fc2_b', 'norm_g', 'norm_b', 'dec_w_lat', 'dec_w_cam', 'dec_b')


def encode_and_decode(pp, patches, camera):
    b = patches.shape[0]
    weights = [pp[n] for n in _ENC_WEIGHT_NAMES]
    in_specs = ([pl.BlockSpec((1, NPATCH, PATCH_DIM), lambda i: (i, 0, 0)),
                 pl.BlockSpec((1, 1, CAM_DIM), lambda i: (i, 0, 0))]
                + [_full_spec(w) for w in weights])
    out = pl.pallas_call(
        _encoder_decoder_kernel,
        out_shape=jax.ShapeDtypeStruct((b, 1, OUTF), jnp.float32),
        grid_spec=pltpu.PrefetchScalarGridSpec(
            num_scalar_prefetch=0, grid=(b,),
            in_specs=in_specs,
            out_specs=pl.BlockSpec((1, 1, OUTF), lambda i: (i, 0, 0))),
        compiler_params=pltpu.CompilerParams(dimension_semantics=("parallel",)),
    )(patches, camera, *weights)
    return out.reshape(b, OUTF)


# ===========================================================================
# Kernel 2: fused sigmoid-RGB + alpha compositing, packed lane output
# ===========================================================================
def _composite_kernel(lin_ref, sigma_ref, dists_ref, t_ref, out_ref):
    sigma = jnp.maximum(sigma_ref[0], 0.0)                       # relu density    [NR, S]
    alpha = 1.0 - jnp.exp(-sigma * dists_ref[0])                 # [NR, S]
    log1ma = jnp.log(jnp.clip(1.0 - alpha, 1e-10, 1.0))
    # exclusive cumulative product via strictly-lower-triangular matmul (MXU friendly)
    row = jax.lax.broadcasted_iota(jnp.int32, (S, S), 0)
    col = jax.lax.broadcasted_iota(jnp.int32, (S, S), 1)
    excl = (row < col).astype(jnp.float32)                       # excl[j, i] = 1 if j < i
    trans = jnp.exp(jnp.dot(log1ma, excl, preferred_element_type=jnp.float32))
    w = alpha * trans                                            # [NR, S]

    acc = jnp.sum(w, axis=-1, keepdims=True)                     # [NR, 1]
    depth = jnp.sum(w * t_ref[0], axis=-1, keepdims=True)        # [NR, 1]
    bg = 1.0 - acc                                               # white background term

    # packed output: lanes 0..2 = rgb, 3 = depth, 4 = acc, 5..7 = pad (single store)
    lane = jax.lax.broadcasted_iota(jnp.int32, (NR, 8), 1)
    packed = jnp.where(lane == 3, depth, 0.0) + jnp.where(lane == 4, acc, 0.0)
    for c in range(3):
        rgb_c = jax.nn.sigmoid(lin_ref[0, c])                    # [NR, S]
        rgb_sum = jnp.sum(w * rgb_c, axis=-1, keepdims=True) + bg
        packed = packed + jnp.where(lane == c, rgb_sum, 0.0)
    out_ref[0] = packed


def composite(lin, sigma, dists, t):
    b = sigma.shape[0]
    return pl.pallas_call(
        _composite_kernel,
        out_shape=jax.ShapeDtypeStruct((b, NR, 8), jnp.float32),
        grid_spec=pltpu.PrefetchScalarGridSpec(
            num_scalar_prefetch=0, grid=(b,),
            in_specs=[pl.BlockSpec((1, 3, NR, S), lambda i: (i, 0, 0, 0)),
                      pl.BlockSpec((1, NR, S), lambda i: (i, 0, 0)),
                      pl.BlockSpec((1, NR, S), lambda i: (i, 0, 0)),
                      pl.BlockSpec((1, NR, S), lambda i: (i, 0, 0))],
            out_specs=pl.BlockSpec((1, NR, 8), lambda i: (i, 0, 0))),
        compiler_params=pltpu.CompilerParams(dimension_semantics=("parallel",)),
    )(lin, sigma, dists, t)


# ----------------------------- parameters -----------------------------
def init_params(key):
    keys = iter(jax.random.split(key, 32))

    def nrm(shape, scale=0.02):
        return jax.random.normal(next(keys), shape, jnp.float32) * scale

    params = {
        'patch_w': nrm((PATCH_DIM, D)),
        'patch_b': jnp.zeros((D,), jnp.float32),
        'pos_embed': nrm((1, NPATCH, D)),
        'norm_g': jnp.ones((D,), jnp.float32),
        'norm_b': jnp.zeros((D,), jnp.float32),
        'mat_w': nrm((D + CAM_DIM, 3 * R * G * G)),
        'mat_b': jnp.zeros((3 * R * G * G,), jnp.float32),
        'vec_w': nrm((D + CAM_DIM, 3 * R * G)),
        'vec_b': jnp.zeros((3 * R * G,), jnp.float32),
        'rgb_w': nrm((3 * R + 3, 3)),
        'rgb_b': jnp.zeros((3,), jnp.float32),
        'blocks': [],
    }
    for _ in range(DEPTH):
        params['blocks'].append({
            'ln1_g': jnp.ones((D,), jnp.float32), 'ln1_b': jnp.zeros((D,), jnp.float32),
            'qkv_w': nrm((D, 3 * D)), 'qkv_b': jnp.zeros((3 * D,), jnp.float32),
            'proj_w': nrm((D, D)), 'proj_b': jnp.zeros((D,), jnp.float32),
            'ln2_g': jnp.ones((D,), jnp.float32), 'ln2_b': jnp.zeros((D,), jnp.float32),
            'fc1_w': nrm((D, HID)), 'fc1_b': jnp.zeros((HID,), jnp.float32),
            'fc2_w': nrm((HID, D)), 'fc2_b': jnp.zeros((D,), jnp.float32),
        })
    return params


def pack_params(p):
    """Repack canonical params into the kernel-friendly (head-split, stacked) layout."""
    blocks = p['blocks']

    def stk(fn):
        return jnp.stack([fn(blk) for blk in blocks], axis=0)

    qw, kw, vw, qb, kb, vb, pw = [], [], [], [], [], [], []
    for blk in blocks:
        w3 = blk['qkv_w'].reshape(D, 3, HEADS, DH)               # columns: [3, H, Dh]
        b3 = blk['qkv_b'].reshape(3, HEADS, 1, DH)
        qw.append(jnp.transpose(w3[:, 0], (1, 0, 2)))            # [H, D, Dh]
        kw.append(jnp.transpose(w3[:, 1], (1, 0, 2)))
        vw.append(jnp.transpose(w3[:, 2], (1, 0, 2)))
        qb.append(b3[0]); kb.append(b3[1]); vb.append(b3[2])
        pw.append(blk['proj_w'].reshape(HEADS, DH, D))           # rows are head-major

    dec_w = jnp.concatenate([p['mat_w'], p['vec_w']], axis=1)    # [D+CAM, OUTF]
    dec_b = jnp.concatenate([p['mat_b'], p['vec_b']], axis=0)

    return {
        'patch_w': p['patch_w'],
        'patch_b': p['patch_b'].reshape(1, D),
        'pos': p['pos_embed'].reshape(NPATCH, D),
        'ln1_g': stk(lambda blk: blk['ln1_g'].reshape(1, D)),
        'ln1_b': stk(lambda blk: blk['ln1_b'].reshape(1, D)),
        'qw': jnp.stack(qw), 'qb': jnp.stack(qb),
        'kw': jnp.stack(kw), 'kb': jnp.stack(kb),
        'vw': jnp.stack(vw), 'vb': jnp.stack(vb),
        'pw': jnp.stack(pw),
        'pb': stk(lambda blk: blk['proj_b'].reshape(1, D)),
        'ln2_g': stk(lambda blk: blk['ln2_g'].reshape(1, D)),
        'ln2_b': stk(lambda blk: blk['ln2_b'].reshape(1, D)),
        'fc1_w': stk(lambda blk: blk['fc1_w']),
        'fc1_b': stk(lambda blk: blk['fc1_b'].reshape(1, HID)),
        'fc2_w': stk(lambda blk: blk['fc2_w']),
        'fc2_b': stk(lambda blk: blk['fc2_b'].reshape(1, D)),
        'norm_g': p['norm_g'].reshape(1, D),
        'norm_b': p['norm_b'].reshape(1, D),
        'dec_w_lat': dec_w[:D],
        'dec_w_cam': dec_w[D:],
        'dec_b': dec_b.reshape(1, OUTF),
        'rgb_w': p['rgb_w'],
        'rgb_b': p['rgb_b'],
    }


# ----------------------------- forward pass -----------------------------
def images_to_patches(images):
    """NCHW -> flattened patches [B, NPATCH, C*p*p] (matches Conv2d patch-embed flattening)."""
    b = images.shape[0]
    x = images.reshape(b, C, IMG // PATCH, PATCH, IMG // PATCH, PATCH)
    return x.transpose(0, 2, 4, 1, 3, 5).reshape(b, NPATCH, PATCH_DIM)


def renderer_forward(pp, ro, rd, dec_out, is_train, key):
    b, nr, _ = ro.shape
    near, far = NEAR, FAR
    t = jnp.linspace(near, far, S)
    if is_train:
        delta = (far - near) / (S - 1)
        t = t[None, None, :] + jax.random.uniform(key, (b, nr, S)) * delta
    else:
        t = jnp.broadcast_to(t[None, None, :], (b, nr, S))

    pts = ro[:, :, None, :] + t[..., None] * rd[:, :, None, :]          # [B,Nr,S,3]
    normed = jnp.clip((pts - AABB[0]) / (AABB[1] - AABB[0]), 0.0, 1.0)
    idx = jnp.round(normed * (G - 1)).astype(jnp.int32)                  # nearest-neighbour

    mats = dec_out[:, :3 * R * G * G].reshape(b, 3, R, G * G)            # [B,3,R,G*G]
    vecs = dec_out[:, 3 * R * G * G:].reshape(b, 3, R, G)                # [B,3,R,G]

    # nearest-neighbour lookup as one-hot matmuls (MXU, no XLA gather loops)
    pairs = ((0, 1), (0, 2), (1, 2))
    line_axes = (2, 1, 0)
    feat_channels = []
    for k3 in range(3):
        f = idx[..., pairs[k3][0]] * G + idx[..., pairs[k3][1]]          # [B,Nr,S]
        oh = (f[..., None] == jnp.arange(G * G)).astype(jnp.float32)     # [B,Nr,S,G*G]
        pv = jnp.einsum('bnsg,brg->bnsr', oh, mats[:, k3])               # [B,Nr,S,R]
        lidx = idx[..., line_axes[k3]]
        ohl = (lidx[..., None] == jnp.arange(G)).astype(jnp.float32)     # [B,Nr,S,G]
        lv = jnp.einsum('bnsg,brg->bnsr', ohl, vecs[:, k3])              # [B,Nr,S,R]
        prod = pv * lv
        for r in range(R):
            feat_channels.append(prod[..., r])
    sigma = sum(feat_channels)                                           # density feature [B,Nr,S]

    for c in range(3):
        feat_channels.append(jnp.broadcast_to(rd[:, :, None, c], (b, nr, S)))
    feat = jnp.stack(feat_channels, axis=-1)                             # [B,Nr,S,3R+3]
    # RGB linear head folded into the fused XLA feature chain; sigmoid applied in-kernel.
    lin = (jnp.einsum('bnsj,jc->bcns', feat, pp['rgb_w'])
           + pp['rgb_b'][None, :, None, None])                           # [B,3,Nr,S]

    dists = jnp.concatenate(
        [t[..., 1:] - t[..., :-1], jnp.full((b, nr, 1), 1e3, jnp.float32)], axis=-1)
    dists = dists * jnp.linalg.norm(rd, axis=-1, keepdims=True)

    packed = composite(lin, sigma, dists, t)                             # [B,Nr,8]
    return {
        'rgb_map': packed[..., 0:3],
        'depth_map': packed[..., 3],
        'acc_map': packed[..., 4],
    }


def model_forward(pp, input_images, camera_params, ro_train, rd_train,
                  is_train=True, key=jax.random.PRNGKey(42)):
    patches = images_to_patches(input_images)
    dec_out = encode_and_decode(pp, patches, camera_params.reshape(-1, 1, CAM_DIM))
    return renderer_forward(pp, ro_train, rd_train, dec_out, is_train, key)


# ----------------------------- main -----------------------------
if __name__ == "__main__":
    root = jax.random.PRNGKey(0)
    k_par, k_img, k_cam, k_ro, k_rd, k_jit = jax.random.split(root, 6)

    params = init_params(k_par)
    pp = pack_params(params)

    input_images = jax.random.normal(k_img, (B, C, IMG, IMG), jnp.float32)
    camera_params = jax.random.normal(k_cam, (B, CAM_DIM), jnp.float32)
    ro_train = jax.random.normal(k_ro, (B, NR, 3), jnp.float32) * 0.1
    rd = jax.random.normal(k_rd, (B, NR, 3), jnp.float32)
    rd_train = rd / jnp.linalg.norm(rd, axis=-1, keepdims=True)

    fwd = jax.jit(functools.partial(model_forward, is_train=True))
    out = fwd(pp, input_images, camera_params, ro_train, rd_train, key=k_jit)
    jax.block_until_ready(out)

    assert out['rgb_map'].shape == (B, NR, 3)
    assert out['depth_map'].shape == (B, NR)
    assert out['acc_map'].shape == (B, NR)
    assert bool(jnp.all(jnp.isfinite(out['rgb_map'])))
    print("KERNEL_OK")
</pallas_src>

<mosaic_0001>
module attributes {stable_mosaic.version = 11 : i64} {
  func.func @_encoder_decoder_kernel(%arg0: i32, %arg1: memref<1x16x48xf32, #tpu.memory_space<vmem>>, %arg2: memref<1x1x16xf32, #tpu.memory_space<vmem>>, %arg3: memref<48x32xf32, #tpu.memory_space<vmem>>, %arg4: memref<1x32xf32, #tpu.memory_space<vmem>>, %arg5: memref<16x32xf32, #tpu.memory_space<vmem>>, %arg6: memref<2x1x32xf32, #tpu.memory_space<vmem>>, %arg7: memref<2x1x32xf32, #tpu.memory_space<vmem>>, %arg8: memref<2x4x32x8xf32, #tpu.memory_space<vmem>>, %arg9: memref<2x4x1x8xf32, #tpu.memory_space<vmem>>, %arg10: memref<2x4x32x8xf32, #tpu.memory_space<vmem>>, %arg11: memref<2x4x1x8xf32, #tpu.memory_space<vmem>>, %arg12: memref<2x4x32x8xf32, #tpu.memory_space<vmem>>, %arg13: memref<2x4x1x8xf32, #tpu.memory_space<vmem>>, %arg14: memref<2x4x8x32xf32, #tpu.memory_space<vmem>>, %arg15: memref<2x1x32xf32, #tpu.memory_space<vmem>>, %arg16: memref<2x1x32xf32, #tpu.memory_space<vmem>>, %arg17: memref<2x1x32xf32, #tpu.memory_space<vmem>>, %arg18: memref<2x32x128xf32, #tpu.memory_space<vmem>>, %arg19: memref<2x1x128xf32, #tpu.memory_space<vmem>>, %arg20: memref<2x128x32xf32, #tpu.memory_space<vmem>>, %arg21: memref<2x1x32xf32, #tpu.memory_space<vmem>>, %arg22: memref<1x32xf32, #tpu.memory_space<vmem>>, %arg23: memref<1x32xf32, #tpu.memory_space<vmem>>, %arg24: memref<32x432xf32, #tpu.memory_space<vmem>>, %arg25: memref<16x432xf32, #tpu.memory_space<vmem>>, %arg26: memref<1x432xf32, #tpu.memory_space<vmem>>, %arg27: memref<1x1x432xf32, #tpu.memory_space<vmem>>) attributes {dimension_semantics = [#tpu.dimension_semantics<parallel>], iteration_bounds = array<i64: 2>, scalar_prefetch = 0 : i64, scratch_operands = 0 : i64, tpu.core_type = #tpu.core_type<tc>, window_params = [{transform_indices = @transform_0, window_bounds = array<i64: 1, 16, 48>}, {transform_indices = @transform_1, window_bounds = array<i64: 1, 1, 16>}, {pipeline_mode = #tpu.pipeline_mode<synchronous>, transform_indices = @transform_2, window_bounds = array<i64: 48, 32>}, {pipeline_mode = #tpu.pipeline_mode<synchronous>, transform_indices = @transform_3, window_bounds = array<i64: 1, 32>}, {pipeline_mode = #tpu.pipeline_mode<synchronous>, transform_indices = @transform_4, window_bounds = array<i64: 16, 32>}, {pipeline_mode = #tpu.pipeline_mode<synchronous>, transform_indices = @transform_5, window_bounds = array<i64: 2, 1, 32>}, {pipeline_mode = #tpu.pipeline_mode<synchronous>, transform_indices = @transform_6, window_bounds = array<i64: 2, 1, 32>}, {pipeline_mode = #tpu.pipeline_mode<synchronous>, transform_indices = @transform_7, window_bounds = array<i64: 2, 4, 32, 8>}, {pipeline_mode = #tpu.pipeline_mode<synchronous>, transform_indices = @transform_8, window_bounds = array<i64: 2, 4, 1, 8>}, {pipeline_mode = #tpu.pipeline_mode<synchronous>, transform_indices = @transform_9, window_bounds = array<i64: 2, 4, 32, 8>}, {pipeline_mode = #tpu.pipeline_mode<synchronous>, transform_indices = @transform_10, window_bounds = array<i64: 2, 4, 1, 8>}, {pipeline_mode = #tpu.pipeline_mode<synchronous>, transform_indices = @transform_11, window_bounds = array<i64: 2, 4, 32, 8>}, {pipeline_mode = #tpu.pipeline_mode<synchronous>, transform_indices = @transform_12, window_bounds = array<i64: 2, 4, 1, 8>}, {pipeline_mode = #tpu.pipeline_mode<synchronous>, transform_indices = @transform_13, window_bounds = array<i64: 2, 4, 8, 32>}, {pipeline_mode = #tpu.pipeline_mode<synchronous>, transform_indices = @transform_14, window_bounds = array<i64: 2, 1, 32>}, {pipeline_mode = #tpu.pipeline_mode<synchronous>, transform_indices = @transform_15, window_bounds = array<i64: 2, 1, 32>}, {pipeline_mode = #tpu.pipeline_mode<synchronous>, transform_indices = @transform_16, window_bounds = array<i64: 2, 1, 32>}, {pipeline_mode = #tpu.pipeline_mode<synchronous>, transform_indices = @transform_17, window_bounds = array<i64: 2, 32, 128>}, {pipeline_mode = #tpu.pipeline_mode<synchronous>, transform_indices = @transform_18, window_bounds = array<i64: 2, 1, 128>}, {pipeline_mode = #tpu.pipeline_mode<synchronous>, transform_indices = @transform_19, window_bounds = array<i64: 2, 128, 32>}, {pipeline_mode = #tpu.pipeline_mode<synchronous>, transform_indices = @transform_20, window_bounds = array<i64: 2, 1, 32>}, {pipeline_mode = #tpu.pipeline_mode<synchronous>, transform_indices = @transform_21, window_bounds = array<i64: 1, 32>}, {pipeline_mode = #tpu.pipeline_mode<synchronous>, transform_indices = @transform_22, window_bounds = array<i64: 1, 32>}, {pipeline_mode = #tpu.pipeline_mode<synchronous>, transform_indices = @transform_23, window_bounds = array<i64: 32, 432>}, {pipeline_mode = #tpu.pipeline_mode<synchronous>, transform_indices = @transform_24, window_bounds = array<i64: 16, 432>}, {pipeline_mode = #tpu.pipeline_mode<synchronous>, transform_indices = @transform_25, window_bounds = array<i64: 1, 432>}, {transform_indices = @transform_26, window_bounds = array<i64: 1, 1, 432>}]} {
    %c0 = arith.constant 0 : index
    %c0_0 = arith.constant 0 : index
    %c0_1 = arith.constant 0 : index
    %0 = vector.load %arg1[%c0, %c0_0, %c0_1] : memref<1x16x48xf32, #tpu.memory_space<vmem>>, vector<1x16x48xf32>
    %1 = vector.shape_cast %0 : vector<1x16x48xf32> to vector<16x48xf32>
    %c0_2 = arith.constant 0 : index
    %c0_3 = arith.constant 0 : index
    %2 = vector.load %arg3[%c0_2, %c0_3] : memref<48x32xf32, #tpu.memory_space<vmem>>, vector<48x32xf32>
    %cst = arith.constant dense<0.000000e+00> : vector<16x32xf32>
    %3 = tpu.matmul %1, %2, %cst {dimension_numbers = #tpu.dot_dimension_numbers<[1], [0], [0], [1], [0, 0, 1, 1], [], []>} : vector<16x48xf32>, vector<48x32xf32>, vector<16x32xf32> -> vector<16x32xf32>
    %c0_4 = arith.constant 0 : index
    %c0_5 = arith.constant 0 : index
    %4 = vector.load %arg4[%c0_4, %c0_5] : memref<1x32xf32, #tpu.memory_space<vmem>>, vector<1x32xf32>
    %5 = vector.broadcast %4 : vector<1x32xf32> to vector<16x32xf32>
    %6 = arith.addf %3, %5 : vector<16x32xf32>
    %c0_6 = arith.constant 0 : index
    %c0_7 = arith.constant 0 : index
    %7 = vector.load %arg5[%c0_6, %c0_7] : memref<16x32xf32, #tpu.memory_space<vmem>>, vector<16x32xf32>
    %8 = arith.addf %6, %7 : vector<16x32xf32>
    %c0_8 = arith.constant 0 : index
    %c0_9 = arith.constant 0 : index
    %c0_10 = arith.constant 0 : index
    %9 = vector.load %arg6[%c0_8, %c0_9, %c0_10] : memref<2x1x32xf32, #tpu.memory_space<vmem>>, vector<1x1x32xf32>
    %10 = vector.shape_cast %9 : vector<1x1x32xf32> to vector<1x32xf32>
    %c0_11 = arith.constant 0 : index
    %c0_12 = arith.constant 0 : index
    %c0_13 = arith.constant 0 : index
    %11 = vector.load %arg7[%c0_11, %c0_12, %c0_13] : memref<2x1x32xf32, #tpu.memory_space<vmem>>, vector<1x1x32xf32>
    %12 = vector.shape_cast %11 : vector<1x1x32xf32> to vector<1x32xf32>
    %cst_14 = arith.constant dense<0.000000e+00> : vector<16xf32>
    %13 = vector.multi_reduction <add>, %8, %cst_14 [1] : vector<16x32xf32> to vector<16xf32>
    %14 = vector.shape_cast %13 : vector<16xf32> to vector<16x1xf32>
    %cst_15 = arith.constant 3.200000e+01 : f32
    %15 = vector.broadcast %cst_15 : f32 to vector<16x1xf32>
    %16 = arith.divf %14, %15 : vector<16x1xf32>
    %17 = vector.broadcast %16 : vector<16x1xf32> to vector<16x32xf32>
    %18 = arith.subf %8, %17 : vector<16x32xf32>
    %19 = arith.mulf %18, %18 : vector<16x32xf32>
    %cst_16 = arith.constant dense<0.000000e+00> : vector<16xf32>
    %20 = vector.multi_reduction <add>, %19, %cst_16 [1] : vector<16x32xf32> to vector<16xf32>
    %21 = vector.shape_cast %20 : vector<16xf32> to vector<16x1xf32>
    %cst_17 = arith.constant 3.200000e+01 : f32
    %22 = vector.broadcast %cst_17 : f32 to vector<16x1xf32>
    %23 = arith.divf %21, %22 : vector<16x1xf32>
    %24 = vector.broadcast %16 : vector<16x1xf32> to vector<16x32xf32>
    %25 = arith.subf %8, %24 : vector<16x32xf32>
    %cst_18 = arith.constant 9.99999974E-6 : f32
    %26 = vector.broadcast %cst_18 : f32 to vector<16x1xf32>
    %27 = arith.addf %23, %26 : vector<16x1xf32>
    %28 = math.rsqrt %27 : vector<16x1xf32>
    %29 = vector.broadcast %28 : vector<16x1xf32> to vector<16x32xf32>
    %30 = arith.mulf %25, %29 : vector<16x32xf32>
    %31 = vector.broadcast %10 : vector<1x32xf32> to vector<16x32xf32>
    %32 = arith.mulf %30, %31 : vector<16x32xf32>
    %33 = vector.broadcast %12 : vector<1x32xf32> to vector<16x32xf32>
    %34 = arith.addf %32, %33 : vector<16x32xf32>
    %cst_19 = arith.constant 0.000000e+00 : f32
    %35 = vector.broadcast %cst_19 : f32 to vector<16x32xf32>
    %c0_20 = arith.constant 0 : index
    %c0_21 = arith.constant 0 : index
    %c0_22 = arith.constant 0 : index
    %c0_23 = arith.constant 0 : index
    %36 = vector.load %arg8[%c0_20, %c0_21, %c0_22, %c0_23] : memref<2x4x32x8xf32, #tpu.memory_space<vmem>>, vector<1x1x32x8xf32>
    %37 = vector.shape_cast %36 : vector<1x1x32x8xf32> to vector<32x8xf32>
    %cst_24 = arith.constant dense<0.000000e+00> : vector<16x8xf32>
    %38 = tpu.matmul %34, %37, %cst_24 {dimension_numbers = #tpu.dot_dimension_numbers<[1], [0], [0], [1], [0, 0, 1, 1], [], []>} : vector<16x32xf32>, vector<32x8xf32>, vector<16x8xf32> -> vector<16x8xf32>
    %c0_25 = arith.constant 0 : index
    %c0_26 = arith.constant 0 : index
    %c0_27 = arith.constant 0 : index
    %c0_28 = arith.constant 0 : index
    %39 = vector.load %arg9[%c0_25, %c0_26, %c0_27, %c0_28] : memref<2x4x1x8xf32, #tpu.memory_space<vmem>>, vector<1x1x1x8xf32>
    %40 = vector.shape_cast %39 : vector<1x1x1x8xf32> to vector<1x8xf32>
    %41 = vector.broadcast %40 : vector<1x8xf32> to vector<16x8xf32>
    %42 = arith.addf %38, %41 : vector<16x8xf32>
    %c0_29 = arith.constant 0 : index
    %c0_30 = arith.constant 0 : index
    %c0_31 = arith.constant 0 : index
    %c0_32 = arith.constant 0 : index
    %43 = vector.load %arg10[%c0_29, %c0_30, %c0_31, %c0_32] : memref<2x4x32x8xf32, #tpu.memory_space<vmem>>, vector<1x1x32x8xf32>
    %44 = vector.shape_cast %43 : vector<1x1x32x8xf32> to vector<32x8xf32>
    %cst_33 = arith.constant dense<0.000000e+00> : vector<16x8xf32>
    %45 = tpu.matmul %34, %44, %cst_33 {dimension_numbers = #tpu.dot_dimension_numbers<[1], [0], [0], [1], [0, 0, 1, 1], [], []>} : vector<16x32xf32>, vector<32x8xf32>, vector<16x8xf32> -> vector<16x8xf32>
    %c0_34 = arith.constant 0 : index
    %c0_35 = arith.constant 0 : index
    %c0_36 = arith.constant 0 : index
    %c0_37 = arith.constant 0 : index
    %46 = vector.load %arg11[%c0_34, %c0_35, %c0_36, %c0_37] : memref<2x4x1x8xf32, #tpu.memory_space<vmem>>, vector<1x1x1x8xf32>
    %47 = vector.shape_cast %46 : vector<1x1x1x8xf32> to vector<1x8xf32>
    %48 = vector.broadcast %47 : vector<1x8xf32> to vector<16x8xf32>
    %49 = arith.addf %45, %48 : vector<16x8xf32>
    %c0_38 = arith.constant 0 : index
    %c0_39 = arith.constant 0 : index
    %c0_40 = arith.constant 0 : index
    %c0_41 = arith.constant 0 : index
    %50 = vector.load %arg12[%c0_38, %c0_39, %c0_40, %c0_41] : memref<2x4x32x8xf32, #tpu.memory_space<vmem>>, vector<1x1x32x8xf32>
    %51 = vector.shape_cast %50 : vector<1x1x32x8xf32> to vector<32x8xf32>
    %cst_42 = arith.constant dense<0.000000e+00> : vector<16x8xf32>
    %52 = tpu.matmul %34, %51, %cst_42 {dimension_numbers = #tpu.dot_dimension_numbers<[1], [0], [0], [1], [0, 0, 1, 1], [], []>} : vector<16x32xf32>, vector<32x8xf32>, vector<16x8xf32> -> vector<16x8xf32>
    %c0_43 = arith.constant 0 : index
    %c0_44 = arith.constant 0 : index
    %c0_45 = arith.constant 0 : index
    %c0_46 = arith.constant 0 : index
    %53 = vector.load %arg13[%c0_43, %c0_44, %c0_45, %c0_46] : memref<2x4x1x8xf32, #tpu.memory_space<vmem>>, vector<1x1x1x8xf32>
    %54 = vector.shape_cast %53 : vector<1x1x1x8xf32> to vector<1x8xf32>
    %55 = vector.broadcast %54 : vector<1x8xf32> to vector<16x8xf32>
    %56 = arith.addf %52, %55 : vector<16x8xf32>
    %cst_47 = arith.constant dense<0.000000e+00> : vector<16x16xf32>
    %57 = tpu.matmul %42, %49, %cst_47 {dimension_numbers = #tpu.dot_dimension_numbers<[1], [1], [0], [0], [0, 0, 1, 0], [], []>} : vector<16x8xf32>, vector<16x8xf32>, vector<16x16xf32> -> vector<16x16xf32>
    %cst_48 = arith.constant 0.353553385 : f32
    %58 = vector.broadcast %cst_48 : f32 to vector<16x16xf32>
    %59 = arith.mulf %57, %58 : vector<16x16xf32>
    %cst_49 = arith.constant dense<0xFF800000> : vector<16xf32>
    %60 = vector.multi_reduction <maximumf>, %59, %cst_49 [1] : vector<16x16xf32> to vector<16xf32>
    %61 = vector.shape_cast %60 : vector<16xf32> to vector<16x1xf32>
    %62 = vector.broadcast %61 : vector<16x1xf32> to vector<16x16xf32>
    %63 = arith.subf %59, %62 : vector<16x16xf32>
    %64 = math.exp %63 : vector<16x16xf32>
    %cst_50 = arith.constant dense<0.000000e+00> : vector<16xf32>
    %65 = vector.multi_reduction <add>, %64, %cst_50 [1] : vector<16x16xf32> to vector<16xf32>
    %66 = vector.shape_cast %65 : vector<16xf32> to vector<16x1xf32>
    %67 = vector.broadcast %66 : vector<16x1xf32> to vector<16x16xf32>
    %68 = arith.divf %64, %67 : vector<16x16xf32>
    %cst_51 = arith.constant dense<0.000000e+00> : vector<16x8xf32>
    %69 = tpu.matmul %68, %56, %cst_51 {dimension_numbers = #tpu.dot_dimension_numbers<[1], [0], [0], [1], [0, 0, 1, 1], [], []>} : vector<16x16xf32>, vector<16x8xf32>, vector<16x8xf32> -> vector<16x8xf32>
    %c0_52 = arith.constant 0 : index
    %c0_53 = arith.constant 0 : index
    %c0_54 = arith.constant 0 : index
    %c0_55 = arith.constant 0 : index
    %70 = vector.load %arg14[%c0_52, %c0_53, %c0_54, %c0_55] : memref<2x4x8x32xf32, #tpu.memory_space<vmem>>, vector<1x1x8x32xf32>
    %71 = vector.shape_cast %70 : vector<1x1x8x32xf32> to vector<8x32xf32>
    %cst_56 = arith.constant dense<0.000000e+00> : vector<16x32xf32>
    %72 = tpu.matmul %69, %71, %cst_56 {dimension_numbers = #tpu.dot_dimension_numbers<[1], [0], [0], [1], [0, 0, 1, 1], [], []>} : vector<16x8xf32>, vector<8x32xf32>, vector<16x32xf32> -> vector<16x32xf32>
    %73 = arith.addf %35, %72 : vector<16x32xf32>
    %c0_57 = arith.constant 0 : index
    %c1 = arith.constant 1 : index
    %c0_58 = arith.constant 0 : index
    %c0_59 = arith.constant 0 : index
    %74 = vector.load %arg8[%c0_57, %c1, %c0_58, %c0_59] : memref<2x4x32x8xf32, #tpu.memory_space<vmem>>, vector<1x1x32x8xf32>
    %75 = vector.shape_cast %74 : vector<1x1x32x8xf32> to vector<32x8xf32>
    %cst_60 = arith.constant dense<0.000000e+00> : vector<16x8xf32>
    %76 = tpu.matmul %34, %75, %cst_60 {dimension_numbers = #tpu.dot_dimension_numbers<[1], [0], [0], [1], [0, 0, 1, 1], [], []>} : vector<16x32xf32>, vector<32x8xf32>, vector<16x8xf32> -> vector<16x8xf32>
    %c0_61 = arith.constant 0 : index
    %c1_62 = arith.constant 1 : index
    %c0_63 = arith.constant 0 : index
    %c0_64 = arith.constant 0 : index
    %77 = vector.load %arg9[%c0_61, %c1_62, %c0_63, %c0_64] : memref<2x4x1x8xf32, #tpu.memory_space<vmem>>, vector<1x1x1x8xf32>
    %78 = vector.shape_cast %77 : vector<1x1x1x8xf32> to vector<1x8xf32>
    %79 = vector.broadcast %78 : vector<1x8xf32> to vector<16x8xf32>
    %80 = arith.addf %76, %79 : vector<16x8xf32>
    %c0_65 = arith.constant 0 : index
    %c1_66 = arith.constant 1 : index
    %c0_67 = arith.constant 0 : index
    %c0_68 = arith.constant 0 : index
    %81 = vector.load %arg10[%c0_65, %c1_66, %c0_67, %c0_68] : memref<2x4x32x8xf32, #tpu.memory_space<vmem>>, vector<1x1x32x8xf32>
    %82 = vector.shape_cast %81 : vector<1x1x32x8xf32> to vector<32x8xf32>
    %cst_69 = arith.constant dense<0.000000e+00> : vector<16x8xf32>
    %83 = tpu.matmul %34, %82, %cst_69 {dimension_numbers = #tpu.dot_dimension_numbers<[1], [0], [0], [1], [0, 0, 1, 1], [], []>} : vector<16x32xf32>, vector<32x8xf32>, vector<16x8xf32> -> vector<16x8xf32>
    %c0_70 = arith.constant 0 : index
    %c1_71 = arith.constant 1 : index
    %c0_72 = arith.constant 0 : index
    %c0_73 = arith.constant 0 : index
    %84 = vector.load %arg11[%c0_70, %c1_71, %c0_72, %c0_73] : memref<2x4x1x8xf32, #tpu.memory_space<vmem>>, vector<1x1x1x8xf32>
    %85 = vector.shape_cast %84 : vector<1x1x1x8xf32> to vector<1x8xf32>
    %86 = vector.broadcast %85 : vector<1x8xf32> to vector<16x8xf32>
    %87 = arith.addf %83, %86 : vector<16x8xf32>
    %c0_74 = arith.constant 0 : index
    %c1_75 = arith.constant 1 : index
    %c0_76 = arith.constant 0 : index
    %c0_77 = arith.constant 0 : index
    %88 = vector.load %arg12[%c0_74, %c1_75, %c0_76, %c0_77] : memref<2x4x32x8xf32, #tpu.memory_space<vmem>>, vector<1x1x32x8xf32>
    %89 = vector.shape_cast %88 : vector<1x1x32x8xf32> to vector<32x8xf32>
    %cst_78 = arith.constant dense<0.000000e+00> : vector<16x8xf32>
    %90 = tpu.matmul %34, %89, %cst_78 {dimension_numbers = #tpu.dot_dimension_numbers<[1], [0], [0], [1], [0, 0, 1, 1], [], []>} : vector<16x32xf32>, vector<32x8xf32>, vector<16x8xf32> -> vector<16x8xf32>
    %c0_79 = arith.constant 0 : index
    %c1_80 = arith.constant 1 : index
    %c0_81 = arith.constant 0 : index
    %c0_82 = arith.constant 0 : index
    %91 = vector.load %arg13[%c0_79, %c1_80, %c0_81, %c0_82] : memref<2x4x1x8xf32, #tpu.memory_space<vmem>>, vector<1x1x1x8xf32>
    %92 = vector.shape_cast %91 : vector<1x1x1x8xf32> to vector<1x8xf32>
    %93 = vector.broadcast %92 : vector<1x8xf32> to vector<16x8xf32>
    %94 = arith.addf %90, %93 : vector<16x8xf32>
    %cst_83 = arith.constant dense<0.000000e+00> : vector<16x16xf32>
    %95 = tpu.matmul %80, %87, %cst_83 {dimension_numbers = #tpu.dot_dimension_numbers<[1], [1], [0], [0], [0, 0, 1, 0], [], []>} : vector<16x8xf32>, vector<16x8xf32>, vector<16x16xf32> -> vector<16x16xf32>
    %cst_84 = arith.constant 0.353553385 : f32
    %96 = vector.broadcast %cst_84 : f32 to vector<16x16xf32>
    %97 = arith.mulf %95, %96 : vector<16x16xf32>
    %cst_85 = arith.constant dense<0xFF800000> : vector<16xf32>
    %98 = vector.multi_reduction <maximumf>, %97, %cst_85 [1] : vector<16x16xf32> to vector<16xf32>
    %99 = vector.shape_cast %98 : vector<16xf32> to vector<16x1xf32>
    %100 = vector.broadcast %99 : vector<16x1xf32> to vector<16x16xf32>
    %101 = arith.subf %97, %100 : vector<16x16xf32>
    %102 = math.exp %101 : vector<16x16xf32>
    %cst_86 = arith.constant dense<0.000000e+00> : vector<16xf32>
    %103 = vector.multi_reduction <add>, %102, %cst_86 [1] : vector<16x16xf32> to vector<16xf32>
    %104 = vector.shape_cast %103 : vector<16xf32> to vector<16x1xf32>
    %105 = vector.broadcast %104 : vector<16x1xf32> to vector<16x16xf32>
    %106 = arith.divf %102, %105 : vector<16x16xf32>
    %cst_87 = arith.constant dense<0.000000e+00> : vector<16x8xf32>
    %107 = tpu.matmul %106, %94, %cst_87 {dimension_numbers = #tpu.dot_dimension_numbers<[1], [0], [0], [1], [0, 0, 1, 1], [], []>} : vector<16x16xf32>, vector<16x8xf32>, vector<16x8xf32> -> vector<16x8xf32>
    %c0_88 = arith.constant 0 : index
    %c1_89 = arith.constant 1 : index
    %c0_90 = arith.constant 0 : index
    %c0_91 = arith.constant 0 : index
    %108 = vector.load %arg14[%c0_88, %c1_89, %c0_90, %c0_91] : memref<2x4x8x32xf32, #tpu.memory_space<vmem>>, vector<1x1x8x32xf32>
    %109 = vector.shape_cast %108 : vector<1x1x8x32xf32> to vector<8x32xf32>
    %cst_92 = arith.constant dense<0.000000e+00> : vector<16x32xf32>
    %110 = tpu.matmul %107, %109, %cst_92 {dimension_numbers = #tpu.dot_dimension_numbers<[1], [0], [0], [1], [0, 0, 1, 1], [], []>} : vector<16x8xf32>, vector<8x32xf32>, vector<16x32xf32> -> vector<16x32xf32>
    %111 = arith.addf %73, %110 : vector<16x32xf32>
    %c0_93 = arith.constant 0 : index
    %c2 = arith.constant 2 : index
    %c0_94 = arith.constant 0 : index
    %c0_95 = arith.constant 0 : index
    %112 = vector.load %arg8[%c0_93, %c2, %c0_94, %c0_95] : memref<2x4x32x8xf32, #tpu.memory_space<vmem>>, vector<1x1x32x8xf32>
    %113 = vector.shape_cast %112 : vector<1x1x32x8xf32> to vector<32x8xf32>
    %cst_96 = arith.constant dense<0.000000e+00> : vector<16x8xf32>
    %114 = tpu.matmul %34, %113, %cst_96 {dimension_numbers = #tpu.dot_dimension_numbers<[1], [0], [0], [1], [0, 0, 1, 1], [], []>} : vector<16x32xf32>, vector<32x8xf32>, vector<16x8xf32> -> vector<16x8xf32>
    %c0_97 = arith.constant 0 : index
    %c2_98 = arith.constant 2 : index
    %c0_99 = arith.constant 0 : index
    %c0_100 = arith.constant 0 : index
    %115 = vector.load %arg9[%c0_97, %c2_98, %c0_99, %c0_100] : memref<2x4x1x8xf32, #tpu.memory_space<vmem>>, vector<1x1x1x8xf32>
    %116 = vector.shape_cast %115 : vector<1x1x1x8xf32> to vector<1x8xf32>
    %117 = vector.broadcast %116 : vector<1x8xf32> to vector<16x8xf32>
    %118 = arith.addf %114, %117 : vector<16x8xf32>
    %c0_101 = arith.constant 0 : index
    %c2_102 = arith.constant 2 : index
    %c0_103 = arith.constant 0 : index
    %c0_104 = arith.constant 0 : index
    %119 = vector.load %arg10[%c0_101, %c2_102, %c0_103, %c0_104] : memref<2x4x32x8xf32, #tpu.memory_space<vmem>>, vector<1x1x32x8xf32>
    %120 = vector.shape_cast %119 : vector<1x1x32x8xf32> to vector<32x8xf32>
    %cst_105 = arith.constant dense<0.000000e+00> : vector<16x8xf32>
    %121 = tpu.matmul %34, %120, %cst_105 {dimension_numbers = #tpu.dot_dimension_numbers<[1], [0], [0], [1], [0, 0, 1, 1], [], []>} : vector<16x32xf32>, vector<32x8xf32>, vector<16x8xf32> -> vector<16x8xf32>
    %c0_106 = arith.constant 0 : index
    %c2_107 = arith.constant 2 : index
    %c0_108 = arith.constant 0 : index
    %c0_109 = arith.constant 0 : index
    %122 = vector.load %arg11[%c0_106, %c2_107, %c0_108, %c0_109] : memref<2x4x1x8xf32, #tpu.memory_space<vmem>>, vector<1x1x1x8xf32>
    %123 = vector.shape_cast %122 : vector<1x1x1x8xf32> to vector<1x8xf32>
    %124 = vector.broadcast %123 : vector<1x8xf32> to vector<16x8xf32>
    %125 = arith.addf %121, %124 : vector<16x8xf32>
    %c0_110 = arith.constant 0 : index
    %c2_111 = arith.constant 2 : index
    %c0_112 = arith.constant 0 : index
    %c0_113 = arith.constant 0 : index
    %126 = vector.load %arg12[%c0_110, %c2_111, %c0_112, %c0_113] : memref<2x4x32x8xf32, #tpu.memory_space<vmem>>, vector<1x1x32x8xf32>
    %127 = vector.shape_cast %126 : vector<1x1x32x8xf32> to vector<32x8xf32>
    %cst_114 = arith.constant dense<0.000000e+00> : vector<16x8xf32>
    %128 = tpu.matmul %34, %127, %cst_114 {dimension_numbers = #tpu.dot_dimension_numbers<[1], [0], [0], [1], [0, 0, 1, 1], [], []>} : vector<16x32xf32>, vector<32x8xf32>, vector<16x8xf32> -> vector<16x8xf32>
    %c0_115 = arith.constant 0 : index
    %c2_116 = arith.constant 2 : index
    %c0_117 = arith.constant 0 : index
    %c0_118 = arith.constant 0 : index
    %129 = vector.load %arg13[%c0_115, %c2_116, %c0_117, %c0_118] : memref<2x4x1x8xf32, #tpu.memory_space<vmem>>, vector<1x1x1x8xf32>
    %130 = vector.shape_cast %129 : vector<1x1x1x8xf32> to vector<1x8xf32>
    %131 = vector.broadcast %130 : vector<1x8xf32> to vector<16x8xf32>
    %132 = arith.addf %128, %131 : vector<16x8xf32>
    %cst_119 = arith.constant dense<0.000000e+00> : vector<16x16xf32>
    %133 = tpu.matmul %118, %125, %cst_119 {dimension_numbers = #tpu.dot_dimension_numbers<[1], [1], [0], [0], [0, 0, 1, 0], [], []>} : vector<16x8xf32>, vector<16x8xf32>, vector<16x16xf32> -> vector<16x16xf32>
    %cst_120 = arith.constant 0.353553385 : f32
    %134 = vector.broadcast %cst_120 : f32 to vector<16x16xf32>
    %135 = arith.mulf %133, %134 : vector<16x16xf32>
    %cst_121 = arith.constant dense<0xFF800000> : vector<16xf32>
    %136 = vector.multi_reduction <maximumf>, %135, %cst_121 [1] : vector<16x16xf32> to vector<16xf32>
    %137 = vector.shape_cast %136 : vector<16xf32> to vector<16x1xf32>
    %138 = vector.broadcast %137 : vector<16x1xf32> to vector<16x16xf32>
    %139 = arith.subf %135, %138 : vector<16x16xf32>
    %140 = math.exp %139 : vector<16x16xf32>
    %cst_122 = arith.constant dense<0.000000e+00> : vector<16xf32>
    %141 = vector.multi_reduction <add>, %140, %cst_122 [1] : vector<16x16xf32> to vector<16xf32>
    %142 = vector.shape_cast %141 : vector<16xf32> to vector<16x1xf32>
    %143 = vector.broadcast %142 : vector<16x1xf32> to vector<16x16xf32>
    %144 = arith.divf %140, %143 : vector<16x16xf32>
    %cst_123 = arith.constant dense<0.000000e+00> : vector<16x8xf32>
    %145 = tpu.matmul %144, %132, %cst_123 {dimension_numbers = #tpu.dot_dimension_numbers<[1], [0], [0], [1], [0, 0, 1, 1], [], []>} : vector<16x16xf32>, vector<16x8xf32>, vector<16x8xf32> -> vector<16x8xf32>
    %c0_124 = arith.constant 0 : index
    %c2_125 = arith.constant 2 : index
    %c0_126 = arith.constant 0 : index
    %c0_127 = arith.constant 0 : index
    %146 = vector.load %arg14[%c0_124, %c2_125, %c0_126, %c0_127] : memref<2x4x8x32xf32, #tpu.memory_space<vmem>>, vector<1x1x8x32xf32>
    %147 = vector.shape_cast %146 : vector<1x1x8x32xf32> to vector<8x32xf32>
    %cst_128 = arith.constant dense<0.000000e+00> : vector<16x32xf32>
    %148 = tpu.matmul %145, %147, %cst_128 {dimension_numbers = #tpu.dot_dimension_numbers<[1], [0], [0], [1], [0, 0, 1, 1], [], []>} : vector<16x8xf32>, vector<8x32xf32>, vector<16x32xf32> -> vector<16x32xf32>
    %149 = arith.addf %111, %148 : vector<16x32xf32>
    %c0_129 = arith.constant 0 : index
    %c3 = arith.constant 3 : index
    %c0_130 = arith.constant 0 : index
    %c0_131 = arith.constant 0 : index
    %150 = vector.load %arg8[%c0_129, %c3, %c0_130, %c0_131] : memref<2x4x32x8xf32, #tpu.memory_space<vmem>>, vector<1x1x32x8xf32>
    %151 = vector.shape_cast %150 : vector<1x1x32x8xf32> to vector<32x8xf32>
    %cst_132 = arith.constant dense<0.000000e+00> : vector<16x8xf32>
    %152 = tpu.matmul %34, %151, %cst_132 {dimension_numbers = #tpu.dot_dimension_numbers<[1], [0], [0], [1], [0, 0, 1, 1], [], []>} : vector<16x32xf32>, vector<32x8xf32>, vector<16x8xf32> -> vector<16x8xf32>
    %c0_133 = arith.constant 0 : index
    %c3_134 = arith.constant 3 : index
    %c0_135 = arith.constant 0 : index
    %c0_136 = arith.constant 0 : index
    %153 = vector.load %arg9[%c0_133, %c3_134, %c0_135, %c0_136] : memref<2x4x1x8xf32, #tpu.memory_space<vmem>>, vector<1x1x1x8xf32>
    %154 = vector.shape_cast %153 : vector<1x1x1x8xf32> to vector<1x8xf32>
    %155 = vector.broadcast %154 : vector<1x8xf32> to vector<16x8xf32>
    %156 = arith.addf %152, %155 : vector<16x8xf32>
    %c0_137 = arith.constant 0 : index
    %c3_138 = arith.constant 3 : index
    %c0_139 = arith.constant 0 : index
    %c0_140 = arith.constant 0 : index
    %157 = vector.load %arg10[%c0_137, %c3_138, %c0_139, %c0_140] : memref<2x4x32x8xf32, #tpu.memory_space<vmem>>, vector<1x1x32x8xf32>
    %158 = vector.shape_cast %157 : vector<1x1x32x8xf32> to vector<32x8xf32>
    %cst_141 = arith.constant dense<0.000000e+00> : vector<16x8xf32>
    %159 = tpu.matmul %34, %158, %cst_141 {dimension_numbers = #tpu.dot_dimension_numbers<[1], [0], [0], [1], [0, 0, 1, 1], [], []>} : vector<16x32xf32>, vector<32x8xf32>, vector<16x8xf32> -> vector<16x8xf32>
    %c0_142 = arith.constant 0 : index
    %c3_143 = arith.constant 3 : index
    %c0_144 = arith.constant 0 : index
    %c0_145 = arith.constant 0 : index
    %160 = vector.load %arg11[%c0_142, %c3_143, %c0_144, %c0_145] : memref<2x4x1x8xf32, #tpu.memory_space<vmem>>, vector<1x1x1x8xf32>
    %161 = vector.shape_cast %160 : vector<1x1x1x8xf32> to vector<1x8xf32>
    %162 = vector.broadcast %161 : vector<1x8xf32> to vector<16x8xf32>
    %163 = arith.addf %159, %162 : vector<16x8xf32>
    %c0_146 = arith.constant 0 : index
    %c3_147 = arith.constant 3 : index
    %c0_148 = arith.constant 0 : index
    %c0_149 = arith.constant 0 : index
    %164 = vector.load %arg12[%c0_146, %c3_147, %c0_148, %c0_149] : memref<2x4x32x8xf32, #tpu.memory_space<vmem>>, vector<1x1x32x8xf32>
    %165 = vector.shape_cast %164 : vector<1x1x32x8xf32> to vector<32x8xf32>
    %cst_150 = arith.constant dense<0.000000e+00> : vector<16x8xf32>
    %166 = tpu.matmul %34, %165, %cst_150 {dimension_numbers = #tpu.dot_dimension_numbers<[1], [0], [0], [1], [0, 0, 1, 1], [], []>} : vector<16x32xf32>, vector<32x8xf32>, vector<16x8xf32> -> vector<16x8xf32>
    %c0_151 = arith.constant 0 : index
    %c3_152 = arith.constant 3 : index
    %c0_153 = arith.constant 0 : index
    %c0_154 = arith.constant 0 : index
    %167 = vector.load %arg13[%c0_151, %c3_152, %c0_153, %c0_154] : memref<2x4x1x8xf32, #tpu.memory_space<vmem>>, vector<1x1x1x8xf32>
    %168 = vector.shape_cast %167 : vector<1x1x1x8xf32> to vector<1x8xf32>
    %169 = vector.broadcast %168 : vector<1x8xf32> to vector<16x8xf32>
    %170 = arith.addf %166, %169 : vector<16x8xf32>
    %cst_155 = arith.constant dense<0.000000e+00> : vector<16x16xf32>
    %171 = tpu.matmul %156, %163, %cst_155 {dimension_numbers = #tpu.dot_dimension_numbers<[1], [1], [0], [0], [0, 0, 1, 0], [], []>} : vector<16x8xf32>, vector<16x8xf32>, vector<16x16xf32> -> vector<16x16xf32>
    %cst_156 = arith.constant 0.353553385 : f32
    %172 = vector.broadcast %cst_156 : f32 to vector<16x16xf32>
    %173 = arith.mulf %171, %172 : vector<16x16xf32>
    %cst_157 = arith.constant dense<0xFF800000> : vector<16xf32>
    %174 = vector.multi_reduction <maximumf>, %173, %cst_157 [1] : vector<16x16xf32> to vector<16xf32>
    %175 = vector.shape_cast %174 : vector<16xf32> to vector<16x1xf32>
    %176 = vector.broadcast %175 : vector<16x1xf32> to vector<16x16xf32>
    %177 = arith.subf %173, %176 : vector<16x16xf32>
    %178 = math.exp %177 : vector<16x16xf32>
    %cst_158 = arith.constant dense<0.000000e+00> : vector<16xf32>
    %179 = vector.multi_reduction <add>, %178, %cst_158 [1] : vector<16x16xf32> to vector<16xf32>
    %180 = vector.shape_cast %179 : vector<16xf32> to vector<16x1xf32>
    %181 = vector.broadcast %180 : vector<16x1xf32> to vector<16x16xf32>
    %182 = arith.divf %178, %181 : vector<16x16xf32>
    %cst_159 = arith.constant dense<0.000000e+00> : vector<16x8xf32>
    %183 = tpu.matmul %182, %170, %cst_159 {dimension_numbers = #tpu.dot_dimension_numbers<[1], [0], [0], [1], [0, 0, 1, 1], [], []>} : vector<16x16xf32>, vector<16x8xf32>, vector<16x8xf32> -> vector<16x8xf32>
    %c0_160 = arith.constant 0 : index
    %c3_161 = arith.constant 3 : index
    %c0_162 = arith.constant 0 : index
    %c0_163 = arith.constant 0 : index
    %184 = vector.load %arg14[%c0_160, %c3_161, %c0_162, %c0_163] : memref<2x4x8x32xf32, #tpu.memory_space<vmem>>, vector<1x1x8x32xf32>
    %185 = vector.shape_cast %184 : vector<1x1x8x32xf32> to vector<8x32xf32>
    %cst_164 = arith.constant dense<0.000000e+00> : vector<16x32xf32>
    %186 = tpu.matmul %183, %185, %cst_164 {dimension_numbers = #tpu.dot_dimension_numbers<[1], [0], [0], [1], [0, 0, 1, 1], [], []>} : vector<16x8xf32>, vector<8x32xf32>, vector<16x32xf32> -> vector<16x32xf32>
    %187 = arith.addf %149, %186 : vector<16x32xf32>
    %188 = arith.addf %8, %187 : vector<16x32xf32>
    %c0_165 = arith.constant 0 : index
    %c0_166 = arith.constant 0 : index
    %c0_167 = arith.constant 0 : index
    %189 = vector.load %arg15[%c0_165, %c0_166, %c0_167] : memref<2x1x32xf32, #tpu.memory_space<vmem>>, vector<1x1x32xf32>
    %190 = vector.shape_cast %189 : vector<1x1x32xf32> to vector<1x32xf32>
    %191 = vector.broadcast %190 : vector<1x32xf32> to vector<16x32xf32>
    %192 = arith.addf %188, %191 : vector<16x32xf32>
    %c0_168 = arith.constant 0 : index
    %c0_169 = arith.constant 0 : index
    %c0_170 = arith.constant 0 : index
    %193 = vector.load %arg16[%c0_168, %c0_169, %c0_170] : memref<2x1x32xf32, #tpu.memory_space<vmem>>, vector<1x1x32xf32>
    %194 = vector.shape_cast %193 : vector<1x1x32xf32> to vector<1x32xf32>
    %c0_171 = arith.constant 0 : index
    %c0_172 = arith.constant 0 : index
    %c0_173 = arith.constant 0 : index
    %195 = vector.load %arg17[%c0_171, %c0_172, %c0_173] : memref<2x1x32xf32, #tpu.memory_space<vmem>>, vector<1x1x32xf32>
    %196 = vector.shape_cast %195 : vector<1x1x32xf32> to vector<1x32xf32>
    %cst_174 = arith.constant dense<0.000000e+00> : vector<16xf32>
    %197 = vector.multi_reduction <add>, %192, %cst_174 [1] : vector<16x32xf32> to vector<16xf32>
    %198 = vector.shape_cast %197 : vector<16xf32> to vector<16x1xf32>
    %cst_175 = arith.constant 3.200000e+01 : f32
    %199 = vector.broadcast %cst_175 : f32 to vector<16x1xf32>
    %200 = arith.divf %198, %199 : vector<16x1xf32>
    %201 = vector.broadcast %200 : vector<16x1xf32> to vector<16x32xf32>
    %202 = arith.subf %192, %201 : vector<16x32xf32>
    %203 = arith.mulf %202, %202 : vector<16x32xf32>
    %cst_176 = arith.constant dense<0.000000e+00> : vector<16xf32>
    %204 = vector.multi_reduction <add>, %203, %cst_176 [1] : vector<16x32xf32> to vector<16xf32>
    %205 = vector.shape_cast %204 : vector<16xf32> to vector<16x1xf32>
    %cst_177 = arith.constant 3.200000e+01 : f32
    %206 = vector.broadcast %cst_177 : f32 to vector<16x1xf32>
    %207 = arith.divf %205, %206 : vector<16x1xf32>
    %208 = vector.broadcast %200 : vector<16x1xf32> to vector<16x32xf32>
    %209 = arith.subf %192, %208 : vector<16x32xf32>
    %cst_178 = arith.constant 9.99999974E-6 : f32
    %210 = vector.broadcast %cst_178 : f32 to vector<16x1xf32>
    %211 = arith.addf %207, %210 : vector<16x1xf32>
    %212 = math.rsqrt %211 : vector<16x1xf32>
    %213 = vector.broadcast %212 : vector<16x1xf32> to vector<16x32xf32>
    %214 = arith.mulf %209, %213 : vector<16x32xf32>
    %215 = vector.broadcast %194 : vector<1x32xf32> to vector<16x32xf32>
    %216 = arith.mulf %214, %215 : vector<16x32xf32>
    %217 = vector.broadcast %196 : vector<1x32xf32> to vector<16x32xf32>
    %218 = arith.addf %216, %217 : vector<16x32xf32>
    %c0_179 = arith.constant 0 : index
    %c0_180 = arith.constant 0 : index
    %c0_181 = arith.constant 0 : index
    %219 = vector.load %arg18[%c0_179, %c0_180, %c0_181] : memref<2x32x128xf32, #tpu.memory_space<vmem>>, vector<1x32x128xf32>
    %220 = vector.shape_cast %219 : vector<1x32x128xf32> to vector<32x128xf32>
    %cst_182 = arith.constant dense<0.000000e+00> : vector<16x128xf32>
    %221 = tpu.matmul %218, %220, %cst_182 {dimension_numbers = #tpu.dot_dimension_numbers<[1], [0], [0], [1], [0, 0, 1, 1], [], []>} : vector<16x32xf32>, vector<32x128xf32>, vector<16x128xf32> -> vector<16x128xf32>
    %c0_183 = arith.constant 0 : index
    %c0_184 = arith.constant 0 : index
    %c0_185 = arith.constant 0 : index
    %222 = vector.load %arg19[%c0_183, %c0_184, %c0_185] : memref<2x1x128xf32, #tpu.memory_space<vmem>>, vector<1x1x128xf32>
    %223 = vector.shape_cast %222 : vector<1x1x128xf32> to vector<1x128xf32>
    %224 = vector.broadcast %223 : vector<1x128xf32> to vector<16x128xf32>
    %225 = arith.addf %221, %224 : vector<16x128xf32>
    %226 = arith.mulf %225, %225 : vector<16x128xf32>
    %227 = arith.mulf %225, %226 : vector<16x128xf32>
    %cst_186 = arith.constant 4.471500e-02 : f32
    %228 = vector.broadcast %cst_186 : f32 to vector<16x128xf32>
    %229 = arith.mulf %228, %227 : vector<16x128xf32>
    %230 = arith.addf %225, %229 : vector<16x128xf32>
    %cst_187 = arith.constant 0.797884583 : f32
    %231 = vector.broadcast %cst_187 : f32 to vector<16x128xf32>
    %232 = arith.mulf %231, %230 : vector<16x128xf32>
    %233 = math.tanh %232 : vector<16x128xf32>
    %cst_188 = arith.constant 1.000000e+00 : f32
    %234 = vector.broadcast %cst_188 : f32 to vector<16x128xf32>
    %235 = arith.addf %234, %233 : vector<16x128xf32>
    %cst_189 = arith.constant 5.000000e-01 : f32
    %236 = vector.broadcast %cst_189 : f32 to vector<16x128xf32>
    %237 = arith.mulf %236, %235 : vector<16x128xf32>
    %238 = arith.mulf %225, %237 : vector<16x128xf32>
    %c0_190 = arith.constant 0 : index
    %c0_191 = arith.constant 0 : index
    %c0_192 = arith.constant 0 : index
    %239 = vector.load %arg20[%c0_190, %c0_191, %c0_192] : memref<2x128x32xf32, #tpu.memory_space<vmem>>, vector<1x128x32xf32>
    %240 = vector.shape_cast %239 : vector<1x128x32xf32> to vector<128x32xf32>
    %cst_193 = arith.constant dense<0.000000e+00> : vector<16x32xf32>
    %241 = tpu.matmul %238, %240, %cst_193 {dimension_numbers = #tpu.dot_dimension_numbers<[1], [0], [0], [1], [0, 0, 1, 1], [], []>} : vector<16x128xf32>, vector<128x32xf32>, vector<16x32xf32> -> vector<16x32xf32>
    %c0_194 = arith.constant 0 : index
    %c0_195 = arith.constant 0 : index
    %c0_196 = arith.constant 0 : index
    %242 = vector.load %arg21[%c0_194, %c0_195, %c0_196] : memref<2x1x32xf32, #tpu.memory_space<vmem>>, vector<1x1x32xf32>
    %243 = vector.shape_cast %242 : vector<1x1x32xf32> to vector<1x32xf32>
    %244 = vector.broadcast %243 : vector<1x32xf32> to vector<16x32xf32>
    %245 = arith.addf %241, %244 : vector<16x32xf32>
    %246 = arith.addf %192, %245 : vector<16x32xf32>
    %c1_197 = arith.constant 1 : index
    %c0_198 = arith.constant 0 : index
    %c0_199 = arith.constant 0 : index
    %247 = vector.load %arg6[%c1_197, %c0_198, %c0_199] : memref<2x1x32xf32, #tpu.memory_space<vmem>>, vector<1x1x32xf32>
    %248 = vector.shape_cast %247 : vector<1x1x32xf32> to vector<1x32xf32>
    %c1_200 = arith.constant 1 : index
    %c0_201 = arith.constant 0 : index
    %c0_202 = arith.constant 0 : index
    %249 = vector.load %arg7[%c1_200, %c0_201, %c0_202] : memref<2x1x32xf32, #tpu.memory_space<vmem>>, vector<1x1x32xf32>
    %250 = vector.shape_cast %249 : vector<1x1x32xf32> to vector<1x32xf32>
    %cst_203 = arith.constant dense<0.000000e+00> : vector<16xf32>
    %251 = vector.multi_reduction <add>, %246, %cst_203 [1] : vector<16x32xf32> to vector<16xf32>
    %252 = vector.shape_cast %251 : vector<16xf32> to vector<16x1xf32>
    %cst_204 = arith.constant 3.200000e+01 : f32
    %253 = vector.broadcast %cst_204 : f32 to vector<16x1xf32>
    %254 = arith.divf %252, %253 : vector<16x1xf32>
    %255 = vector.broadcast %254 : vector<16x1xf32> to vector<16x32xf32>
    %256 = arith.subf %246, %255 : vector<16x32xf32>
    %257 = arith.mulf %256, %256 : vector<16x32xf32>
    %cst_205 = arith.constant dense<0.000000e+00> : vector<16xf32>
    %258 = vector.multi_reduction <add>, %257, %cst_205 [1] : vector<16x32xf32> to vector<16xf32>
    %259 = vector.shape_cast %258 : vector<16xf32> to vector<16x1xf32>
    %cst_206 = arith.constant 3.200000e+01 : f32
    %260 = vector.broadcast %cst_206 : f32 to vector<16x1xf32>
    %261 = arith.divf %259, %260 : vector<16x1xf32>
    %262 = vector.broadcast %254 : vector<16x1xf32> to vector<16x32xf32>
    %263 = arith.subf %246, %262 : vector<16x32xf32>
    %cst_207 = arith.constant 9.99999974E-6 : f32
    %264 = vector.broadcast %cst_207 : f32 to vector<16x1xf32>
    %265 = arith.addf %261, %264 : vector<16x1xf32>
    %266 = math.rsqrt %265 : vector<16x1xf32>
    %267 = vector.broadcast %266 : vector<16x1xf32> to vector<16x32xf32>
    %268 = arith.mulf %263, %267 : vector<16x32xf32>
    %269 = vector.broadcast %248 : vector<1x32xf32> to vector<16x32xf32>
    %270 = arith.mulf %268, %269 : vector<16x32xf32>
    %271 = vector.broadcast %250 : vector<1x32xf32> to vector<16x32xf32>
    %272 = arith.addf %270, %271 : vector<16x32xf32>
    %cst_208 = arith.constant 0.000000e+00 : f32
    %273 = vector.broadcast %cst_208 : f32 to vector<16x32xf32>
    %c1_209 = arith.constant 1 : index
    %c0_210 = arith.constant 0 : index
    %c0_211 = arith.constant 0 : index
    %c0_212 = arith.constant 0 : index
    %274 = vector.load %arg8[%c1_209, %c0_210, %c0_211, %c0_212] : memref<2x4x32x8xf32, #tpu.memory_space<vmem>>, vector<1x1x32x8xf32>
    %275 = vector.shape_cast %274 : vector<1x1x32x8xf32> to vector<32x8xf32>
    %cst_213 = arith.constant dense<0.000000e+00> : vector<16x8xf32>
    %276 = tpu.matmul %272, %275, %cst_213 {dimension_numbers = #tpu.dot_dimension_numbers<[1], [0], [0], [1], [0, 0, 1, 1], [], []>} : vector<16x32xf32>, vector<32x8xf32>, vector<16x8xf32> -> vector<16x8xf32>
    %c1_214 = arith.constant 1 : index
    %c0_215 = arith.constant 0 : index
    %c0_216 = arith.constant 0 : index
    %c0_217 = arith.constant 0 : index
    %277 = vector.load %arg9[%c1_214, %c0_215, %c0_216, %c0_217] : memref<2x4x1x8xf32, #tpu.memory_space<vmem>>, vector<1x1x1x8xf32>
    %278 = vector.shape_cast %277 : vector<1x1x1x8xf32> to vector<1x8xf32>
    %279 = vector.broadcast %278 : vector<1x8xf32> to vector<16x8xf32>
    %280 = arith.addf %276, %279 : vector<16x8xf32>
    %c1_218 = arith.constant 1 : index
    %c0_219 = arith.constant 0 : index
    %c0_220 = arith.constant 0 : index
    %c0_221 = arith.constant 0 : index
    %281 = vector.load %arg10[%c1_218, %c0_219, %c0_220, %c0_221] : memref<2x4x32x8xf32, #tpu.memory_space<vmem>>, vector<1x1x32x8xf32>
    %282 = vector.shape_cast %281 : vector<1x1x32x8xf32> to vector<32x8xf32>
    %cst_222 = arith.constant dense<0.000000e+00> : vector<16x8xf32>
    %283 = tpu.matmul %272, %282, %cst_222 {dimension_numbers = #tpu.dot_dimension_numbers<[1], [0], [0], [1], [0, 0, 1, 1], [], []>} : vector<16x32xf32>, vector<32x8xf32>, vector<16x8xf32> -> vector<16x8xf32>
    %c1_223 = arith.constant 1 : index
    %c0_224 = arith.constant 0 : index
    %c0_225 = arith.constant 0 : index
    %c0_226 = arith.constant 0 : index
    %284 = vector.load %arg11[%c1_223, %c0_224, %c0_225, %c0_226] : memref<2x4x1x8xf32, #tpu.memory_space<vmem>>, vector<1x1x1x8xf32>
    %285 = vector.shape_cast %284 : vector<1x1x1x8xf32> to vector<1x8xf32>
    %286 = vector.broadcast %285 : vector<1x8xf32> to vector<16x8xf32>
    %287 = arith.addf %283, %286 : vector<16x8xf32>
    %c1_227 = arith.constant 1 : index
    %c0_228 = arith.constant 0 : index
    %c0_229 = arith.constant 0 : index
    %c0_230 = arith.constant 0 : index
    %288 = vector.load %arg12[%c1_227, %c0_228, %c0_229, %c0_230] : memref<2x4x32x8xf32, #tpu.memory_space<vmem>>, vector<1x1x32x8xf32>
    %289 = vector.shape_cast %288 : vector<1x1x32x8xf32> to vector<32x8xf32>
    %cst_231 = arith.constant dense<0.000000e+00> : vector<16x8xf32>
    %290 = tpu.matmul %272, %289, %cst_231 {dimension_numbers = #tpu.dot_dimension_numbers<[1], [0], [0], [1], [0, 0, 1, 1], [], []>} : vector<16x32xf32>, vector<32x8xf32>, vector<16x8xf32> -> vector<16x8xf32>
    %c1_232 = arith.constant 1 : index
    %c0_233 = arith.constant 0 : index
    %c0_234 = arith.constant 0 : index
    %c0_235 = arith.constant 0 : index
    %291 = vector.load %arg13[%c1_232, %c0_233, %c0_234, %c0_235] : memref<2x4x1x8xf32, #tpu.memory_space<vmem>>, vector<1x1x1x8xf32>
    %292 = vector.shape_cast %291 : vector<1x1x1x8xf32> to vector<1x8xf32>
    %293 = vector.broadcast %292 : vector<1x8xf32> to vector<16x8xf32>
    %294 = arith.addf %290, %293 : vector<16x8xf32>
    %cst_236 = arith.constant dense<0.000000e+00> : vector<16x16xf32>
    %295 = tpu.matmul %280, %287, %cst_236 {dimension_numbers = #tpu.dot_dimension_numbers<[1], [1], [0], [0], [0, 0, 1, 0], [], []>} : vector<16x8xf32>, vector<16x8xf32>, vector<16x16xf32> -> vector<16x16xf32>
    %cst_237 = arith.constant 0.353553385 : f32
    %296 = vector.broadcast %cst_237 : f32 to vector<16x16xf32>
    %297 = arith.mulf %295, %296 : vector<16x16xf32>
    %cst_238 = arith.constant dense<0xFF800000> : vector<16xf32>
    %298 = vector.multi_reduction <maximumf>, %297, %cst_238 [1] : vector<16x16xf32> to vector<16xf32>
    %299 = vector.shape_cast %298 : vector<16xf32> to vector<16x1xf32>
    %300 = vector.broadcast %299 : vector<16x1xf32> to vector<16x16xf32>
    %301 = arith.subf %297, %300 : vector<16x16xf32>
    %302 = math.exp %301 : vector<16x16xf32>
    %cst_239 = arith.constant dense<0.000000e+00> : vector<16xf32>
    %303 = vector.multi_reduction <add>, %302, %cst_239 [1] : vector<16x16xf32> to vector<16xf32>
    %304 = vector.shape_cast %303 : vector<16xf32> to vector<16x1xf32>
    %305 = vector.broadcast %304 : vector<16x1xf32> to vector<16x16xf32>
    %306 = arith.divf %302, %305 : vector<16x16xf32>
    %cst_240 = arith.constant dense<0.000000e+00> : vector<16x8xf32>
    %307 = tpu.matmul %306, %294, %cst_240 {dimension_numbers = #tpu.dot_dimension_numbers<[1], [0], [0], [1], [0, 0, 1, 1], [], []>} : vector<16x16xf32>, vector<16x8xf32>, vector<16x8xf32> -> vector<16x8xf32>
    %c1_241 = arith.constant 1 : index
    %c0_242 = arith.constant 0 : index
    %c0_243 = arith.constant 0 : index
    %c0_244 = arith.constant 0 : index
    %308 = vector.load %arg14[%c1_241, %c0_242, %c0_243, %c0_244] : memref<2x4x8x32xf32, #tpu.memory_space<vmem>>, vector<1x1x8x32xf32>
    %309 = vector.shape_cast %308 : vector<1x1x8x32xf32> to vector<8x32xf32>
    %cst_245 = arith.constant dense<0.000000e+00> : vector<16x32xf32>
    %310 = tpu.matmul %307, %309, %cst_245 {dimension_numbers = #tpu.dot_dimension_numbers<[1], [0], [0], [1], [0, 0, 1, 1], [], []>} : vector<16x8xf32>, vector<8x32xf32>, vector<16x32xf32> -> vector<16x32xf32>
    %311 = arith.addf %273, %310 : vector<16x32xf32>
    %c1_246 = arith.constant 1 : index
    %c1_247 = arith.constant 1 : index
    %c0_248 = arith.constant 0 : index
    %c0_249 = arith.constant 0 : index
    %312 = vector.load %arg8[%c1_246, %c1_247, %c0_248, %c0_249] : memref<2x4x32x8xf32, #tpu.memory_space<vmem>>, vector<1x1x32x8xf32>
    %313 = vector.shape_cast %312 : vector<1x1x32x8xf32> to vector<32x8xf32>
    %cst_250 = arith.constant dense<0.000000e+00> : vector<16x8xf32>
    %314 = tpu.matmul %272, %313, %cst_250 {dimension_numbers = #tpu.dot_dimension_numbers<[1], [0], [0], [1], [0, 0, 1, 1], [], []>} : vector<16x32xf32>, vector<32x8xf32>, vector<16x8xf32> -> vector<16x8xf32>
    %c1_251 = arith.constant 1 : index
    %c1_252 = arith.constant 1 : index
    %c0_253 = arith.constant 0 : index
    %c0_254 = arith.constant 0 : index
    %315 = vector.load %arg9[%c1_251, %c1_252, %c0_253, %c0_254] : memref<2x4x1x8xf32, #tpu.memory_space<vmem>>, vector<1x1x1x8xf32>
    %316 = vector.shape_cast %315 : vector<1x1x1x8xf32> to vector<1x8xf32>
    %317 = vector.broadcast %316 : vector<1x8xf32> to vector<16x8xf32>
    %318 = arith.addf %314, %317 : vector<16x8xf32>
    %c1_255 = arith.constant 1 : index
    %c1_256 = arith.constant 1 : index
    %c0_257 = arith.constant 0 : index
    %c0_258 = arith.constant 0 : index
    %319 = vector.load %arg10[%c1_255, %c1_256, %c0_257, %c0_258] : memref<2x4x32x8xf32, #tpu.memory_space<vmem>>, vector<1x1x32x8xf32>
    %320 = vector.shape_cast %319 : vector<1x1x32x8xf32> to vector<32x8xf32>
    %cst_259 = arith.constant dense<0.000000e+00> : vector<16x8xf32>
    %321 = tpu.matmul %272, %320, %cst_259 {dimension_numbers = #tpu.dot_dimension_numbers<[1], [0], [0], [1], [0, 0, 1, 1], [], []>} : vector<16x32xf32>, vector<32x8xf32>, vector<16x8xf32> -> vector<16x8xf32>
    %c1_260 = arith.constant 1 : index
    %c1_261 = arith.constant 1 : index
    %c0_262 = arith.constant 0 : index
    %c0_263 = arith.constant 0 : index
    %322 = vector.load %arg11[%c1_260, %c1_261, %c0_262, %c0_263] : memref<2x4x1x8xf32, #tpu.memory_space<vmem>>, vector<1x1x1x8xf32>
    %323 = vector.shape_cast %322 : vector<1x1x1x8xf32> to vector<1x8xf32>
    %324 = vector.broadcast %323 : vector<1x8xf32> to vector<16x8xf32>
    %325 = arith.addf %321, %324 : vector<16x8xf32>
    %c1_264 = arith.constant 1 : index
    %c1_265 = arith.constant 1 : index
    %c0_266 = arith.constant 0 : index
    %c0_267 = arith.constant 0 : index
    %326 = vector.load %arg12[%c1_264, %c1_265, %c0_266, %c0_267] : memref<2x4x32x8xf32, #tpu.memory_space<vmem>>, vector<1x1x32x8xf32>
    %327 = vector.shape_cast %326 : vector<1x1x32x8xf32> to vector<32x8xf32>
    %cst_268 = arith.constant dense<0.000000e+00> : vector<16x8xf32>
    %328 = tpu.matmul %272, %327, %cst_268 {dimension_numbers = #tpu.dot_dimension_numbers<[1], [0], [0], [1], [0, 0, 1, 1], [], []>} : vector<16x32xf32>, vector<32x8xf32>, vector<16x8xf32> -> vector<16x8xf32>
    %c1_269 = arith.constant 1 : index
    %c1_270 = arith.constant 1 : index
    %c0_271 = arith.constant 0 : index
    %c0_272 = arith.constant 0 : index
    %329 = vector.load %arg13[%c1_269, %c1_270, %c0_271, %c0_272] : memref<2x4x1x8xf32, #tpu.memory_space<vmem>>, vector<1x1x1x8xf32>
    %330 = vector.shape_cast %329 : vector<1x1x1x8xf32> to vector<1x8xf32>
    %331 = vector.broadcast %330 : vector<1x8xf32> to vector<16x8xf32>
    %332 = arith.addf %328, %331 : vector<16x8xf32>
    %cst_273 = arith.constant dense<0.000000e+00> : vector<16x16xf32>
    %333 = tpu.matmul %318, %325, %cst_273 {dimension_numbers = #tpu.dot_dimension_numbers<[1], [1], [0], [0], [0, 0, 1, 0], [], []>} : vector<16x8xf32>, vector<16x8xf32>, vector<16x16xf32> -> vector<16x16xf32>
    %cst_274 = arith.constant 0.353553385 : f32
    %334 = vector.broadcast %cst_274 : f32 to vector<16x16xf32>
    %335 = arith.mulf %333, %334 : vector<16x16xf32>
    %cst_275 = arith.constant dense<0xFF800000> : vector<16xf32>
    %336 = vector.multi_reduction <maximumf>, %335, %cst_275 [1] : vector<16x16xf32> to vector<16xf32>
    %337 = vector.shape_cast %336 : vector<16xf32> to vector<16x1xf32>
    %338 = vector.broadcast %337 : vector<16x1xf32> to vector<16x16xf32>
    %339 = arith.subf %335, %338 : vector<16x16xf32>
    %340 = math.exp %339 : vector<16x16xf32>
    %cst_276 = arith.constant dense<0.000000e+00> : vector<16xf32>
    %341 = vector.multi_reduction <add>, %340, %cst_276 [1] : vector<16x16xf32> to vector<16xf32>
    %342 = vector.shape_cast %341 : vector<16xf32> to vector<16x1xf32>
    %343 = vector.broadcast %342 : vector<16x1xf32> to vector<16x16xf32>
    %344 = arith.divf %340, %343 : vector<16x16xf32>
    %cst_277 = arith.constant dense<0.000000e+00> : vector<16x8xf32>
    %345 = tpu.matmul %344, %332, %cst_277 {dimension_numbers = #tpu.dot_dimension_numbers<[1], [0], [0], [1], [0, 0, 1, 1], [], []>} : vector<16x16xf32>, vector<16x8xf32>, vector<16x8xf32> -> vector<16x8xf32>
    %c1_278 = arith.constant 1 : index
    %c1_279 = arith.constant 1 : index
    %c0_280 = arith.constant 0 : index
    %c0_281 = arith.constant 0 : index
    %346 = vector.load %arg14[%c1_278, %c1_279, %c0_280, %c0_281] : memref<2x4x8x32xf32, #tpu.memory_space<vmem>>, vector<1x1x8x32xf32>
    %347 = vector.shape_cast %346 : vector<1x1x8x32xf32> to vector<8x32xf32>
    %cst_282 = arith.constant dense<0.000000e+00> : vector<16x32xf32>
    %348 = tpu.matmul %345, %347, %cst_282 {dimension_numbers = #tpu.dot_dimension_numbers<[1], [0], [0], [1], [0, 0, 1, 1], [], []>} : vector<16x8xf32>, vector<8x32xf32>, vector<16x32xf32> -> vector<16x32xf32>
    %349 = arith.addf %311, %348 : vector<16x32xf32>
    %c1_283 = arith.constant 1 : index
    %c2_284 = arith.constant 2 : index
    %c0_285 = arith.constant 0 : index
    %c0_286 = arith.constant 0 : index
    %350 = vector.load %arg8[%c1_283, %c2_284, %c0_285, %c0_286] : memref<2x4x32x8xf32, #tpu.memory_space<vmem>>, vector<1x1x32x8xf32>
    %351 = vector.shape_cast %350 : vector<1x1x32x8xf32> to vector<32x8xf32>
    %cst_287 = arith.constant dense<0.000000e+00> : vector<16x8xf32>
    %352 = tpu.matmul %272, %351, %cst_287 {dimension_numbers = #tpu.dot_dimension_numbers<[1], [0], [0], [1], [0, 0, 1, 1], [], []>} : vector<16x32xf32>, vector<32x8xf32>, vector<16x8xf32> -> vector<16x8xf32>
    %c1_288 = arith.constant 1 : index
    %c2_289 = arith.constant 2 : index
    %c0_290 = arith.constant 0 : index
    %c0_291 = arith.constant 0 : index
    %353 = vector.load %arg9[%c1_288, %c2_289, %c0_290, %c0_291] : memref<2x4x1x8xf32, #tpu.memory_space<vmem>>, vector<1x1x1x8xf32>
    %354 = vector.shape_cast %353 : vector<1x1x1x8xf32> to vector<1x8xf32>
    %355 = vector.broadcast %354 : vector<1x8xf32> to vector<16x8xf32>
    %356 = arith.addf %352, %355 : vector<16x8xf32>
    %c1_292 = arith.constant 1 : index
    %c2_293 = arith.constant 2 : index
    %c0_294 = arith.constant 0 : index
    %c0_295 = arith.constant 0 : index
    %357 = vector.load %arg10[%c1_292, %c2_293, %c0_294, %c0_295] : memref<2x4x32x8xf32, #tpu.memory_space<vmem>>, vector<1x1x32x8xf32>
    %358 = vector.shape_cast %357 : vector<1x1x32x8xf32> to vector<32x8xf32>
    %cst_296 = arith.constant dense<0.000000e+00> : vector<16x8xf32>
    %359 = tpu.matmul %272, %358, %cst_296 {dimension_numbers = #tpu.dot_dimension_numbers<[1], [0], [0], [1], [0, 0, 1, 1], [], []>} : vector<16x32xf32>, vector<32x8xf32>, vector<16x8xf32> -> vector<16x8xf32>
    %c1_297 = arith.constant 1 : index
    %c2_298 = arith.constant 2 : index
    %c0_299 = arith.constant 0 : index
    %c0_300 = arith.constant 0 : index
    %360 = vector.load %arg11[%c1_297, %c2_298, %c0_299, %c0_300] : memref<2x4x1x8xf32, #tpu.memory_space<vmem>>, vector<1x1x1x8xf32>
    %361 = vector.shape_cast %360 : vector<1x1x1x8xf32> to vector<1x8xf32>
    %362 = vector.broadcast %361 : vector<1x8xf32> to vector<16x8xf32>
    %363 = arith.addf %359, %362 : vector<16x8xf32>
    %c1_301 = arith.constant 1 : index
    %c2_302 = arith.constant 2 : index
    %c0_303 = arith.constant 0 : index
    %c0_304 = arith.constant 0 : index
    %364 = vector.load %arg12[%c1_301, %c2_302, %c0_303, %c0_304] : memref<2x4x32x8xf32, #tpu.memory_space<vmem>>, vector<1x1x32x8xf32>
    %365 = vector.shape_cast %364 : vector<1x1x32x8xf32> to vector<32x8xf32>
    %cst_305 = arith.constant dense<0.000000e+00> : vector<16x8xf32>
    %366 = tpu.matmul %272, %365, %cst_305 {dimension_numbers = #tpu.dot_dimension_numbers<[1], [0], [0], [1], [0, 0, 1, 1], [], []>} : vector<16x32xf32>, vector<32x8xf32>, vector<16x8xf32> -> vector<16x8xf32>
    %c1_306 = arith.constant 1 : index
    %c2_307 = arith.constant 2 : index
    %c0_308 = arith.constant 0 : index
    %c0_309 = arith.constant 0 : index
    %367 = vector.load %arg13[%c1_306, %c2_307, %c0_308, %c0_309] : memref<2x4x1x8xf32, #tpu.memory_space<vmem>>, vector<1x1x1x8xf32>
    %368 = vector.shape_cast %367 : vector<1x1x1x8xf32> to vector<1x8xf32>
    %369 = vector.broadcast %368 : vector<1x8xf32> to vector<16x8xf32>
    %370 = arith.addf %366, %369 : vector<16x8xf32>
    %cst_310 = arith.constant dense<0.000000e+00> : vector<16x16xf32>
    %371 = tpu.matmul %356, %363, %cst_310 {dimension_numbers = #tpu.dot_dimension_numbers<[1], [1], [0], [0], [0, 0, 1, 0], [], []>} : vector<16x8xf32>, vector<16x8xf32>, vector<16x16xf32> -> vector<16x16xf32>
    %cst_311 = arith.constant 0.353553385 : f32
    %372 = vector.broadcast %cst_311 : f32 to vector<16x16xf32>
    %373 = arith.mulf %371, %372 : vector<16x16xf32>
    %cst_312 = arith.constant dense<0xFF800000> : vector<16xf32>
    %374 = vector.multi_reduction <maximumf>, %373, %cst_312 [1] : vector<16x16xf32> to vector<16xf32>
    %375 = vector.shape_cast %374 : vector<16xf32> to vector<16x1xf32>
    %376 = vector.broadcast %375 : vector<16x1xf32> to vector<16x16xf32>
    %377 = arith.subf %373, %376 : vector<16x16xf32>
    %378 = math.exp %377 : vector<16x16xf32>
    %cst_313 = arith.constant dense<0.000000e+00> : vector<16xf32>
    %379 = vector.multi_reduction <add>, %378, %cst_313 [1] : vector<16x16xf32> to vector<16xf32>
    %380 = vector.shape_cast %379 : vector<16xf32> to vector<16x1xf32>
    %381 = vector.broadcast %380 : vector<16x1xf32> to vector<16x16xf32>
    %382 = arith.divf %378, %381 : vector<16x16xf32>
    %cst_314 = arith.constant dense<0.000000e+00> : vector<16x8xf32>
    %383 = tpu.matmul %382, %370, %cst_314 {dimension_numbers = #tpu.dot_dimension_numbers<[1], [0], [0], [1], [0, 0, 1, 1], [], []>} : vector<16x16xf32>, vector<16x8xf32>, vector<16x8xf32> -> vector<16x8xf32>
    %c1_315 = arith.constant 1 : index
    %c2_316 = arith.constant 2 : index
    %c0_317 = arith.constant 0 : index
    %c0_318 = arith.constant 0 : index
    %384 = vector.load %arg14[%c1_315, %c2_316, %c0_317, %c0_318] : memref<2x4x8x32xf32, #tpu.memory_space<vmem>>, vector<1x1x8x32xf32>
    %385 = vector.shape_cast %384 : vector<1x1x8x32xf32> to vector<8x32xf32>
    %cst_319 = arith.constant dense<0.000000e+00> : vector<16x32xf32>
    %386 = tpu.matmul %383, %385, %cst_319 {dimension_numbers = #tpu.dot_dimension_numbers<[1], [0], [0], [1], [0, 0, 1, 1], [], []>} : vector<16x8xf32>, vector<8x32xf32>, vector<16x32xf32> -> vector<16x32xf32>
    %387 = arith.addf %349, %386 : vector<16x32xf32>
    %c1_320 = arith.constant 1 : index
    %c3_321 = arith.constant 3 : index
    %c0_322 = arith.constant 0 : index
    %c0_323 = arith.constant 0 : index
    %388 = vector.load %arg8[%c1_320, %c3_321, %c0_322, %c0_323] : memref<2x4x32x8xf32, #tpu.memory_space<vmem>>, vector<1x1x32x8xf32>
    %389 = vector.shape_cast %388 : vector<1x1x32x8xf32> to vector<32x8xf32>
    %cst_324 = arith.constant dense<0.000000e+00> : vector<16x8xf32>
    %390 = tpu.matmul %272, %389, %cst_324 {dimension_numbers = #tpu.dot_dimension_numbers<[1], [0], [0], [1], [0, 0, 1, 1], [], []>} : vector<16x32xf32>, vector<32x8xf32>, vector<16x8xf32> -> vector<16x8xf32>
    %c1_325 = arith.constant 1 : index
    %c3_326 = arith.constant 3 : index
    %c0_327 = arith.constant 0 : index
    %c0_328 = arith.constant 0 : index
    %391 = vector.load %arg9[%c1_325, %c3_326, %c0_327, %c0_328] : memref<2x4x1x8xf32, #tpu.memory_space<vmem>>, vector<1x1x1x8xf32>
    %392 = vector.shape_cast %391 : vector<1x1x1x8xf32> to vector<1x8xf32>
    %393 = vector.broadcast %392 : vector<1x8xf32> to vector<16x8xf32>
    %394 = arith.addf %390, %393 : vector<16x8xf32>
    %c1_329 = arith.constant 1 : index
    %c3_330 = arith.constant 3 : index
    %c0_331 = arith.constant 0 : index
    %c0_332 = arith.constant 0 : index
    %395 = vector.load %arg10[%c1_329, %c3_330, %c0_331, %c0_332] : memref<2x4x32x8xf32, #tpu.memory_space<vmem>>, vector<1x1x32x8xf32>
    %396 = vector.shape_cast %395 : vector<1x1x32x8xf32> to vector<32x8xf32>
    %cst_333 = arith.constant dense<0.000000e+00> : vector<16x8xf32>
    %397 = tpu.matmul %272, %396, %cst_333 {dimension_numbers = #tpu.dot_dimension_numbers<[1], [0], [0], [1], [0, 0, 1, 1], [], []>} : vector<16x32xf32>, vector<32x8xf32>, vector<16x8xf32> -> vector<16x8xf32>
    %c1_334 = arith.constant 1 : index
    %c3_335 = arith.constant 3 : index
    %c0_336 = arith.constant 0 : index
    %c0_337 = arith.constant 0 : index
    %398 = vector.load %arg11[%c1_334, %c3_335, %c0_336, %c0_337] : memref<2x4x1x8xf32, #tpu.memory_space<vmem>>, vector<1x1x1x8xf32>
    %399 = vector.shape_cast %398 : vector<1x1x1x8xf32> to vector<1x8xf32>
    %400 = vector.broadcast %399 : vector<1x8xf32> to vector<16x8xf32>
    %401 = arith.addf %397, %400 : vector<16x8xf32>
    %c1_338 = arith.constant 1 : index
    %c3_339 = arith.constant 3 : index
    %c0_340 = arith.constant 0 : index
    %c0_341 = arith.constant 0 : index
    %402 = vector.load %arg12[%c1_338, %c3_339, %c0_340, %c0_341] : memref<2x4x32x8xf32, #tpu.memory_space<vmem>>, vector<1x1x32x8xf32>
    %403 = vector.shape_cast %402 : vector<1x1x32x8xf32> to vector<32x8xf32>
    %cst_342 = arith.constant dense<0.000000e+00> : vector<16x8xf32>
    %404 = tpu.matmul %272, %403, %cst_342 {dimension_numbers = #tpu.dot_dimension_numbers<[1], [0], [0], [1], [0, 0, 1, 1], [], []>} : vector<16x32xf32>, vector<32x8xf32>, vector<16x8xf32> -> vector<16x8xf32>
    %c1_343 = arith.constant 1 : index
    %c3_344 = arith.constant 3 : index
    %c0_345 = arith.constant 0 : index
    %c0_346 = arith.constant 0 : index
    %405 = vector.load %arg13[%c1_343, %c3_344, %c0_345, %c0_346] : memref<2x4x1x8xf32, #tpu.memory_space<vmem>>, vector<1x1x1x8xf32>
    %406 = vector.shape_cast %405 : vector<1x1x1x8xf32> to vector<1x8xf32>
    %407 = vector.broadcast %406 : vector<1x8xf32> to vector<16x8xf32>
    %408 = arith.addf %404, %407 : vector<16x8xf32>
    %cst_347 = arith.constant dense<0.000000e+00> : vector<16x16xf32>
    %409 = tpu.matmul %394, %401, %cst_347 {dimension_numbers = #tpu.dot_dimension_numbers<[1], [1], [0], [0], [0, 0, 1, 0], [], []>} : vector<16x8xf32>, vector<16x8xf32>, vector<16x16xf32> -> vector<16x16xf32>
    %cst_348 = arith.constant 0.353553385 : f32
    %410 = vector.broadcast %cst_348 : f32 to vector<16x16xf32>
    %411 = arith.mulf %409, %410 : vector<16x16xf32>
    %cst_349 = arith.constant dense<0xFF800000> : vector<16xf32>
    %412 = vector.multi_reduction <maximumf>, %411, %cst_349 [1] : vector<16x16xf32> to vector<16xf32>
    %413 = vector.shape_cast %412 : vector<16xf32> to vector<16x1xf32>
    %414 = vector.broadcast %413 : vector<16x1xf32> to vector<16x16xf32>
    %415 = arith.subf %411, %414 : vector<16x16xf32>
    %416 = math.exp %415 : vector<16x16xf32>
    %cst_350 = arith.constant dense<0.000000e+00> : vector<16xf32>
    %417 = vector.multi_reduction <add>, %416, %cst_350 [1] : vector<16x16xf32> to vector<16xf32>
    %418 = vector.shape_cast %417 : vector<16xf32> to vector<16x1xf32>
    %419 = vector.broadcast %418 : vector<16x1xf32> to vector<16x16xf32>
    %420 = arith.divf %416, %419 : vector<16x16xf32>
    %cst_351 = arith.constant dense<0.000000e+00> : vector<16x8xf32>
    %421 = tpu.matmul %420, %408, %cst_351 {dimension_numbers = #tpu.dot_dimension_numbers<[1], [0], [0], [1], [0, 0, 1, 1], [], []>} : vector<16x16xf32>, vector<16x8xf32>, vector<16x8xf32> -> vector<16x8xf32>
    %c1_352 = arith.constant 1 : index
    %c3_353 = arith.constant 3 : index
    %c0_354 = arith.constant 0 : index
    %c0_355 = arith.constant 0 : index
    %422 = vector.load %arg14[%c1_352, %c3_353, %c0_354, %c0_355] : memref<2x4x8x32xf32, #tpu.memory_space<vmem>>, vector<1x1x8x32xf32>
    %423 = vector.shape_cast %422 : vector<1x1x8x32xf32> to vector<8x32xf32>
    %cst_356 = arith.constant dense<0.000000e+00> : vector<16x32xf32>
    %424 = tpu.matmul %421, %423, %cst_356 {dimension_numbers = #tpu.dot_dimension_numbers<[1], [0], [0], [1], [0, 0, 1, 1], [], []>} : vector<16x8xf32>, vector<8x32xf32>, vector<16x32xf32> -> vector<16x32xf32>
    %425 = arith.addf %387, %424 : vector<16x32xf32>
    %426 = arith.addf %246, %425 : vector<16x32xf32>
    %c1_357 = arith.constant 1 : index
    %c0_358 = arith.constant 0 : index
    %c0_359 = arith.constant 0 : index
    %427 = vector.load %arg15[%c1_357, %c0_358, %c0_359] : memref<2x1x32xf32, #tpu.memory_space<vmem>>, vector<1x1x32xf32>
    %428 = vector.shape_cast %427 : vector<1x1x32xf32> to vector<1x32xf32>
    %429 = vector.broadcast %428 : vector<1x32xf32> to vector<16x32xf32>
    %430 = arith.addf %426, %429 : vector<16x32xf32>
    %c1_360 = arith.constant 1 : index
    %c0_361 = arith.constant 0 : index
    %c0_362 = arith.constant 0 : index
    %431 = vector.load %arg16[%c1_360, %c0_361, %c0_362] : memref<2x1x32xf32, #tpu.memory_space<vmem>>, vector<1x1x32xf32>
    %432 = vector.shape_cast %431 : vector<1x1x32xf32> to vector<1x32xf32>
    %c1_363 = arith.constant 1 : index
    %c0_364 = arith.constant 0 : index
    %c0_365 = arith.constant 0 : index
    %433 = vector.load %arg17[%c1_363, %c0_364, %c0_365] : memref<2x1x32xf32, #tpu.memory_space<vmem>>, vector<1x1x32xf32>
    %434 = vector.shape_cast %433 : vector<1x1x32xf32> to vector<1x32xf32>
    %cst_366 = arith.constant dense<0.000000e+00> : vector<16xf32>
    %435 = vector.multi_reduction <add>, %430, %cst_366 [1] : vector<16x32xf32> to vector<16xf32>
    %436 = vector.shape_cast %435 : vector<16xf32> to vector<16x1xf32>
    %cst_367 = arith.constant 3.200000e+01 : f32
    %437 = vector.broadcast %cst_367 : f32 to vector<16x1xf32>
    %438 = arith.divf %436, %437 : vector<16x1xf32>
    %439 = vector.broadcast %438 : vector<16x1xf32> to vector<16x32xf32>
    %440 = arith.subf %430, %439 : vector<16x32xf32>
    %441 = arith.mulf %440, %440 : vector<16x32xf32>
    %cst_368 = arith.constant dense<0.000000e+00> : vector<16xf32>
    %442 = vector.multi_reduction <add>, %441, %cst_368 [1] : vector<16x32xf32> to vector<16xf32>
    %443 = vector.shape_cast %442 : vector<16xf32> to vector<16x1xf32>
    %cst_369 = arith.constant 3.200000e+01 : f32
    %444 = vector.broadcast %cst_369 : f32 to vector<16x1xf32>
    %445 = arith.divf %443, %444 : vector<16x1xf32>
    %446 = vector.broadcast %438 : vector<16x1xf32> to vector<16x32xf32>
    %447 = arith.subf %430, %446 : vector<16x32xf32>
    %cst_370 = arith.constant 9.99999974E-6 : f32
    %448 = vector.broadcast %cst_370 : f32 to vector<16x1xf32>
    %449 = arith.addf %445, %448 : vector<16x1xf32>
    %450 = math.rsqrt %449 : vector<16x1xf32>
    %451 = vector.broadcast %450 : vector<16x1xf32> to vector<16x32xf32>
    %452 = arith.mulf %447, %451 : vector<16x32xf32>
    %453 = vector.broadcast %432 : vector<1x32xf32> to vector<16x32xf32>
    %454 = arith.mulf %452, %453 : vector<16x32xf32>
    %455 = vector.broadcast %434 : vector<1x32xf32> to vector<16x32xf32>
    %456 = arith.addf %454, %455 : vector<16x32xf32>
    %c1_371 = arith.constant 1 : index
    %c0_372 = arith.constant 0 : index
    %c0_373 = arith.constant 0 : index
    %457 = vector.load %arg18[%c1_371, %c0_372, %c0_373] : memref<2x32x128xf32, #tpu.memory_space<vmem>>, vector<1x32x128xf32>
    %458 = vector.shape_cast %457 : vector<1x32x128xf32> to vector<32x128xf32>
    %cst_374 = arith.constant dense<0.000000e+00> : vector<16x128xf32>
    %459 = tpu.matmul %456, %458, %cst_374 {dimension_numbers = #tpu.dot_dimension_numbers<[1], [0], [0], [1], [0, 0, 1, 1], [], []>} : vector<16x32xf32>, vector<32x128xf32>, vector<16x128xf32> -> vector<16x128xf32>
    %c1_375 = arith.constant 1 : index
    %c0_376 = arith.constant 0 : index
    %c0_377 = arith.constant 0 : index
    %460 = vector.load %arg19[%c1_375, %c0_376, %c0_377] : memref<2x1x128xf32, #tpu.memory_space<vmem>>, vector<1x1x128xf32>
    %461 = vector.shape_cast %460 : vector<1x1x128xf32> to vector<1x128xf32>
    %462 = vector.broadcast %461 : vector<1x128xf32> to vector<16x128xf32>
    %463 = arith.addf %459, %462 : vector<16x128xf32>
    %464 = arith.mulf %463, %463 : vector<16x128xf32>
    %465 = arith.mulf %463, %464 : vector<16x128xf32>
    %cst_378 = arith.constant 4.471500e-02 : f32
    %466 = vector.broadcast %cst_378 : f32 to vector<16x128xf32>
    %467 = arith.mulf %466, %465 : vector<16x128xf32>
    %468 = arith.addf %463, %467 : vector<16x128xf32>
    %cst_379 = arith.constant 0.797884583 : f32
    %469 = vector.broadcast %cst_379 : f32 to vector<16x128xf32>
    %470 = arith.mulf %469, %468 : vector<16x128xf32>
    %471 = math.tanh %470 : vector<16x128xf32>
    %cst_380 = arith.constant 1.000000e+00 : f32
    %472 = vector.broadcast %cst_380 : f32 to vector<16x128xf32>
    %473 = arith.addf %472, %471 : vector<16x128xf32>
    %cst_381 = arith.constant 5.000000e-01 : f32
    %474 = vector.broadcast %cst_381 : f32 to vector<16x128xf32>
    %475 = arith.mulf %474, %473 : vector<16x128xf32>
    %476 = arith.mulf %463, %475 : vector<16x128xf32>
    %c1_382 = arith.constant 1 : index
    %c0_383 = arith.constant 0 : index
    %c0_384 = arith.constant 0 : index
    %477 = vector.load %arg20[%c1_382, %c0_383, %c0_384] : memref<2x128x32xf32, #tpu.memory_space<vmem>>, vector<1x128x32xf32>
    %478 = vector.shape_cast %477 : vector<1x128x32xf32> to vector<128x32xf32>
    %cst_385 = arith.constant dense<0.000000e+00> : vector<16x32xf32>
    %479 = tpu.matmul %476, %478, %cst_385 {dimension_numbers = #tpu.dot_dimension_numbers<[1], [0], [0], [1], [0, 0, 1, 1], [], []>} : vector<16x128xf32>, vector<128x32xf32>, vector<16x32xf32> -> vector<16x32xf32>
    %c1_386 = arith.constant 1 : index
    %c0_387 = arith.constant 0 : index
    %c0_388 = arith.constant 0 : index
    %480 = vector.load %arg21[%c1_386, %c0_387, %c0_388] : memref<2x1x32xf32, #tpu.memory_space<vmem>>, vector<1x1x32xf32>
    %481 = vector.shape_cast %480 : vector<1x1x32xf32> to vector<1x32xf32>
    %482 = vector.broadcast %481 : vector<1x32xf32> to vector<16x32xf32>
    %483 = arith.addf %479, %482 : vector<16x32xf32>
    %484 = arith.addf %430, %483 : vector<16x32xf32>
    %c0_389 = arith.constant 0 : index
    %c0_390 = arith.constant 0 : index
    %485 = vector.load %arg22[%c0_389, %c0_390] : memref<1x32xf32, #tpu.memory_space<vmem>>, vector<1x32xf32>
    %c0_391 = arith.constant 0 : index
    %c0_392 = arith.constant 0 : index
    %486 = vector.load %arg23[%c0_391, %c0_392] : memref<1x32xf32, #tpu.memory_space<vmem>>, vector<1x32xf32>
    %cst_393 = arith.constant dense<0.000000e+00> : vector<16xf32>
    %487 = vector.multi_reduction <add>, %484, %cst_393 [1] : vector<16x32xf32> to vector<16xf32>
    %488 = vector.shape_cast %487 : vector<16xf32> to vector<16x1xf32>
    %cst_394 = arith.constant 3.200000e+01 : f32
    %489 = vector.broadcast %cst_394 : f32 to vector<16x1xf32>
    %490 = arith.divf %488, %489 : vector<16x1xf32>
    %491 = vector.broadcast %490 : vector<16x1xf32> to vector<16x32xf32>
    %492 = arith.subf %484, %491 : vector<16x32xf32>
    %493 = arith.mulf %492, %492 : vector<16x32xf32>
    %cst_395 = arith.constant dense<0.000000e+00> : vector<16xf32>
    %494 = vector.multi_reduction <add>, %493, %cst_395 [1] : vector<16x32xf32> to vector<16xf32>
    %495 = vector.shape_cast %494 : vector<16xf32> to vector<16x1xf32>
    %cst_396 = arith.constant 3.200000e+01 : f32
    %496 = vector.broadcast %cst_396 : f32 to vector<16x1xf32>
    %497 = arith.divf %495, %496 : vector<16x1xf32>
    %498 = vector.broadcast %490 : vector<16x1xf32> to vector<16x32xf32>
    %499 = arith.subf %484, %498 : vector<16x32xf32>
    %cst_397 = arith.constant 9.99999974E-6 : f32
    %500 = vector.broadcast %cst_397 : f32 to vector<16x1xf32>
    %501 = arith.addf %497, %500 : vector<16x1xf32>
    %502 = math.rsqrt %501 : vector<16x1xf32>
    %503 = vector.broadcast %502 : vector<16x1xf32> to vector<16x32xf32>
    %504 = arith.mulf %499, %503 : vector<16x32xf32>
    %505 = vector.broadcast %485 : vector<1x32xf32> to vector<16x32xf32>
    %506 = arith.mulf %504, %505 : vector<16x32xf32>
    %507 = vector.broadcast %486 : vector<1x32xf32> to vector<16x32xf32>
    %508 = arith.addf %506, %507 : vector<16x32xf32>
    %cst_398 = arith.constant dense<0.000000e+00> : vector<32xf32>
    %509 = vector.multi_reduction <add>, %508, %cst_398 [0] : vector<16x32xf32> to vector<32xf32>
    %510 = vector.shape_cast %509 : vector<32xf32> to vector<1x32xf32>
    %cst_399 = arith.constant 1.600000e+01 : f32
    %511 = vector.broadcast %cst_399 : f32 to vector<1x32xf32>
    %512 = arith.divf %510, %511 : vector<1x32xf32>
    %c0_400 = arith.constant 0 : index
    %c0_401 = arith.constant 0 : index
    %513 = vector.load %arg24[%c0_400, %c0_401] : memref<32x432xf32, #tpu.memory_space<vmem>>, vector<32x432xf32>
    %cst_402 = arith.constant dense<0.000000e+00> : vector<1x432xf32>
    %514 = tpu.matmul %512, %513, %cst_402 {dimension_numbers = #tpu.dot_dimension_numbers<[1], [0], [0], [1], [0, 0, 1, 1], [], []>} : vector<1x32xf32>, vector<32x432xf32>, vector<1x432xf32> -> vector<1x432xf32>
    %c0_403 = arith.constant 0 : index
    %c0_404 = arith.constant 0 : index
    %c0_405 = arith.constant 0 : index
    %515 = vector.load %arg2[%c0_403, %c0_404, %c0_405] : memref<1x1x16xf32, #tpu.memory_space<vmem>>, vector<1x1x16xf32>
    %516 = vector.shape_cast %515 : vector<1x1x16xf32> to vector<1x16xf32>
    %c0_406 = arith.constant 0 : index
    %c0_407 = arith.constant 0 : index
    %517 = vector.load %arg25[%c0_406, %c0_407] : memref<16x432xf32, #tpu.memory_space<vmem>>, vector<16x432xf32>
    %cst_408 = arith.constant dense<0.000000e+00> : vector<1x432xf32>
    %518 = tpu.matmul %516, %517, %cst_408 {dimension_numbers = #tpu.dot_dimension_numbers<[1], [0], [0], [1], [0, 0, 1, 1], [], []>} : vector<1x16xf32>, vector<16x432xf32>, vector<1x432xf32> -> vector<1x432xf32>
    %519 = arith.addf %514, %518 : vector<1x432xf32>
    %c0_409 = arith.constant 0 : index
    %c0_410 = arith.constant 0 : index
    %520 = vector.load %arg26[%c0_409, %c0_410] : memref<1x432xf32, #tpu.memory_space<vmem>>, vector<1x432xf32>
    %521 = arith.addf %519, %520 : vector<1x432xf32>
    %c0_411 = arith.constant 0 : index
    %c0_412 = arith.constant 0 : index
    %c0_413 = arith.constant 0 : index
    %522 = vector.load %arg27[%c0_411, %c0_412, %c0_413] : memref<1x1x432xf32, #tpu.memory_space<vmem>>, vector<1x1x432xf32>
    %523 = vector.shape_cast %522 : vector<1x1x432xf32> to vector<1x432xf32>
    %524 = vector.shape_cast %521 : vector<1x432xf32> to vector<1x1x432xf32>
    tpu.vector_store %arg27[%c0_411, %c0_412, %c0_413], %524 {strides = array<i32>} : memref<1x1x432xf32, #tpu.memory_space<vmem>>, vector<1x1x432xf32>,
    return
  }
  func.func @transform_0(%arg0: i32) -> (i32, i32, i32) {
    %c0_i32 = arith.constant 0 : i32
    %c0_i32_0 = arith.constant 0 : i32
    %c0_i32_1 = arith.constant 0 : i32
    return %arg0, %c0_i32, %c0_i32_0 : i32, i32, i32
  }
  func.func @transform_1(%arg0: i32) -> (i32, i32, i32) {
    %c0_i32 = arith.constant 0 : i32
    %c0_i32_0 = arith.constant 0 : i32
    %c0_i32_1 = arith.constant 0 : i32
    return %arg0, %c0_i32, %c0_i32_0 : i32, i32, i32
  }
  func.func @transform_2(%arg0: i32) -> (i32, i32) {
    %c0_i32 = arith.constant 0 : i32
    %c0_i32_0 = arith.constant 0 : i32
    %c0_i32_1 = arith.constant 0 : i32
    return %c0_i32, %c0_i32_0 : i32, i32
  }
  func.func @transform_3(%arg0: i32) -> (i32, i32) {
    %c0_i32 = arith.constant 0 : i32
    %c0_i32_0 = arith.constant 0 : i32
    %c0_i32_1 = arith.constant 0 : i32
    return %c0_i32, %c0_i32_0 : i32, i32
  }
  func.func @transform_4(%arg0: i32) -> (i32, i32) {
    %c0_i32 = arith.constant 0 : i32
    %c0_i32_0 = arith.constant 0 : i32
    %c0_i32_1 = arith.constant 0 : i32
    return %c0_i32, %c0_i32_0 : i32, i32
  }
  func.func @transform_5(%arg0: i32) -> (i32, i32, i32) {
    %c0_i32 = arith.constant 0 : i32
    %c0_i32_0 = arith.constant 0 : i32
    %c0_i32_1 = arith.constant 0 : i32
    %c0_i32_2 = arith.constant 0 : i32
    return %c0_i32, %c0_i32_0, %c0_i32_1 : i32, i32, i32
  }
  func.func @transform_6(%arg0: i32) -> (i32, i32, i32) {
    %c0_i32 = arith.constant 0 : i32
    %c0_i32_0 = arith.constant 0 : i32
    %c0_i32_1 = arith.constant 0 : i32
    %c0_i32_2 = arith.constant 0 : i32
    return %c0_i32, %c0_i32_0, %c0_i32_1 : i32, i32, i32
  }
  func.func @transform_7(%arg0: i32) -> (i32, i32, i32, i32) {
    %c0_i32 = arith.constant 0 : i32
    %c0_i32_0 = arith.constant 0 : i32
    %c0_i32_1 = arith.constant 0 : i32
    %c0_i32_2 = arith.constant 0 : i32
    %c0_i32_3 = arith.constant 0 : i32
    return %c0_i32, %c0_i32_0, %c0_i32_1, %c0_i32_2 : i32, i32, i32, i32
  }
  func.func @transform_8(%arg0: i32) -> (i32, i32, i32, i32) {
    %c0_i32 = arith.constant 0 : i32
    %c0_i32_0 = arith.constant 0 : i32
    %c0_i32_1 = arith.constant 0 : i32
    %c0_i32_2 = arith.constant 0 : i32
    %c0_i32_3 = arith.constant 0 : i32
    return %c0_i32, %c0_i32_0, %c0_i32_1, %c0_i32_2 : i32, i32, i32, i32
  }
  func.func @transform_9(%arg0: i32) -> (i32, i32, i32, i32) {
    %c0_i32 = arith.constant 0 : i32
    %c0_i32_0 = arith.constant 0 : i32
    %c0_i32_1 = arith.constant 0 : i32
    %c0_i32_2 = arith.constant 0 : i32
    %c0_i32_3 = arith.constant 0 : i32
    return %c0_i32, %c0_i32_0, %c0_i32_1, %c0_i32_2 : i32, i32, i32, i32
  }
  func.func @transform_10(%arg0: i32) -> (i32, i32, i32, i32) {
    %c0_i32 = arith.constant 0 : i32
    %c0_i32_0 = arith.constant 0 : i32
    %c0_i32_1 = arith.constant 0 : i32
    %c0_i32_2 = arith.constant 0 : i32
    %c0_i32_3 = arith.constant 0 : i32
    return %c0_i32, %c0_i32_0, %c0_i32_1, %c0_i32_2 : i32, i32, i32, i32
  }
  func.func @transform_11(%arg0: i32) -> (i32, i32, i32, i32) {
    %c0_i32 = arith.constant 0 : i32
    %c0_i32_0 = arith.constant 0 : i32
    %c0_i32_1 = arith.constant 0 : i32
    %c0_i32_2 = arith.constant 0 : i32
    %c0_i32_3 = arith.constant 0 : i32
    return %c0_i32, %c0_i32_0, %c0_i32_1, %c0_i32_2 : i32, i32, i32, i32
  }
  func.func @transform_12(%arg0: i32) -> (i32, i32, i32, i32) {
    %c0_i32 = arith.constant 0 : i32
    %c0_i32_0 = arith.constant 0 : i32
    %c0_i32_1 = arith.constant 0 : i32
    %c0_i32_2 = arith.constant 0 : i32
    %c0_i32_3 = arith.constant 0 : i32
    return %c0_i32, %c0_i32_0, %c0_i32_1, %c0_i32_2 : i32, i32, i32, i32
  }
  func.func @transform_13(%arg0: i32) -> (i32, i32, i32, i32) {
    %c0_i32 = arith.constant 0 : i32
    %c0_i32_0 = arith.constant 0 : i32
    %c0_i32_1 = arith.constant 0 : i32
    %c0_i32_2 = arith.constant 0 : i32
    %c0_i32_3 = arith.constant 0 : i32
    return %c0_i32, %c0_i32_0, %c0_i32_1, %c0_i32_2 : i32, i32, i32, i32
  }
  func.func @transform_14(%arg0: i32) -> (i32, i32, i32) {
    %c0_i32 = arith.constant 0 : i32
    %c0_i32_0 = arith.constant 0 : i32
    %c0_i32_1 = arith.constant 0 : i32
    %c0_i32_2 = arith.constant 0 : i32
    return %c0_i32, %c0_i32_0, %c0_i32_1 : i32, i32, i32
  }
  func.func @transform_15(%arg0: i32) -> (i32, i32, i32) {
    %c0_i32 = arith.constant 0 : i32
    %c0_i32_0 = arith.constant 0 : i32
    %c0_i32_1 = arith.constant 0 : i32
    %c0_i32_2 = arith.constant 0 : i32
    return %c0_i32, %c0_i32_0, %c0_i32_1 : i32, i32, i32
  }
  func.func @transform_16(%arg0: i32) -> (i32, i32, i32) {
    %c0_i32 = arith.constant 0 : i32
    %c0_i32_0 = arith.constant 0 : i32
    %c0_i32_1 = arith.constant 0 : i32
    %c0_i32_2 = arith.constant 0 : i32
    return %c0_i32, %c0_i32_0, %c0_i32_1 : i32, i32, i32
  }
  func.func @transform_17(%arg0: i32) -> (i32, i32, i32) {
    %c0_i32 = arith.constant 0 : i32
    %c0_i32_0 = arith.constant 0 : i32
    %c0_i32_1 = arith.constant 0 : i32
    %c0_i32_2 = arith.constant 0 : i32
    return %c0_i32, %c0_i32_0, %c0_i32_1 : i32, i32, i32
  }
  func.func @transform_18(%arg0: i32) -> (i32, i32, i32) {
    %c0_i32 = arith.constant 0 : i32
    %c0_i32_0 = arith.constant 0 : i32
    %c0_i32_1 = arith.constant 0 : i32
    %c0_i32_2 = arith.constant 0 : i32
    return %c0_i32, %c0_i32_0, %c0_i32_1 : i32, i32, i32
  }
  func.func @transform_19(%arg0: i32) -> (i32, i32, i32) {
    %c0_i32 = arith.constant 0 : i32
    %c0_i32_0 = arith.constant 0 : i32
    %c0_i32_1 = arith.constant 0 : i32
    %c0_i32_2 = arith.constant 0 : i32
    return %c0_i32, %c0_i32_0, %c0_i32_1 : i32, i32, i32
  }
  func.func @transform_20(%arg0: i32) -> (i32, i32, i32) {
    %c0_i32 = arith.constant 0 : i32
    %c0_i32_0 = arith.constant 0 : i32
    %c0_i32_1 = arith.constant 0 : i32
    %c0_i32_2 = arith.constant 0 : i32
    return %c0_i32, %c0_i32_0, %c0_i32_1 : i32, i32, i32
  }
  func.func @transform_21(%arg0: i32) -> (i32, i32) {
    %c0_i32 = arith.constant 0 : i32
    %c0_i32_0 = arith.constant 0 : i32
    %c0_i32_1 = arith.constant 0 : i32
    return %c0_i32, %c0_i32_0 : i32, i32
  }
  func.func @transform_22(%arg0: i32) -> (i32, i32) {
    %c0_i32 = arith.constant 0 : i32
    %c0_i32_0 = arith.constant 0 : i32
    %c0_i32_1 = arith.constant 0 : i32
    return %c0_i32, %c0_i32_0 : i32, i32
  }
  func.func @transform_23(%arg0: i32) -> (i32, i32) {
    %c0_i32 = arith.constant 0 : i32
    %c0_i32_0 = arith.constant 0 : i32
    %c0_i32_1 = arith.constant 0 : i32
    return %c0_i32, %c0_i32_0 : i32, i32
  }
  func.func @transform_24(%arg0: i32) -> (i32, i32) {
    %c0_i32 = arith.constant 0 : i32
    %c0_i32_0 = arith.constant 0 : i32
    %c0_i32_1 = arith.constant 0 : i32
    return %c0_i32, %c0_i32_0 : i32, i32
  }
  func.func @transform_25(%arg0: i32) -> (i32, i32) {
    %c0_i32 = arith.constant 0 : i32
    %c0_i32_0 = arith.constant 0 : i32
    %c0_i32_1 = arith.constant 0 : i32
    return %c0_i32, %c0_i32_0 : i32, i32
  }
  func.func @transform_26(%arg0: i32) -> (i32, i32, i32) {
    %c0_i32 = arith.constant 0 : i32
    %c0_i32_0 = arith.constant 0 : i32
    %c0_i32_1 = arith.constant 0 : i32
    return %arg0, %c0_i32, %c0_i32_0 : i32, i32, i32
  }
}

module attributes {stable_mosaic.version = 11 : i64} {
  func.func @_composite_kernel(%arg0: i32, %arg1: memref<1x3x64x16xf32, #tpu.memory_space<vmem>>, %arg2: memref<1x64x16xf32, #tpu.memory_space<vmem>>, %arg3: memref<1x64x16xf32, #tpu.memory_space<vmem>>, %arg4: memref<1x64x16xf32, #tpu.memory_space<vmem>>, %arg5: memref<1x64x8xf32, #tpu.memory_space<vmem>>) attributes {dimension_semantics = [#tpu.dimension_semantics<parallel>], iteration_bounds = array<i64: 2>, scalar_prefetch = 0 : i64, scratch_operands = 0 : i64, tpu.core_type = #tpu.core_type<tc>, window_params = [{transform_indices = @transform_0, window_bounds = array<i64: 1, 3, 64, 16>}, {transform_indices = @transform_1, window_bounds = array<i64: 1, 64, 16>}, {transform_indices = @transform_2, window_bounds = array<i64: 1, 64, 16>}, {transform_indices = @transform_3, window_bounds = array<i64: 1, 64, 16>}, {transform_indices = @transform_4, window_bounds = array<i64: 1, 64, 8>}]} {
    %c0 = arith.constant 0 : index
    %c0_0 = arith.constant 0 : index
    %c0_1 = arith.constant 0 : index
    %0 = vector.load %arg2[%c0, %c0_0, %c0_1] : memref<1x64x16xf32, #tpu.memory_space<vmem>>, vector<1x64x16xf32>
    %1 = vector.shape_cast %0 : vector<1x64x16xf32> to vector<64x16xf32>
    %cst = arith.constant 0.000000e+00 : f32
    %2 = vector.broadcast %cst : f32 to vector<64x16xf32>
    %3 = arith.maximumf %1, %2 : vector<64x16xf32>
    %cst_2 = arith.constant 0.000000e+00 : f32
    %4 = vector.broadcast %cst_2 : f32 to vector<64x16xf32>
    %5 = arith.subf %4, %3 : vector<64x16xf32>
    %c0_3 = arith.constant 0 : index
    %c0_4 = arith.constant 0 : index
    %c0_5 = arith.constant 0 : index
    %6 = vector.load %arg3[%c0_3, %c0_4, %c0_5] : memref<1x64x16xf32, #tpu.memory_space<vmem>>, vector<1x64x16xf32>
    %7 = vector.shape_cast %6 : vector<1x64x16xf32> to vector<64x16xf32>
    %8 = arith.mulf %5, %7 : vector<64x16xf32>
    %9 = math.exp %8 : vector<64x16xf32>
    %cst_6 = arith.constant 1.000000e+00 : f32
    %10 = vector.broadcast %cst_6 : f32 to vector<64x16xf32>
    %11 = arith.subf %10, %9 : vector<64x16xf32>
    %cst_7 = arith.constant 1.000000e+00 : f32
    %12 = vector.broadcast %cst_7 : f32 to vector<64x16xf32>
    %13 = arith.subf %12, %11 : vector<64x16xf32>
    %cst_8 = arith.constant 1.000000e-10 : f32
    %cst_9 = arith.constant 1.000000e+00 : f32
    %14 = vector.broadcast %cst_8 : f32 to vector<64x16xf32>
    %15 = arith.maximumf %14, %13 : vector<64x16xf32>
    %16 = vector.broadcast %cst_9 : f32 to vector<64x16xf32>
    %17 = arith.minimumf %16, %15 : vector<64x16xf32>
    %18 = math.log %17 : vector<64x16xf32>
    %19 = tpu.iota {dimensions = array<i32: 0>} : vector<16x16xi32>
    %20 = tpu.iota {dimensions = array<i32: 1>} : vector<16x16xi32>
    %21 = arith.cmpi slt, %19, %20 : vector<16x16xi32>
    %22 = arith.extui %21 : vector<16x16xi1> to vector<16x16xi32>
    %23 = arith.sitofp %22 : vector<16x16xi32> to vector<16x16xf32>
    %cst_10 = arith.constant dense<0.000000e+00> : vector<64x16xf32>
    %24 = tpu.matmul %18, %23, %cst_10 {dimension_numbers = #tpu.dot_dimension_numbers<[1], [0], [0], [1], [0, 0, 1, 1], [], []>} : vector<64x16xf32>, vector<16x16xf32>, vector<64x16xf32> -> vector<64x16xf32>
    %25 = math.exp %24 : vector<64x16xf32>
    %26 = arith.mulf %11, %25 : vector<64x16xf32>
    %cst_11 = arith.constant dense<0.000000e+00> : vector<64xf32>
    %27 = vector.multi_reduction <add>, %26, %cst_11 [1] : vector<64x16xf32> to vector<64xf32>
    %28 = vector.shape_cast %27 : vector<64xf32> to vector<64x1xf32>
    %c0_12 = arith.constant 0 : index
    %c0_13 = arith.constant 0 : index
    %c0_14 = arith.constant 0 : index
    %29 = vector.load %arg4[%c0_12, %c0_13, %c0_14] : memref<1x64x16xf32, #tpu.memory_space<vmem>>, vector<1x64x16xf32>
    %30 = vector.shape_cast %29 : vector<1x64x16xf32> to vector<64x16xf32>
    %31 = arith.mulf %26, %30 : vector<64x16xf32>
    %cst_15 = arith.constant dense<0.000000e+00> : vector<64xf32>
    %32 = vector.multi_reduction <add>, %31, %cst_15 [1] : vector<64x16xf32> to vector<64xf32>
    %33 = vector.shape_cast %32 : vector<64xf32> to vector<64x1xf32>
    %cst_16 = arith.constant 1.000000e+00 : f32
    %34 = vector.broadcast %cst_16 : f32 to vector<64x1xf32>
    %35 = arith.subf %34, %28 : vector<64x1xf32>
    %36 = tpu.iota {dimensions = array<i32: 1>} : vector<64x8xi32>
    %c3_i32 = arith.constant 3 : i32
    %37 = vector.broadcast %c3_i32 : i32 to vector<64x8xi32>
    %38 = arith.cmpi eq, %36, %37 : vector<64x8xi32>
    %cst_17 = arith.constant 0.000000e+00 : f32
    %39 = vector.shape_cast %33 : vector<64x1xf32> to vector<64x1xf32>
    %40 = vector.broadcast %39 : vector<64x1xf32> to vector<64x8xf32>
    %41 = vector.broadcast %cst_17 : f32 to vector<64x8xf32>
    %42 = arith.select %38, %40, %41 : vector<64x8xi1>, vector<64x8xf32>
    %c4_i32 = arith.constant 4 : i32
    %43 = vector.broadcast %c4_i32 : i32 to vector<64x8xi32>
    %44 = arith.cmpi eq, %36, %43 : vector<64x8xi32>
    %cst_18 = arith.constant 0.000000e+00 : f32
    %45 = vector.shape_cast %28 : vector<64x1xf32> to vector<64x1xf32>
    %46 = vector.broadcast %45 : vector<64x1xf32> to vector<64x8xf32>
    %47 = vector.broadcast %cst_18 : f32 to vector<64x8xf32>
    %48 = arith.select %44, %46, %47 : vector<64x8xi1>, vector<64x8xf32>
    %49 = arith.addf %42, %48 : vector<64x8xf32>
    %c0_19 = arith.constant 0 : index
    %c0_20 = arith.constant 0 : index
    %c0_21 = arith.constant 0 : index
    %c0_22 = arith.constant 0 : index
    %50 = vector.load %arg1[%c0_19, %c0_20, %c0_21, %c0_22] : memref<1x3x64x16xf32, #tpu.memory_space<vmem>>, vector<1x1x64x16xf32>
    %51 = vector.shape_cast %50 : vector<1x1x64x16xf32> to vector<64x16xf32>
    %52 = arith.negf %51 : vector<64x16xf32>
    %53 = math.exp %52 : vector<64x16xf32>
    %cst_23 = arith.constant 1.000000e+00 : f32
    %54 = vector.broadcast %cst_23 : f32 to vector<64x16xf32>
    %55 = arith.addf %54, %53 : vector<64x16xf32>
    %56 = arith.divf %54, %55 : vector<64x16xf32>
    %57 = arith.mulf %26, %56 : vector<64x16xf32>
    %cst_24 = arith.constant dense<0.000000e+00> : vector<64xf32>
    %58 = vector.multi_reduction <add>, %57, %cst_24 [1] : vector<64x16xf32> to vector<64xf32>
    %59 = vector.shape_cast %58 : vector<64xf32> to vector<64x1xf32>
    %60 = arith.addf %59, %35 : vector<64x1xf32>
    %c0_i32 = arith.constant 0 : i32
    %61 = vector.broadcast %c0_i32 : i32 to vector<64x8xi32>
    %62 = arith.cmpi eq, %36, %61 : vector<64x8xi32>
    %cst_25 = arith.constant 0.000000e+00 : f32
    %63 = vector.shape_cast %60 : vector<64x1xf32> to vector<64x1xf32>
    %64 = vector.broadcast %63 : vector<64x1xf32> to vector<64x8xf32>
    %65 = vector.broadcast %cst_25 : f32 to vector<64x8xf32>
    %66 = arith.select %62, %64, %65 : vector<64x8xi1>, vector<64x8xf32>
    %67 = arith.addf %49, %66 : vector<64x8xf32>
    %c0_26 = arith.constant 0 : index
    %c1 = arith.constant 1 : index
    %c0_27 = arith.constant 0 : index
    %c0_28 = arith.constant 0 : index
    %68 = vector.load %arg1[%c0_26, %c1, %c0_27, %c0_28] : memref<1x3x64x16xf32, #tpu.memory_space<vmem>>, vector<1x1x64x16xf32>
    %69 = vector.shape_cast %68 : vector<1x1x64x16xf32> to vector<64x16xf32>
    %70 = arith.negf %69 : vector<64x16xf32>
    %71 = math.exp %70 : vector<64x16xf32>
    %cst_29 = arith.constant 1.000000e+00 : f32
    %72 = vector.broadcast %cst_29 : f32 to vector<64x16xf32>
    %73 = arith.addf %72, %71 : vector<64x16xf32>
    %74 = arith.divf %72, %73 : vector<64x16xf32>
    %75 = arith.mulf %26, %74 : vector<64x16xf32>
    %cst_30 = arith.constant dense<0.000000e+00> : vector<64xf32>
    %76 = vector.multi_reduction <add>, %75, %cst_30 [1] : vector<64x16xf32> to vector<64xf32>
    %77 = vector.shape_cast %76 : vector<64xf32> to vector<64x1xf32>
    %78 = arith.addf %77, %35 : vector<64x1xf32>
    %c1_i32 = arith.constant 1 : i32
    %79 = vector.broadcast %c1_i32 : i32 to vector<64x8xi32>
    %80 = arith.cmpi eq, %36, %79 : vector<64x8xi32>
    %cst_31 = arith.constant 0.000000e+00 : f32
    %81 = vector.shape_cast %78 : vector<64x1xf32> to vector<64x1xf32>
    %82 = vector.broadcast %81 : vector<64x1xf32> to vector<64x8xf32>
    %83 = vector.broadcast %cst_31 : f32 to vector<64x8xf32>
    %84 = arith.select %80, %82, %83 : vector<64x8xi1>, vector<64x8xf32>
    %85 = arith.addf %67, %84 : vector<64x8xf32>
    %c0_32 = arith.constant 0 : index
    %c2 = arith.constant 2 : index
    %c0_33 = arith.constant 0 : index
    %c0_34 = arith.constant 0 : index
    %86 = vector.load %arg1[%c0_32, %c2, %c0_33, %c0_34] : memref<1x3x64x16xf32, #tpu.memory_space<vmem>>, vector<1x1x64x16xf32>
    %87 = vector.shape_cast %86 : vector<1x1x64x16xf32> to vector<64x16xf32>
    %88 = arith.negf %87 : vector<64x16xf32>
    %89 = math.exp %88 : vector<64x16xf32>
    %cst_35 = arith.constant 1.000000e+00 : f32
    %90 = vector.broadcast %cst_35 : f32 to vector<64x16xf32>
    %91 = arith.addf %90, %89 : vector<64x16xf32>
    %92 = arith.divf %90, %91 : vector<64x16xf32>
    %93 = arith.mulf %26, %92 : vector<64x16xf32>
    %cst_36 = arith.constant dense<0.000000e+00> : vector<64xf32>
    %94 = vector.multi_reduction <add>, %93, %cst_36 [1] : vector<64x16xf32> to vector<64xf32>
    %95 = vector.shape_cast %94 : vector<64xf32> to vector<64x1xf32>
    %96 = arith.addf %95, %35 : vector<64x1xf32>
    %c2_i32 = arith.constant 2 : i32
    %97 = vector.broadcast %c2_i32 : i32 to vector<64x8xi32>
    %98 = arith.cmpi eq, %36, %97 : vector<64x8xi32>
    %cst_37 = arith.constant 0.000000e+00 : f32
    %99 = vector.shape_cast %96 : vector<64x1xf32> to vector<64x1xf32>
    %100 = vector.broadcast %99 : vector<64x1xf32> to vector<64x8xf32>
    %101 = vector.broadcast %cst_37 : f32 to vector<64x8xf32>
    %102 = arith.select %98, %100, %101 : vector<64x8xi1>, vector<64x8xf32>
    %103 = arith.addf %85, %102 : vector<64x8xf32>
    %c0_38 = arith.constant 0 : index
    %c0_39 = arith.constant 0 : index
    %c0_40 = arith.constant 0 : index
    %104 = vector.load %arg5[%c0_38, %c0_39, %c0_40] : memref<1x64x8xf32, #tpu.memory_space<vmem>>, vector<1x64x8xf32>
    %105 = vector.shape_cast %104 : vector<1x64x8xf32> to vector<64x8xf32>
    %106 = vector.shape_cast %103 : vector<64x8xf32> to vector<1x64x8xf32>
    tpu.vector_store %arg5[%c0_38, %c0_39, %c0_40], %106 {strides = array<i32>} : memref<1x64x8xf32, #tpu.memory_space<vmem>>, vector<1x64x8xf32>,
    return
  }
  func.func @transform_0(%arg0: i32) -> (i32, i32, i32, i32) {
    %c0_i32 = arith.constant 0 : i32
    %c0_i32_0 = arith.constant 0 : i32
    %c0_i32_1 = arith.constant 0 : i32
    %c0_i32_2 = arith.constant 0 : i32
    return %arg0, %c0_i32, %c0_i32_0, %c0_i32_1 : i32, i32, i32, i32
  }
  func.func @transform_1(%arg0: i32) -> (i32, i32, i32) {
    %c0_i32 = arith.constant 0 : i32
    %c0_i32_0 = arith.constant 0 : i32
    %c0_i32_1 = arith.constant 0 : i32
    return %arg0, %c0_i32, %c0_i32_0 : i32, i32, i32
  }
  func.func @transform_2(%arg0: i32) -> (i32, i32, i32) {
    %c0_i32 = arith.constant 0 : i32
    %c0_i32_0 = arith.constant 0 : i32
    %c0_i32_1 = arith.constant 0 : i32
    return %arg0, %c0_i32, %c0_i32_0 : i32, i32, i32
  }
  func.func @transform_3(%arg0: i32) -> (i32, i32, i32) {
    %c0_i32 = arith.constant 0 : i32
    %c0_i32_0 = arith.constant 0 : i32
    %c0_i32_1 = arith.constant 0 : i32
    return %arg0, %c0_i32, %c0_i32_0 : i32, i32, i32
  }
  func.func @transform_4(%arg0: i32) -> (i32, i32, i32) {
    %c0_i32 = arith.constant 0 : i32
    %c0_i32_0 = arith.constant 0 : i32
    %c0_i32_1 = arith.constant 0 : i32
    return %arg0, %c0_i32, %c0_i32_0 : i32, i32, i32
  }
}

</mosaic_0001>

<bundles_post_ra>
// kernel: model_forward.2
= control target key start
LH: loop header
LB: loop body
LE: loop exit
PB: predicated region body
PF: predicated region fallthrough
CT: control target
= control target key end

     0   :  { %s4201_s27 = smov 0   ;;  %s5241_s0 = inlined_call_operand.vmem [shape: f32[2,16,48], index: 0, kind: input, shape index: {}]   ;;  %s5242_s1 = inlined_call_operand.vmem [shape: f32[2,1,16], index: 1, kind: input, shape index: {}]   ;;  %s5243_s2 = inlined_call_operand.vmem [shape: f32[48,32], index: 2, kind: input, shape index: {}]   ;;  %s5244_s3 = inlined_call_operand.vmem [shape: f32[1,32], index: 3, kind: input, shape index: {}]   ;;  %s5245_s4 = inlined_call_operand.vmem [shape: f32[16,32], index: 4, kind: input, shape index: {}]   ;;  %s5246_s5 = inlined_call_operand.vmem [shape: f32[2,1,32], index: 5, kind: input, shape index: {}]   ;;  %s5247_s6 = inlined_call_operand.vmem [shape: f32[2,1,32], index: 6, kind: input, shape index: {}]   ;;  %s5248_s7 = inlined_call_operand.vmem [shape: f32[2,4,32,8], index: 7, kind: input, shape index: {}]   ;;  %s5249_s8 = inlined_call_operand.vmem [shape: f32[2,4,1,8], index: 8, kind: input, shape index: {}]   ;;  %s5250_s9 = inlined_call_operand.vmem [shape: f32[2,4,32,8], index: 9, kind: input, shape index: {}]   ;;  %s5251_s10 = inlined_call_operand.vmem [shape: f32[2,4,1,8], index: 10, kind: input, shape index: {}]   ;;  %s5252_s11 = inlined_call_operand.vmem [shape: f32[2,4,32,8], index: 11, kind: input, shape index: {}]   ;;  %s5253_s12 = inlined_call_operand.vmem [shape: f32[2,4,1,8], index: 12, kind: input, shape index: {}]   ;;  %s5254_s13 = inlined_call_operand.vmem [shape: f32[2,4,8,32], index: 13, kind: input, shape index: {}]   ;;  %s5255_s14 = inlined_call_operand.vmem [shape: f32[2,1,32], index: 14, kind: input, shape index: {}]   ;;  %s5256_s15 = inlined_call_operand.vmem [shape: f32[2,1,32], index: 15, kind: input, shape index: {}]   ;;  %s5257_s16 = inlined_call_operand.vmem [shape: f32[2,1,32], index: 16, kind: input, shape index: {}]   ;;  %s5258_s17 = inlined_call_operand.vmem [shape: f32[2,32,128], index: 17, kind: input, shape index: {}]   ;;  %s5259_s18 = inlined_call_operand.vmem [shape: f32[2,1,128], index: 18, kind: input, shape index: {}]   ;;  %s5260_s19 = inlined_call_operand.vmem [shape: f32[2,128,32], index: 19, kind: input, shape index: {}]   ;;  %s5261_s20 = inlined_call_operand.vmem [shape: f32[2,1,32], index: 20, kind: input, shape index: {}]   ;;  %s5262_s21 = inlined_call_operand.vmem [shape: f32[1,32], index: 21, kind: input, shape index: {}]   ;;  %s5263_s22 = inlined_call_operand.vmem [shape: f32[1,32], index: 22, kind: input, shape index: {}]   ;;  %s5264_s23 = inlined_call_operand.vmem [shape: f32[32,432], index: 23, kind: input, shape index: {}]   ;;  %s5265_s24 = inlined_call_operand.vmem [shape: f32[16,432], index: 24, kind: input, shape index: {}]   ;;  %s5266_s25 = inlined_call_operand.vmem [shape: f32[1,432], index: 25, kind: input, shape index: {}]   ;;  %s5267_s26 = inlined_call_operand.vmem [shape: f32[2,1,432], index: 26, kind: output, shape index: {}]  }
   0x1   :  { %5281 = sst [smem:[#allocation3_spill]] %s5241_s0 }
   0x2   :  { %5282 = sst [smem:[#allocation4_spill]] %s5242_s1 }
   0x3   :  { %5283 = sst [smem:[#allocation5_spill]] %s5243_s2 }
   0x4   :  { %5284 = sst [smem:[#allocation6_spill]] %s5244_s3 }
   0x5   :  { %5285 = sst [smem:[#allocation7_spill]] %s5245_s4 }
   0x6   :  { %5286 = sst [smem:[#allocation8_spill]] %s5246_s5 }
   0x7   :  { %5287 = sst [smem:[#allocation9_spill]] %s5247_s6 }
   0x8   :  { %5288 = sst [smem:[#allocation10_spill]] %s5248_s7 }
   0x9   :  { %5289 = sst [smem:[#allocation11_spill]] %s5249_s8 }
   0xa   :  { %5290 = sst [smem:[#allocation12_spill]] %s5250_s9 }
   0xb   :  { %5291 = sst [smem:[#allocation13_spill]] %s5251_s10 }
   0xc   :  { %5292 = sst [smem:[#allocation14_spill]] %s5266_s25 }
   0xd   :  { %5293 = sst [smem:[#allocation15_spill]] %s5267_s26 }
   0xe LB: > { %5294 = sst [smem:[#allocation2_spill]] %s4062_s27  ;;  %s3633_s3 = sadd.s32 4294967295, %s4062_s27   ;;  %s4062_s27 = sphi %s4201_s27, %s36_s27  }
   0xf   : > { %p3637_p0 = scmp.ge.s32.totalorder %s4062_s27, 1  ;;  %p720_p1 = scmp.lt.s32.totalorder %s4062_s27, 3 }
  0x11   : > { %p721_p2 = pnand %p3637_p0, %p720_p1 }
  0x12   : > { %s5295_s8 = sld [smem:[#allocation5_spill]] (!%p721_p2)  ;;  %p792_p3 = scmp.lt.s32.totalorder (!%p721_p2), %s3633_s3, 1 }
  0x13   : > { %724 = sbr.rel (%p721_p2) target bundleno = 6874 (0x1ada), region = 124  ;;  %s5296_s1 = sld [smem:[#allocation3_spill]] (!%p721_p2) }
  0x14   : > { %s5297_s2 = sld [smem:[#allocation6_spill]] (!%p721_p2) }
  0x15   : > { %s5298_s6 = sld [smem:[#allocation7_spill]] (!%p721_p2) }
  0x16   : > { %s5299_s29 = sld [smem:[#allocation10_spill]] (!%p721_p2) }
  0x17   : > { %s5300_s30 = sld [smem:[#allocation12_spill]] (!%p721_p2) }
  0x18   : > { %v811_v0 = vld [vmem:[%s5295_s8 + $0x28] sm:$0xff]  ;;  %v810_v1 = vld [vmem:[%s5295_s8 + $0x20] sm:$0xff]  ;;  %v809_v2 = vld [vmem:[%s5295_s8 + $0x18] sm:$0xff]  ;;  %s5310_s3 = smov (!%p792_p3, %s3633_s3), 1  ;;  %vm816_vm0 = vcmask 392192   ;;  %vm852_vm1 = vcmask 261120  }
  0x19   : > { %833 = vmatpush.msra.mxu0 %v811_v0  ;;  %v808_v3 = vld [vmem:[%s5295_s8 + $0x10] sm:$0xff]  ;;  %s3908_s5 = sshll.u32 %s5310_s3, 4  ;;  %v807_v4 = vld [vmem:[%s5295_s8 + $0x8] sm:$0xff]  ;;  %v806_v5 = vld [vmem:[%s5295_s8] sm:$0xff]  ;;  %v4064_v19 = vmov 32.0   ;;  %s5301_s0 = sld [smem:[#allocation8_spill]] }
  0x1a   : > { %s796_s7 = scalar_lea.vmem %s5296_s1, %s3908_s5  ;;  %v3919_v8 = vld [vmem:[%s5297_s2] ss:$0 sm:$0xff]  ;;  %3960 = vrcp.f32 %v4064_v19  ;;  %v985_v38 = vld [vmem:[%s5252_s11 + $0x18] sm:$0xff]  ;;  %v984_v42 = vld [vmem:[%s5252_s11 + $0x10] sm:$0xff]  ;;  %s5302_s5 = sld [smem:[#allocation9_spill]]  ;;  %vm1013_vm9 = vcmask 64512  }
  0x1b   : > { %834 = vmatpush.msra.mxu0 %v810_v1  ;;  %v804_v6 = vld [vmem:[%s796_s7] sm:$0xff]  ;;  %v805_v7 = vld [vmem:[%s796_s7 + $0x8] sm:$0xff]  ;;  %1002 = vmatpush.msra.mxu3 %v985_v38  ;;  %s5304_s1 = sld [smem:[#allocation11_spill]]  ;;  %vm1051_vm10 = vcmask 130048   ;;  %s3640_s8 = sshll.u32 %s5310_s3, 2 }
  0x1c   : > { %v846_v10 = vld [vmem:[%s5298_s6] sm:$0xff]  ;;  %v847_v15 = vld [vmem:[%s5298_s6 + $0x8] sm:$0xff]  ;;  %v917_v36 = vld [vmem:[%s5299_s29 + $0x18] sm:$0xff]  ;;  %s5303_s6 = sld [smem:[#allocation13_spill]] }
  0x1d   : > { %835 = vmatpush.msra.mxu0 %v809_v2  ;;  %v954_v37 = vld [vmem:[%s5300_s30 + $0x18] sm:$0xff]  ;;  %940 = vmatpush.msra.mxu1 %v917_v36  ;;  %v916_v40 = vld [vmem:[%s5299_s29 + $0x10] sm:$0xff]  ;;  %v915_v44 = vld [vmem:[%s5299_s29 + $0x8] sm:$0xff]  ;;  %s5305_s4 = sld [smem:[#allocation4_spill]] }
  0x1e   : > { %971 = vmatpush.msra.mxu2 %v954_v37  ;;  %v3665_v39 = vld [vmem:[%s5300_s30 + $0x38] sm:$0xff]  ;;  %v953_v41 = vld [vmem:[%s5300_s30 + $0x10] sm:$0xff]  ;;  %1003 = vmatpush.msra.mxu3 %v984_v42  ;;  %v952_v45 = vld [vmem:[%s5300_s30 + $0x8] sm:$0xff]  ;;  %s5306_s27 = sld [smem:[#allocation14_spill]] }
  0x1f   : > { %836 = vmatpush.msra.mxu0 %v808_v3  ;;  %941 = vmatpush.msra.mxu1 %v916_v40  ;;  %v3664_v43 = vld [vmem:[%s5300_s30 + $0x30] sm:$0xff]  ;;  %v983_v46 = vld [vmem:[%s5252_s11 + $0x8] sm:$0xff]  ;;  %v914_v48 = vld [vmem:[%s5299_s29] sm:$0xff]  ;;  %s5307_s7 = sld [smem:[#allocation15_spill]] }
  0x20   : > { %v3961_v20 = vpop.eup %3960  ;;  %972 = vmatpush.msra.mxu2 %v953_v41  ;;  %v3663_v47 = vld [vmem:[%s5300_s30 + $0x28] sm:$0xff]  ;;  %1004 = vmatpush.msra.mxu3 %v983_v46  ;;  %v951_v49 = vld [vmem:[%s5300_s30] sm:$0xff]  ;;  %v3658_v55 = vld [vmem:[%s5299_s29 + $0x38] sm:$0xff] }
  0x21   : > { %837 = vmatpush.msra.mxu0 %v807_v4  ;;  %v860_v21 = vmul.f32 32.0, %v3961_v20  ;;  %vm864_vm2 = vweird.f32 %v3961_v20  ;;  %942 = vmatpush.msra.mxu1 %v915_v44  ;;  %v982_v50 = vld [vmem:[%s5252_s11] sm:$0xff]  ;;  %v3657_v56 = vld [vmem:[%s5299_s29 + $0x30] sm:$0xff]  ;;  %v3656_v58 = vld [vmem:[%s5299_s29 + $0x28] sm:$0xff] }
  0x22   : > { %973 = vmatpush.msra.mxu2 %v952_v45  ;;  %v3662_v51 = vld [vmem:[%s5300_s30 + $0x20] sm:$0xff]  ;;  %1005 = vmatpush.msra.mxu3 %v982_v50  ;;  %v3671_v41 = vld [vmem:[%s5252_s11 + $0x30] sm:$0xff] }
  0x23   : > { %838 = vmatpush.msra.mxu0 %v806_v5  ;;  %v861_v22 = vsub.f32 1.0, %v860_v21  ;;  %943 = vmatpush.msra.mxu1 %v914_v48  ;;  %v3655_v60 = vld [vmem:[%s5299_s29 + $0x20] sm:$0xff]  ;;  %s799_s9 = scalar_lea.vmem %s5305_s4, %s5310_s3 }
  0x24   : > { %3641 = vmatmul.msk.f32.vlgmr.msra.gmra.mxu0 %vm816_vm0, %v804_v6  ;;  %974 = vmatpush.msra.mxu2 %v951_v49  ;;  %v3920_v6 = vld [vmem:[%s5301_s0] ss:$0 sm:$0xff] }
  0x25   : > { %v862_v23 = vmul.f32 %v3961_v20, %v861_v22  ;;  %1185 = vmatpush.msrb.mxu0 %v3665_v39  ;;  %1152 = vmatpush.msrb.mxu3 %v3658_v55  ;;  %v3672_v39 = vld [vmem:[%s5252_s11 + $0x38] sm:$0xff]  ;;  %v3669_v44 = vld [vmem:[%s5252_s11 + $0x20] sm:$0xff] }
  0x27   : > { %v863_v24 = vadd.f32 %v3961_v20, %v862_v23  ;;  %1186 = vmatpush.msrb.mxu0 %v3664_v43  ;;  %1153 = vmatpush.msrb.mxu3 %v3657_v56  ;;  %v3670_v43 = vld [vmem:[%s5252_s11 + $0x28] sm:$0xff] }
  0x29   : > { %v4250_v25 = vsel %vm864_vm2, %v3961_v20, %v863_v24  ;;  %1187 = vmatpush.msrb.mxu0 %v3663_v47  ;;  %1154 = vmatpush.msrb.mxu3 %v3656_v58 }
  0x2b   : > { %1188 = vmatpush.msrb.mxu0 %v3662_v51  ;;  %1155 = vmatpush.msrb.mxu3 %v3655_v60 }
  0x2c   : > { %3642 = vmatmul.msk.f32.gmra.mxu0 %vm816_vm0, %v805_v7 }
  0xa1   : > { %v840_v9 = vpop.f32.mrf.mxu0 }
  0xa2   : > { %v841_v11 = vadd.f32 %v3919_v8, %v840_v9  ;;  %v3921_v9 = vld [vmem:[%s5302_s5] ss:$0 sm:$0xff] }
  0xa4   : > { %v4239_v12 = vadd.f32 %v846_v10, %v841_v11 }
  0xa6   : > { %v853_v13 = vsel %vm852_vm1, %v4239_v12, 0.0 }
  0xa7   : > { %854 = vadd.xlane.f32.xlu0 %v853_v13 }
  0xa9   : > { %v843_v14 = vpop.f32.mrf.mxu0 }
  0xaa   : > { %v844_v16 = vadd.f32 %v3919_v8, %v843_v14 }
  0xac   : > { %v4246_v17 = vadd.f32 %v847_v15, %v844_v16 }
  0xae   : > { %v856_v18 = vsel %vm852_vm1, %v4246_v17, 0.0 }
  0xaf   : > { %857 = vadd.xlane.f32.xlu0 %v856_v18 }
 0x11a   : > { %v855_v26 = vpop.xlane.xlu0 %854 }
 0x11b   : > { %v866_v27 = vmul.f32 %v4250_v25, %v855_v26  ;;  %v3924_v26 = vld [vmem:[%s5303_s6] ss:$0 sm:$0xff] }
 0x11d   : > { %v4254_v28 = vsub.f32 %v4239_v12, %v866_v27 }
 0x11f   : > { %v870_v29 = vmul.f32 %v4254_v28, %v4254_v28 }
 0x121   : > { %v872_v30 = vsel %vm852_vm1, %v870_v29, 0.0 }
 0x122   : > { %873 = vadd.xlane.f32.xlu1 %v872_v30  ;;  %v858_v31 = vpop.xlane.xlu0 %857 }
 0x123   : > { %v867_v32 = vmul.f32 %v4250_v25, %v858_v31 }
 0x125   : > { %v4261_v33 = vsub.f32 %v4246_v17, %v867_v32 }
 0x127   : > { %v871_v34 = vmul.f32 %v4261_v33, %v4261_v33 }
 0x129   : > { %v875_v35 = vsel %vm852_vm1, %v871_v34, 0.0  ;;  %v3923_v34 = vld [vmem:[%s5303_s6 + $0x1] ss:$0 sm:$0xff] }
 0x12a   : > { %876 = vadd.xlane.f32.xlu1 %v875_v35  ;;  %v3922_v35 = vld [vmem:[%s5304_s1] ss:$0 sm:$0xff] }
 0x195   : > { %v874_v52 = vpop.xlane.xlu1 %873 }
 0x196   : > { %v878_v53 = vmul.f32 %v874_v52, %v4250_v25 }
 0x198   : > { %v880_v54 = vadd.f32 1e-05, %v878_v53 }
 0x19a   : > { %3962 = vrsqrt.f32 %v880_v54  ;;  %vm888_vm4 = vweird.f32 %v880_v54 }
 0x19d   : > { %v877_v57 = vpop.xlane.xlu1 %876 }
 0x19e   : > { %v879_v59 = vmul.f32 %v877_v57, %v4250_v25 }
 0x1a0   : > { %v3963_v61 = vpop.eup %3962  ;;  %v881_v62 = vadd.f32 1e-05, %v879_v59 }
 0x1a1   : > { %v883_v63 = vmul.f32 %v3963_v61, %v880_v54  ;;  %vm889_vm3 = vweird.f32 %v3963_v61  ;;  %v3927_v54 = vld [vmem:[%s5253_s12 + $0x1] ss:$0 sm:$0xff] }
 0x1a2   : > { %3964 = vrsqrt.f32 %v881_v62  ;;  %vm890_vm5 = vmor %vm888_vm4, %vm889_vm3  ;;  %vm898_vm7 = vweird.f32 %v881_v62 }
 0x1a3   : > { %v884_v0 = vmul.f32 %v3963_v61, %v883_v63 }
 0x1a5   : > { %v885_v1 = vmul.f32 0.5, %v884_v0 }
 0x1a7   : > { %v886_v2 = vsub.f32 1.5, %v885_v1 }
 0x1a8   : > { %v3965_v3 = vpop.eup %3964 }
 0x1a9   : > { %v887_v4 = vmul.f32 %v3963_v61, %v886_v2  ;;  %v893_v5 = vmul.f32 %v3965_v3, %v881_v62  ;;  %vm899_vm6 = vweird.f32 %v3965_v3 }
 0x1aa   : > { %vm900_vm8 = vmor %vm898_vm7, %vm899_vm6 }
 0x1ab   : > { %v891_v7 = vsel %vm890_vm5, %v3963_v61, %v887_v4  ;;  %v894_v8 = vmul.f32 %v3965_v3, %v893_v5 }
 0x1ac   : > { %v902_v10 = vmul.f32 %v891_v7, %v4254_v28  ;;  %v3925_v28 = vld [vmem:[%s5253_s12] ss:$0 sm:$0xff] }
 0x1ad   : > { %v895_v11 = vmul.f32 0.5, %v894_v8 }
 0x1ae   : > { %v907_v13 = vmul.f32 %v3920_v6, %v902_v10 }
 0x1af   : > { %v896_v14 = vsub.f32 1.5, %v895_v11 }
 0x1b0   : > { %v4335_v15 = vadd.f32 %v3921_v9, %v907_v13 }
 0x1b1   : > { %v897_v16 = vmul.f32 %v3965_v3, %v896_v14 }
 0x1b2   : > { %3643 = vmatmul.msk.f32.vlgmr.msra.gmra.mxu1 %vm852_vm1, %v4335_v15  ;;  %3645 = vmatmul.msk.f32.vlgmr.msra.gmra.mxu2 %vm852_vm1, %v4335_v15 }
 0x1b3   : > { %v901_v18 = vsel %vm900_vm8, %v3965_v3, %v897_v16  ;;  %3647 = vmatmul.msk.f32.vlgmr.msra.gmra.mxu3 %vm852_vm1, %v4335_v15  ;;  %3667 = vmatmul.msk.f32.vlgmr.msrb.gmra.mxu0 %vm852_vm1, %v4335_v15 }
 0x1b4   : > { %v903_v19 = vmul.f32 %v901_v18, %v4261_v33 }
 0x1b6   : > { %v908_v20 = vmul.f32 %v3920_v6, %v903_v19 }
 0x1b8   : > { %v4346_v21 = vadd.f32 %v3921_v9, %v908_v20 }
 0x1ba   : > { %3644 = vmatmul.msk.f32.gmra.mxu1 %vm852_vm1, %v4346_v21  ;;  %3646 = vmatmul.msk.f32.gmra.mxu2 %vm852_vm1, %v4346_v21 }
 0x1bb   : > { %3648 = vmatmul.msk.f32.gmra.mxu3 %vm852_vm1, %v4346_v21  ;;  %3668 = vmatmul.msk.f32.gmra.mxu0 %vm852_vm1, %v4346_v21 }
 0x1c3   : > { %3660 = vmatmul.msk.f32.vlgmr.msrb.gmra.mxu3 %vm852_vm1, %v4335_v15 }
 0x1cb   : > { %3661 = vmatmul.msk.f32.gmra.mxu3 %vm852_vm1, %v4346_v21 }
 0x22f   : > { %v945_v33 = vpop.f32.mrf.mxu1 }
 0x230   : > { %v1190_v22 = vpop.f32.mrf.mxu0  ;;  %v946_v40 = vadd.f32 %v3922_v35, %v945_v33 }
 0x231   : > { %v1191_v42 = vadd.f32 %v3923_v34, %v1190_v22 }
 0x235   : > { %v976_v23 = vpop.f32.mrf.mxu2 }
 0x236   : > { %v1007_v24 = vpop.f32.mrf.mxu3  ;;  %v977_v37 = vadd.f32 %v3924_v26, %v976_v23 }
 0x237   : > { %v1008_v36 = vadd.f32 %v3925_v28, %v1007_v24  ;;  %v948_v45 = vpop.f32.mrf.mxu1  ;;  %v3690_v24 = vld [vmem:[%s5299_s29 + $0x58] sm:$0xff] }
 0x238   : > { %v1193_v31 = vpop.f32.mrf.mxu0  ;;  %v949_v46 = vadd.f32 %v3922_v35, %v948_v45 }
 0x239   : > { %v1194_v38 = vadd.f32 %v3923_v34, %v1193_v31  ;;  %v3688_v31 = vld [vmem:[%s5299_s29 + $0x48] sm:$0xff]  ;;  %v3687_v34 = vld [vmem:[%s5299_s29 + $0x40] sm:$0xff] }
 0x23d   : > { %v979_v27 = vpop.f32.mrf.mxu2 }
 0x23e   : > { %v980_v29 = vadd.f32 %v3924_v26, %v979_v27  ;;  %v1010_v30 = vpop.f32.mrf.mxu3 }
 0x23f   : > { %v1011_v32 = vadd.f32 %v3925_v28, %v1010_v30 }
 0x240   : > { %3649 = vmatpush.xpose.msk.msrb.mxu1 %vm1013_vm9, %v980_v29  ;;  %v3689_v29 = vld [vmem:[%s5299_s29 + $0x50] sm:$0xff] }
 0x241   : > { %1120 = vmatpush.msrb.mxu2 %v1011_v32 }
 0x243   : > { %1121 = vmatpush.msrb.mxu2 %v1008_v36 }
 0x244   : > { %3650 = vmatpush.xpose.msk.msrb.mxu1 %vm1013_vm9, %v977_v37 }
 0x245   : > { %3676 = vmatpush.xpose.msk.msra.mxu2 %vm1013_vm9, %v1194_v38  ;;  %v3926_v38 = vld [vmem:[%s5304_s1 + $0x1] ss:$0 sm:$0xff] }
 0x246   : > { %v1157_v37 = vpop.f32.mrf.mxu3 }
 0x247   : > { %3651 = vmatmul.msk.f32.vlgmr.msrb.gmra.mxu1 %vm1013_vm9, %v946_v40 }
 0x248   : > { %1218 = vmatpush.msra.mxu1 %v3672_v39  ;;  %v1158_v39 = vadd.f32 %v3926_v38, %v1157_v37  ;;  %v3719_v37 = vld [vmem:[%s5299_s29 + $0x70] sm:$0xff] }
 0x249   : > { %3677 = vmatpush.xpose.msk.msra.mxu2 %vm1013_vm9, %v1191_v42  ;;  %v1129_v42 = vld [vmem:[%s5254_s13] sm:$0xff] }
 0x24a   : > { %1219 = vmatpush.msra.mxu1 %v3671_v41 }
 0x24c   : > { %1220 = vmatpush.msra.mxu1 %v3670_v43 }
 0x24e   : > { %1221 = vmatpush.msra.mxu1 %v3669_v44  ;;  %v1160_v40 = vpop.f32.mrf.mxu3 }
 0x24f   : > { %3652 = vmatmul.msk.f32.gmra.mxu1 %vm1013_vm9, %v949_v46  ;;  %v1161_v41 = vadd.f32 %v3926_v38, %v1160_v40  ;;  %v3718_v38 = vld [vmem:[%s5299_s29 + $0x68] sm:$0xff] }
 0x250   : > { %1395 = vmatpush.msrb.mxu1 %v1129_v42  ;;  %v3929_v42 = vld [vmem:[%s5303_s6 + $0x2] ss:$0 sm:$0xff] }
 0x257   : > { %3674 = vmatmul.msk.f32.vlgmr.msra.gmra.mxu1 %vm852_vm1, %v4335_v15 }
 0x25f   : > { %3675 = vmatmul.msk.f32.gmra.mxu1 %vm852_vm1, %v4346_v21 }
 0x2c4   : > { %v1043_v47 = vpop.f32.mrf.mxu1 }
 0x2c5   : > { %v1049_v48 = vmul.f32 0.35355338, %v1043_v47 }
 0x2c7   : > { %v1052_v49 = vsel %vm1051_vm10, %v1049_v48, -inf }
 0x2c8   : > { %1053 = vmax.xlane.f32.xlu2 %v1052_v49 }
 0x2cc   : > { %v1046_v50 = vpop.f32.mrf.mxu1 }
 0x2cd   : > { %v1050_v51 = vmul.f32 0.35355338, %v1046_v50 }
 0x2cf   : > { %v1055_v52 = vsel %vm1051_vm10, %v1050_v51, -inf }
 0x2d0   : > { %1056 = vmax.xlane.f32.xlu2 %v1055_v52 }
 0x2d4   : > { %v1223_v53 = vpop.f32.mrf.mxu1 }
 0x2d5   : > { %v1224_v57 = vadd.f32 %v3927_v54, %v1223_v53 }
 0x2dc   : > { %v1226_v55 = vpop.f32.mrf.mxu1 }
 0x2dd   : > { %v1227_v56 = vadd.f32 %v3927_v54, %v1226_v55 }
 0x2df   : > { %1334 = vmatpush.msra.mxu3 %v1227_v56 }
 0x2e1   : > { %1335 = vmatpush.msra.mxu3 %v1224_v57 }
 0x33b   : > { %v1054_v58 = vpop.xlane.xlu2 %1053 }
 0x33c   : > { %v1058_v59 = vsub.f32 %v1049_v48, %v1054_v58 }
 0x33e   : > { %v1060_v60 = vmul.f32 1.442695, %v1058_v59 }
 0x340   : > { %3966 = vpow2.f32 %v1060_v60 }
 0x343   : > { %v1057_v61 = vpop.xlane.xlu2 %1056 }
 0x344   : > { %v1059_v62 = vsub.f32 %v1050_v51, %v1057_v61  ;;  %v3697_v61 = vld [vmem:[%s5300_s30 + $0x58] sm:$0xff] }
 0x345   : > { %1458 = vmatpush.msrb.mxu3 %v3697_v61  ;;  %v3930_v61 = vld [vmem:[%s5253_s12 + $0x2] ss:$0 sm:$0xff] }
 0x346   : > { %v3967_v63 = vpop.eup %3966  ;;  %v1062_v0 = vmul.f32 1.442695, %v1059_v62  ;;  %v3696_v62 = vld [vmem:[%s5300_s30 + $0x50] sm:$0xff] }
 0x347   : > { %v1064_v1 = vsel %vm1051_vm10, %v3967_v63, 0.0  ;;  %1459 = vmatpush.msrb.mxu3 %v3696_v62 }
 0x348   : > { %3968 = vpow2.f32 %v1062_v0  ;;  %1065 = vadd.xlane.f32.xlu0 %v1064_v1  ;;  %v3694_v1 = vld [vmem:[%s5300_s30 + $0x40] sm:$0xff] }
 0x34e   : > { %v3969_v2 = vpop.eup %3968 }
 0x34f   : > { %v1067_v3 = vsel %vm1051_vm10, %v3969_v2, 0.0 }
 0x350   : > { %1068 = vadd.xlane.f32.xlu1 %v1067_v3 }
 0x3bb   : > { %v1066_v4 = vpop.xlane.xlu0 %1065 }
 0x3bc   : > { %3970 = vrcp.f32 %v1066_v4  ;;  %v1081_v9 = vand.u32 2147483648, %v1066_v4  ;;  %v1079_v11 = vand.u32 2147483647, %v1066_v4  ;;  %vm1075_vm12 = vweird.f32 %v1066_v4 }
 0x3be   : > { %v1082_v16 = vor.u32 1.1754944e-38, %v1081_v9  ;;  %vm1080_vm14 = vcmp.eq.f32.partialorder %v1079_v11, 8.507059e+37 }
 0x3c2   : > { %v3971_v5 = vpop.eup %3970 }
 0x3c3   : > { %v1071_v6 = vmul.f32 %v3971_v5, %v1066_v4  ;;  %v1069_v7 = vpop.xlane.xlu1 %1068  ;;  %vm1076_vm11 = vweird.f32 %v3971_v5 }
 0x3c4   : > { %3972 = vrcp.f32 %v1069_v7  ;;  %vm1077_vm13 = vmor %vm1075_vm12, %vm1076_vm11  ;;  %v1096_v26 = vand.u32 2147483648, %v1069_v7  ;;  %v1094_v28 = vand.u32 2147483647, %v1069_v7  ;;  %vm1090_vm0 = vweird.f32 %v1069_v7 }
 0x3c5   : > { %v1072_v8 = vsub.f32 1.0, %v1071_v6 }
 0x3c6   : > { %v1097_v32 = vor.u32 1.1754944e-38, %v1096_v26  ;;  %vm1095_vm3 = vcmp.eq.f32.partialorder %v1094_v28, 8.507059e+37 }
 0x3c7   : > { %v1073_v10 = vmul.f32 %v3971_v5, %v1072_v8 }
 0x3c9   : > { %v1074_v13 = vadd.f32 %v3971_v5, %v1073_v10 }
 0x3ca   : > { %v3973_v14 = vpop.eup %3972 }
 0x3cb   : > { %v1086_v18 = vmul.f32 %v3973_v14, %v1069_v7  ;;  %v1078_v19 = vsel %vm1077_vm13, %v3971_v5, %v1074_v13  ;;  %vm1091_vm15 = vweird.f32 %v3973_v14 }
 0x3cc   : > { %v1083_v20 = vsel %vm1080_vm14, %v1082_v16, %v1078_v19  ;;  %vm1092_vm2 = vmor %vm1090_vm0, %vm1091_vm15 }
 0x3cd   : > { %v1087_v22 = vsub.f32 1.0, %v1086_v18  ;;  %v1084_v23 = vmul.f32 %v3967_v63, %v1083_v20  ;;  %v3695_v63 = vld [vmem:[%s5300_s30 + $0x48] sm:$0xff] }
 0x3ce   : > { %1460 = vmatpush.msrb.mxu3 %v3695_v63 }
 0x3cf   : > { %v1088_v27 = vmul.f32 %v3973_v14, %v1087_v22  ;;  %3653 = vmatmul.msk.f32.vlgmr.msrb.gmra.mxu2 %vm1051_vm10, %v1084_v23 }
 0x3d0   : > { %1425 = vmatpush.msrb.mxu2 %v3690_v24  ;;  %1461 = vmatpush.msrb.mxu3 %v3694_v1 }
 0x3d1   : > { %v1089_v30 = vadd.f32 %v3973_v14, %v1088_v27 }
 0x3d2   : > { %1426 = vmatpush.msrb.mxu2 %v3689_v29 }
 0x3d3   : > { %v1093_v33 = vsel %vm1092_vm2, %v3973_v14, %v1089_v30  ;;  %v3682_v30 = vld [vmem:[%s5254_s13 + $0x8] sm:$0xff] }
 0x3d4   : > { %v1098_v35 = vsel %vm1095_vm3, %v1097_v32, %v1093_v33  ;;  %1427 = vmatpush.msrb.mxu2 %v3688_v31  ;;  %1366 = vmatpush.msra.mxu0 %v3682_v30  ;;  %v3704_v31 = vld [vmem:[%s5252_s11 + $0x58] sm:$0xff]  ;;  %v3703_v32 = vld [vmem:[%s5252_s11 + $0x50] sm:$0xff]  ;;  %v3702_v33 = vld [vmem:[%s5252_s11 + $0x48] sm:$0xff] }
 0x3d5   : > { %v1099_v36 = vmul.f32 %v3969_v2, %v1098_v35  ;;  %v3720_v35 = vld [vmem:[%s5299_s29 + $0x78] sm:$0xff]  ;;  %v3732_v30 = vld [vmem:[%s5252_s11 + $0x68] sm:$0xff] }
 0x3d6   : > { %1428 = vmatpush.msrb.mxu2 %v3687_v34  ;;  %1491 = vmatpush.msrb.mxu0 %v3704_v31  ;;  %v3701_v34 = vld [vmem:[%s5252_s11 + $0x40] sm:$0xff] }
 0x3d7   : > { %3654 = vmatmul.msk.f32.gmra.mxu2 %vm1051_vm10, %v1099_v36 }
 0x3d8   : > { %1492 = vmatpush.msrb.mxu0 %v3703_v32  ;;  %v3731_v32 = vld [vmem:[%s5252_s11 + $0x60] sm:$0xff] }
 0x3da   : > { %1493 = vmatpush.msrb.mxu0 %v3702_v33 }
 0x3dc   : > { %1494 = vmatpush.msrb.mxu0 %v3701_v34 }
 0x3df   : > { %3678 = vmatmul.msk.f32.vlgmr.msra.gmra.mxu2 %vm1013_vm9, %v1158_v39  ;;  %v3717_v39 = vld [vmem:[%s5299_s29 + $0x60] sm:$0xff] }
 0x3e7   : > { %3679 = vmatmul.msk.f32.gmra.mxu2 %vm1013_vm9, %v1161_v41 }
 0x3ef   : > { %3692 = vmatmul.msk.f32.vlgmr.msrb.gmra.mxu2 %vm852_vm1, %v4335_v15 }
 0x3f7   : > { %3693 = vmatmul.msk.f32.gmra.mxu2 %vm852_vm1, %v4346_v21 }
 0x452   : > { %v1123_v43 = vpop.f32.mrf.mxu2 }
 0x453   : > { %3685 = vmatmul.msk.f32.vlgmr.msrb.gmra.mxu1 %vm1013_vm9, %v1123_v43 }
 0x45a   : > { %v1126_v44 = vpop.f32.mrf.mxu2 }
 0x45b   : > { %3686 = vmatmul.msk.f32.gmra.mxu1 %vm1013_vm9, %v1126_v44 }
 0x462   : > { %v1258_v45 = vpop.f32.mrf.mxu2 }
 0x463   : > { %v1264_v46 = vmul.f32 0.35355338, %v1258_v45 }
 0x465   : > { %v1266_v47 = vsel %vm1051_vm10, %v1264_v46, -inf }
 0x466   : > { %1267 = vmax.xlane.f32.xlu2 %v1266_v47 }
 0x46a   : > { %v1261_v48 = vpop.f32.mrf.mxu2 }
 0x46b   : > { %v1265_v49 = vmul.f32 0.35355338, %v1261_v48  ;;  %v3727_v48 = vld [vmem:[%s5300_s30 + $0x78] sm:$0xff] }
 0x46d   : > { %v1269_v50 = vsel %vm1051_vm10, %v1265_v49, -inf }
 0x46e   : > { %1270 = vmax.xlane.f32.xlu0 %v1269_v50  ;;  %v3726_v50 = vld [vmem:[%s5300_s30 + $0x70] sm:$0xff] }
 0x472   : > { %v1430_v45 = vpop.f32.mrf.mxu2 }
 0x4d9   : > { %v1268_v51 = vpop.xlane.xlu2 %1267 }
 0x4da   : > { %v1272_v52 = vsub.f32 %v1264_v46, %v1268_v51  ;;  %v3928_v46 = vld [vmem:[%s5304_s1 + $0x2] ss:$0 sm:$0xff]  ;;  %v3725_v51 = vld [vmem:[%s5300_s30 + $0x68] sm:$0xff] }
 0x4dc   : > { %v1274_v53 = vmul.f32 1.442695, %v1272_v52  ;;  %v3724_v52 = vld [vmem:[%s5300_s30 + $0x60] sm:$0xff] }
 0x4de   : > { %3974 = vpow2.f32 %v1274_v53  ;;  %v1433_v53 = vpop.f32.mrf.mxu2 }
 0x4e1   : > { %v1271_v54 = vpop.xlane.xlu0 %1270 }
 0x4e2   : > { %v1273_v55 = vsub.f32 %v1265_v49, %v1271_v54  ;;  %v1431_v49 = vadd.f32 %v3928_v46, %v1430_v45  ;;  %v1434_v54 = vadd.f32 %v3928_v46, %v1433_v53 }
 0x4e4   : > { %v3975_v56 = vpop.eup %3974  ;;  %v1276_v57 = vmul.f32 1.442695, %v1273_v55  ;;  %v4514_v55 = vpop.f32.mrf.mxu1 }
 0x4e5   : > { %v1278_v58 = vsel %vm1051_vm10, %v3975_v56, 0.0 }
 0x4e6   : > { %3976 = vpow2.f32 %v1276_v57  ;;  %1279 = vadd.xlane.f32.xlu1 %v1278_v58 }
 0x4ec   : > { %v3977_v59 = vpop.eup %3976  ;;  %v1400_v57 = vpop.f32.mrf.mxu1 }
 0x4ed   : > { %v1281_v60 = vsel %vm1051_vm10, %v3977_v59, 0.0 }
 0x4ee   : > { %1282 = vadd.xlane.f32.xlu2 %v1281_v60 }
 0x559   : > { %v1280_v0 = vpop.xlane.xlu1 %1279 }
 0x55a   : > { %3978 = vrcp.f32 %v1280_v0  ;;  %v1295_v6 = vand.u32 2147483648, %v1280_v0  ;;  %v1293_v8 = vand.u32 2147483647, %v1280_v0  ;;  %vm1289_vm5 = vweird.f32 %v1280_v0 }
 0x55c   : > { %v1296_v11 = vor.u32 1.1754944e-38, %v1295_v6  ;;  %vm1294_vm7 = vcmp.eq.f32.partialorder %v1293_v8, 8.507059e+37 }
 0x560   : > { %v3979_v2 = vpop.eup %3978 }
 0x561   : > { %v1285_v3 = vmul.f32 %v3979_v2, %v1280_v0  ;;  %v1283_v4 = vpop.xlane.xlu2 %1282  ;;  %vm1290_vm4 = vweird.f32 %v3979_v2  ;;  %v3714_v0 = vld [vmem:[%s5254_s13 + $0x10] sm:$0xff] }
 0x562   : > { %3980 = vrcp.f32 %v1283_v4  ;;  %vm1291_vm6 = vmor %vm1289_vm5, %vm1290_vm4  ;;  %v1310_v20 = vand.u32 2147483648, %v1283_v4  ;;  %v1308_v23 = vand.u32 2147483647, %v1283_v4  ;;  %vm1304_vm11 = vweird.f32 %v1283_v4 }
 0x563   : > { %v1286_v5 = vsub.f32 1.0, %v1285_v3 }
 0x564   : > { %v1311_v26 = vor.u32 1.1754944e-38, %v1310_v20  ;;  %vm1309_vm13 = vcmp.eq.f32.partialorder %v1308_v23, 8.507059e+37 }
 0x565   : > { %v1287_v7 = vmul.f32 %v3979_v2, %v1286_v5 }
 0x567   : > { %v1288_v9 = vadd.f32 %v3979_v2, %v1287_v7 }
 0x568   : > { %v3981_v10 = vpop.eup %3980 }
 0x569   : > { %v1292_v13 = vsel %vm1291_vm6, %v3979_v2, %v1288_v9  ;;  %v1300_v14 = vmul.f32 %v3981_v10, %v1283_v4  ;;  %vm1305_vm8 = vweird.f32 %v3981_v10  ;;  %v3932_v9 = vld [vmem:[%s5303_s6 + $0x3] ss:$0 sm:$0xff] }
 0x56a   : > { %v1297_v16 = vsel %vm1294_vm7, %v1296_v11, %v1292_v13  ;;  %vm1306_vm12 = vmor %vm1304_vm11, %vm1305_vm8 }
 0x56b   : > { %v1301_v18 = vsub.f32 1.0, %v1300_v14  ;;  %v1298_v19 = vmul.f32 %v3975_v56, %v1297_v16 }
 0x56d   : > { %v1302_v22 = vmul.f32 %v3981_v10, %v1301_v18  ;;  %3680 = vmatmul.msk.f32.vlgmr.msra.gmra.mxu3 %vm1051_vm10, %v1298_v19 }
 0x56e   : > { %1639 = vmatpush.msra.mxu3 %v3714_v0 }
 0x56f   : > { %v1303_v24 = vadd.f32 %v3981_v10, %v1302_v22 }
 0x571   : > { %v1307_v27 = vsel %vm1306_vm12, %v3981_v10, %v1303_v24 }
 0x572   : > { %v1312_v28 = vsel %vm1309_vm13, %v1311_v26, %v1307_v27 }
 0x573   : > { %v1313_v29 = vmul.f32 %v3977_v59, %v1312_v28  ;;  %v3734_v28 = vld [vmem:[%s5252_s11 + $0x78] sm:$0xff] }
 0x575   : > { %3681 = vmatmul.msk.f32.gmra.mxu3 %vm1051_vm10, %v1313_v29  ;;  %v3733_v29 = vld [vmem:[%s5252_s11 + $0x70] sm:$0xff] }
 0x57d   : > { %3699 = vmatmul.msk.f32.vlgmr.msrb.gmra.mxu3 %vm852_vm1, %v4335_v15 }
 0x585   : > { %3700 = vmatmul.msk.f32.gmra.mxu3 %vm852_vm1, %v4346_v21 }
 0x5f0   : > { %v1337_v36 = vpop.f32.mrf.mxu3 }
 0x5f1   : > { %3683 = vmatmul.msk.f32.vlgmr.msra.gmra.mxu0 %vm1013_vm9, %v1337_v36 }
 0x5f2   : > { %1671 = vmatpush.msra.mxu0 %v3720_v35 }
 0x5f4   : > { %1672 = vmatpush.msra.mxu0 %v3719_v37 }
 0x5f6   : > { %1673 = vmatpush.msra.mxu0 %v3718_v38 }
 0x5f8   : > { %v1340_v40 = vpop.f32.mrf.mxu3  ;;  %1674 = vmatpush.msra.mxu0 %v3717_v39 }
 0x5f9   : > { %3684 = vmatmul.msk.f32.gmra.mxu0 %vm1013_vm9, %v1340_v40 }
 0x600   : > { %v1463_v41 = vpop.f32.mrf.mxu3 }
 0x601   : > { %3706 = vmatmul.msk.f32.vlgmr.msrb.gmra.mxu0 %vm852_vm1, %v4335_v15  ;;  %v1464_v47 = vadd.f32 %v3929_v42, %v1463_v41 }
 0x608   : > { %v1466_v43 = vpop.f32.mrf.mxu3 }
 0x609   : > { %v1467_v44 = vadd.f32 %v3929_v42, %v1466_v43  ;;  %3707 = vmatmul.msk.f32.gmra.mxu0 %vm852_vm1, %v4346_v21 }
 0x60b   : > { %3708 = vmatpush.xpose.msk.msra.mxu1 %vm1013_vm9, %v1467_v44 }
 0x60f   : > { %3709 = vmatpush.xpose.msk.msra.mxu1 %vm1013_vm9, %v1464_v47 }
 0x611   : > { %3722 = vmatmul.msk.f32.vlgmr.msra.gmra.mxu0 %vm852_vm1, %v4335_v15 }
 0x612   : > { %3710 = vmatmul.msk.f32.vlgmr.msra.gmra.mxu1 %vm1013_vm9, %v1431_v49 }
 0x613   : > { %1704 = vmatpush.msrb.mxu1 %v3727_v48 }
 0x615   : > { %1705 = vmatpush.msrb.mxu1 %v3726_v50 }
 0x617   : > { %1706 = vmatpush.msrb.mxu1 %v3725_v51 }
 0x619   : > { %1707 = vmatpush.msrb.mxu1 %v3724_v52  ;;  %3723 = vmatmul.msk.f32.gmra.mxu0 %vm852_vm1, %v4346_v21 }
 0x61a   : > { %3711 = vmatmul.msk.f32.gmra.mxu1 %vm1013_vm9, %v1434_v54 }
 0x622   : > { %3729 = vmatmul.msk.f32.vlgmr.msrb.gmra.mxu1 %vm852_vm1, %v4335_v15 }
 0x62a   : > { %3730 = vmatmul.msk.f32.gmra.mxu1 %vm852_vm1, %v4346_v21 }
 0x66e   : > { %v4516_v56 = vpop.f32.mrf.mxu0 }
 0x676   : > { %v1371_v58 = vpop.f32.mrf.mxu0 }
 0x677   : > { %v4518_v59 = vadd.f32 %v1400_v57, %v1371_v58 }
 0x67e   : > { %v1496_v60 = vpop.f32.mrf.mxu0 }
 0x67f   : > { %v1497_v1 = vadd.f32 %v3930_v61, %v1496_v60 }
 0x686   : > { %v1499_v62 = vpop.f32.mrf.mxu0 }
 0x687   : > { %v1500_v63 = vadd.f32 %v3930_v61, %v1499_v62  ;;  %v3931_v62 = vld [vmem:[%s5304_s1 + $0x3] ss:$0 sm:$0xff] }
 0x689   : > { %1607 = vmatpush.msra.mxu2 %v1500_v63 }
 0x68b   : > { %1608 = vmatpush.msra.mxu2 %v1497_v1 }
 0x68d   : > { %1737 = vmatpush.msrb.mxu2 %v3734_v28  ;;  %v3744_v28 = vld [vmem:[%s5254_s13 + $0x18] sm:$0xff] }
 0x68e   : > { %v1676_v61 = vpop.f32.mrf.mxu0  ;;  %1885 = vmatpush.msra.mxu1 %v3744_v28 }
 0x68f   : > { %v1531_v2 = vpop.f32.mrf.mxu1  ;;  %1738 = vmatpush.msrb.mxu2 %v3733_v29  ;;  %v1677_v63 = vadd.f32 %v3931_v62, %v1676_v61 }
 0x690   : > { %v1537_v3 = vmul.f32 0.35355338, %v1531_v2 }
 0x691   : > { %1739 = vmatpush.msrb.mxu2 %v3732_v30 }
 0x692   : > { %v1539_v4 = vsel %vm1051_vm10, %v1537_v3, -inf }
 0x693   : > { %1540 = vmax.xlane.f32.xlu0 %v1539_v4  ;;  %1740 = vmatpush.msrb.mxu2 %v3731_v32 }
 0x696   : > { %v1679_v1 = vpop.f32.mrf.mxu0 }
 0x697   : > { %v1534_v5 = vpop.f32.mrf.mxu1 }
 0x698   : > { %v1538_v6 = vmul.f32 0.35355338, %v1534_v5 }
 0x69a   : > { %v1542_v7 = vsel %vm1051_vm10, %v1538_v6, -inf }
 0x69b   : > { %1543 = vmax.xlane.f32.xlu1 %v1542_v7 }
 0x69f   : > { %v1709_v8 = vpop.f32.mrf.mxu1 }
 0x6a0   : > { %v1710_v13 = vadd.f32 %v3932_v9, %v1709_v8 }
 0x6a7   : > { %v1712_v10 = vpop.f32.mrf.mxu1 }
 0x6a8   : > { %v1713_v11 = vadd.f32 %v3932_v9, %v1712_v10 }
 0x6aa   : > { %3738 = vmatpush.xpose.msk.msrb.mxu3 %vm1013_vm9, %v1713_v11 }
 0x6ae   : > { %3739 = vmatpush.xpose.msk.msrb.mxu3 %vm1013_vm9, %v1710_v13 }
 0x706   : > { %v1541_v14 = vpop.xlane.xlu0 %1540 }
 0x707   : > { %v1545_v16 = vsub.f32 %v1537_v3, %v1541_v14 }
 0x709   : > { %v1547_v18 = vmul.f32 1.442695, %v1545_v16 }
 0x70b   : > { %3982 = vpow2.f32 %v1547_v18 }
 0x70e   : > { %v1544_v19 = vpop.xlane.xlu1 %1543 }
 0x70f   : > { %v1546_v20 = vsub.f32 %v1538_v6, %v1544_v19 }
 0x711   : > { %v3983_v22 = vpop.eup %3982  ;;  %v1549_v23 = vmul.f32 1.442695, %v1546_v20 }
 0x712   : > { %v1551_v24 = vsel %vm1051_vm10, %v3983_v22, 0.0 }
 0x713   : > { %3984 = vpow2.f32 %v1549_v23  ;;  %1552 = vadd.xlane.f32.xlu2 %v1551_v24 }
 0x719   : > { %v3985_v26 = vpop.eup %3984 }
 0x71a   : > { %v1554_v27 = vsel %vm1051_vm10, %v3985_v26, 0.0 }
 0x71b   : > { %1555 = vadd.xlane.f32.xlu0 %v1554_v27 }
 0x786   : > { %v1553_v31 = vpop.xlane.xlu2 %1552 }
 0x787   : > { %3986 = vrcp.f32 %v1553_v31  ;;  %v1568_v37 = vand.u32 2147483648, %v1553_v31  ;;  %v1566_v39 = vand.u32 2147483647, %v1553_v31  ;;  %vm1562_vm15 = vweird.f32 %v1553_v31 }
 0x789   : > { %v1569_v42 = vor.u32 1.1754944e-38, %v1568_v37  ;;  %vm1567_vm2 = vcmp.eq.f32.partialorder %v1566_v39, 8.507059e+37 }
 0x78d   : > { %v3987_v33 = vpop.eup %3986 }
 0x78e   : > { %v1558_v34 = vmul.f32 %v3987_v33, %v1553_v31  ;;  %v1556_v35 = vpop.xlane.xlu0 %1555  ;;  %vm1563_vm14 = vweird.f32 %v3987_v33 }
 0x78f   : > { %3988 = vrcp.f32 %v1556_v35  ;;  %vm1564_vm0 = vmor %vm1562_vm15, %vm1563_vm14  ;;  %v1583_v48 = vand.u32 2147483648, %v1556_v35  ;;  %v1581_v50 = vand.u32 2147483647, %v1556_v35  ;;  %vm1577_vm4 = vweird.f32 %v1556_v35 }
 0x790   : > { %v1559_v36 = vsub.f32 1.0, %v1558_v34 }
 0x791   : > { %v1584_v52 = vor.u32 1.1754944e-38, %v1583_v48  ;;  %vm1582_vm6 = vcmp.eq.f32.partialorder %v1581_v50, 8.507059e+37 }
 0x792   : > { %v1560_v38 = vmul.f32 %v3987_v33, %v1559_v36 }
 0x794   : > { %v1561_v40 = vadd.f32 %v3987_v33, %v1560_v38 }
 0x795   : > { %v3989_v41 = vpop.eup %3988 }
 0x796   : > { %v1565_v43 = vsel %vm1564_vm0, %v3987_v33, %v1561_v40  ;;  %v1573_v44 = vmul.f32 %v3989_v41, %v1556_v35  ;;  %vm1578_vm3 = vweird.f32 %v3989_v41 }
 0x797   : > { %v1570_v45 = vsel %vm1567_vm2, %v1569_v42, %v1565_v43  ;;  %vm1579_vm5 = vmor %vm1577_vm4, %vm1578_vm3 }
 0x798   : > { %v1574_v46 = vsub.f32 1.0, %v1573_v44  ;;  %v1571_v47 = vmul.f32 %v3983_v22, %v1570_v45 }
 0x79a   : > { %v1575_v49 = vmul.f32 %v3989_v41, %v1574_v46  ;;  %3712 = vmatmul.msk.f32.vlgmr.msra.gmra.mxu2 %vm1051_vm10, %v1571_v47 }
 0x79c   : > { %v1576_v51 = vadd.f32 %v3989_v41, %v1575_v49 }
 0x79e   : > { %v1580_v53 = vsel %vm1579_vm5, %v3989_v41, %v1576_v51 }
 0x79f   : > { %v1585_v54 = vsel %vm1582_vm6, %v1584_v52, %v1580_v53 }
 0x7a0   : > { %v1586_v57 = vmul.f32 %v3985_v26, %v1585_v54 }
 0x7a2   : > { %3713 = vmatmul.msk.f32.gmra.mxu2 %vm1051_vm10, %v1586_v57  ;;  %v1398_v57 = vadd.f32 %v4514_v55, %v4516_v56 }
 0x7aa   : > { %3736 = vmatmul.msk.f32.vlgmr.msrb.gmra.mxu2 %vm852_vm1, %v4335_v15  ;;  %v1680_v15 = vadd.f32 %v3931_v62, %v1679_v1  ;;  %v3934_v62 = vld [vmem:[%s5255_s14] ss:$0 sm:$0xff] }
 0x7b2   : > { %3737 = vmatmul.msk.f32.gmra.mxu2 %vm852_vm1, %v4346_v21  ;;  %v3933_v21 = vld [vmem:[%s5253_s12 + $0x3] ss:$0 sm:$0xff] }
 0x81d   : > { %v1610_v58 = vpop.f32.mrf.mxu2 }
 0x81e   : > { %3715 = vmatmul.msk.f32.vlgmr.msra.gmra.mxu3 %vm1013_vm9, %v1610_v58 }
 0x825   : > { %v1613_v60 = vpop.f32.mrf.mxu2 }
 0x826   : > { %3716 = vmatmul.msk.f32.gmra.mxu3 %vm1013_vm9, %v1613_v60 }
 0x82d   : > { %v1742_v0 = vpop.f32.mrf.mxu2 }
 0x82e   : > { %3740 = vmatmul.msk.f32.vlgmr.msrb.gmra.mxu3 %vm1013_vm9, %v1677_v63  ;;  %v1743_v4 = vadd.f32 %v3933_v21, %v1742_v0 }
 0x835   : > { %v1745_v2 = vpop.f32.mrf.mxu2 }
 0x836   : > { %v1746_v3 = vadd.f32 %v3933_v21, %v1745_v2  ;;  %3741 = vmatmul.msk.f32.gmra.mxu3 %vm1013_vm9, %v1680_v15 }
 0x838   : > { %1853 = vmatpush.msrb.mxu0 %v1746_v3 }
 0x83a   : > { %1854 = vmatpush.msrb.mxu0 %v1743_v4 }
 0x8a1   : > { %v4563_v5 = vpop.f32.mrf.mxu3 }
 0x8a2   : > { %v1647_v58 = vadd.f32 %v4563_v5, %v1398_v57  ;;  %v2021_v57 = vld [vmem:[%s5260_s19 + $0x38] sm:$0xff] }
 0x8a9   : > { %v1644_v6 = vpop.f32.mrf.mxu3 }
 0x8aa   : > { %v4566_v7 = vadd.f32 %v1644_v6, %v4518_v59 }
 0x8b1   : > { %v1777_v8 = vpop.f32.mrf.mxu3 }
 0x8b2   : > { %v1783_v9 = vmul.f32 0.35355338, %v1777_v8 }
 0x8b4   : > { %v1785_v10 = vsel %vm1051_vm10, %v1783_v9, -inf }
 0x8b5   : > { %1786 = vmax.xlane.f32.xlu1 %v1785_v10 }
 0x8b9   : > { %v1780_v11 = vpop.f32.mrf.mxu3 }
 0x8ba   : > { %v1784_v13 = vmul.f32 0.35355338, %v1780_v11  ;;  %v1962_v11 = vld [vmem:[%s5258_s17 + $0x18] sm:$0xff] }
 0x8bb   : > { %1985 = vmatpush.msra.mxu2 %v1962_v11 }
 0x8bc   : > { %v1788_v14 = vsel %vm1051_vm10, %v1784_v13, -inf }
 0x8bd   : > { %1789 = vmax.xlane.f32.xlu2 %v1788_v14  ;;  %v1960_v14 = vld [vmem:[%s5258_s17 + $0x8] sm:$0xff] }
 0x928   : > { %v1787_v16 = vpop.xlane.xlu1 %1786 }
 0x929   : > { %v1791_v18 = vsub.f32 %v1783_v9, %v1787_v16  ;;  %v1959_v16 = vld [vmem:[%s5258_s17] sm:$0xff] }
 0x92b   : > { %v1793_v19 = vmul.f32 1.442695, %v1791_v18 }
 0x92d   : > { %3990 = vpow2.f32 %v1793_v19 }
 0x930   : > { %v1790_v20 = vpop.xlane.xlu2 %1789 }
 0x931   : > { %v1792_v22 = vsub.f32 %v1784_v13, %v1790_v20  ;;  %v1961_v13 = vld [vmem:[%s5258_s17 + $0x10] sm:$0xff] }
 0x932   : > { %1986 = vmatpush.msra.mxu2 %v1961_v13 }
 0x933   : > { %v3991_v23 = vpop.eup %3990  ;;  %v1795_v24 = vmul.f32 1.442695, %v1792_v22  ;;  %v2029_v22 = vld [vmem:[%s5260_s19 + $0x78] sm:$0xff] }
 0x934   : > { %v1797_v59 = vsel %vm1051_vm10, %v3991_v23, 0.0  ;;  %1987 = vmatpush.msra.mxu2 %v1960_v14  ;;  %2034 = vmatpush.msra.mxu3 %v2029_v22 }
 0x935   : > { %3992 = vpow2.f32 %v1795_v24  ;;  %1798 = vadd.xlane.f32.xlu0 %v1797_v59  ;;  %v2027_v24 = vld [vmem:[%s5260_s19 + $0x68] sm:$0xff] }
 0x936   : > { %1988 = vmatpush.msra.mxu2 %v1959_v16 }
 0x93b   : > { %v3993_v26 = vpop.eup %3992 }
 0x93c   : > { %v1800_v27 = vsel %vm1051_vm10, %v3993_v26, 0.0 }
 0x93d   : > { %1801 = vadd.xlane.f32.xlu1 %v1800_v27 }
 0x9a8   : > { %v1799_v29 = vpop.xlane.xlu0 %1798 }
 0x9a9   : > { %3994 = vrcp.f32 %v1799_v29  ;;  %v1814_v34 = vand.u32 2147483648, %v1799_v29  ;;  %v1812_v36 = vand.u32 2147483647, %v1799_v29  ;;  %vm1808_vm8 = vweird.f32 %v1799_v29 }
 0x9ab   : > { %v1815_v39 = vor.u32 1.1754944e-38, %v1814_v34  ;;  %vm1813_vm12 = vcmp.eq.f32.partialorder %v1812_v36, 8.507059e+37  ;;  %v3935_v36 = vld [vmem:[%s5256_s15] ss:$0 sm:$0xff] }
 0x9af   : > { %v3995_v30 = vpop.eup %3994 }
 0x9b0   : > { %v1804_v31 = vmul.f32 %v3995_v30, %v1799_v29  ;;  %v1802_v32 = vpop.xlane.xlu1 %1801  ;;  %vm1809_vm7 = vweird.f32 %v3995_v30 }
 0x9b1   : > { %3996 = vrcp.f32 %v1802_v32  ;;  %vm1810_vm11 = vmor %vm1808_vm8, %vm1809_vm7  ;;  %v1829_v45 = vand.u32 2147483648, %v1802_v32  ;;  %v1827_v47 = vand.u32 2147483647, %v1802_v32  ;;  %vm1823_vm14 = vweird.f32 %v1802_v32 }
 0x9b2   : > { %v1805_v33 = vsub.f32 1.0, %v1804_v31 }
 0x9b3   : > { %v1830_v49 = vor.u32 1.1754944e-38, %v1829_v45  ;;  %vm1828_vm0 = vcmp.eq.f32.partialorder %v1827_v47, 8.507059e+37 }
 0x9b4   : > { %v1806_v35 = vmul.f32 %v3995_v30, %v1805_v33 }
 0x9b6   : > { %v1807_v37 = vadd.f32 %v3995_v30, %v1806_v35 }
 0x9b7   : > { %v3997_v38 = vpop.eup %3996 }
 0x9b8   : > { %v1811_v40 = vsel %vm1810_vm11, %v3995_v30, %v1807_v37  ;;  %v1819_v41 = vmul.f32 %v3997_v38, %v1802_v32  ;;  %vm1824_vm13 = vweird.f32 %v3997_v38 }
 0x9b9   : > { %v1816_v42 = vsel %vm1813_vm12, %v1815_v39, %v1811_v40  ;;  %vm1825_vm15 = vmor %vm1823_vm14, %vm1824_vm13  ;;  %v3936_v40 = vld [vmem:[%s5257_s16] ss:$0 sm:$0xff] }
 0x9ba   : > { %v1820_v43 = vsub.f32 1.0, %v1819_v41  ;;  %v1817_v44 = vmul.f32 %v3991_v23, %v1816_v42  ;;  %v2028_v23 = vld [vmem:[%s5260_s19 + $0x70] sm:$0xff] }
 0x9bb   : > { %2035 = vmatpush.msra.mxu3 %v2028_v23 }
 0x9bc   : > { %v1821_v46 = vmul.f32 %v3997_v38, %v1820_v43  ;;  %3742 = vmatmul.msk.f32.vlgmr.msrb.gmra.mxu0 %vm1051_vm10, %v1817_v44 }
 0x9bd   : > { %2036 = vmatpush.msra.mxu3 %v2027_v24 }
 0x9be   : > { %v1822_v48 = vadd.f32 %v3997_v38, %v1821_v46 }
 0x9c0   : > { %v1826_v50 = vsel %vm1825_vm15, %v3997_v38, %v1822_v48 }
 0x9c1   : > { %v1831_v51 = vsel %vm1828_vm0, %v1830_v49, %v1826_v50  ;;  %v2026_v50 = vld [vmem:[%s5260_s19 + $0x60] sm:$0xff] }
 0x9c2   : > { %v1832_v52 = vmul.f32 %v3993_v26, %v1831_v51  ;;  %2037 = vmatpush.msra.mxu3 %v2026_v50  ;;  %v2025_v51 = vld [vmem:[%s5260_s19 + $0x58] sm:$0xff]  ;;  %v3752_v50 = vld [vmem:[%s5299_s29 + $0x88] sm:$0xff] }
 0x9c4   : > { %3743 = vmatmul.msk.f32.gmra.mxu0 %vm1051_vm10, %v1832_v52  ;;  %2038 = vmatpush.msra.mxu3 %v2025_v51  ;;  %v2024_v52 = vld [vmem:[%s5260_s19 + $0x50] sm:$0xff]  ;;  %v3759_v51 = vld [vmem:[%s5300_s30 + $0x88] sm:$0xff] }
 0x9c6   : > { %2039 = vmatpush.msra.mxu3 %v2024_v52  ;;  %v3766_v52 = vld [vmem:[%s5252_s11 + $0x88] sm:$0xff] }
 0xa39   : > { %v1856_v53 = vpop.f32.mrf.mxu0 }
 0xa3a   : > { %3745 = vmatmul.msk.f32.vlgmr.msra.gmra.mxu1 %vm1013_vm9, %v1856_v53  ;;  %v2023_v53 = vld [vmem:[%s5260_s19 + $0x48] sm:$0xff] }
 0xa3b   : > { %2040 = vmatpush.msra.mxu3 %v2023_v53  ;;  %v3787_v53 = vld [vmem:[%s5300_s30 + $0xa8] sm:$0xff] }
 0xa41   : > { %v1859_v54 = vpop.f32.mrf.mxu0 }
 0xa42   : > { %3746 = vmatmul.msk.f32.gmra.mxu1 %vm1013_vm9, %v1859_v54  ;;  %v2022_v54 = vld [vmem:[%s5260_s19 + $0x40] sm:$0xff] }
 0xa43   : > { %2041 = vmatpush.msra.mxu3 %v2022_v54  ;;  %v3751_v54 = vld [vmem:[%s5299_s29 + $0x80] sm:$0xff] }
 0xa45   : > { %2042 = vmatpush.msra.mxu3 %v2021_v57  ;;  %v3758_v57 = vld [vmem:[%s5300_s30 + $0x80] sm:$0xff] }
 0xab7   : > { %v1887_v60 = vpop.f32.mrf.mxu1 }
 0xab8   : > { %v1893_v61 = vadd.f32 %v1887_v60, %v1647_v58  ;;  %v2020_v58 = vld [vmem:[%s5260_s19 + $0x30] sm:$0xff]  ;;  %v2019_v60 = vld [vmem:[%s5260_s19 + $0x28] sm:$0xff] }
 0xab9   : > { %2043 = vmatpush.msra.mxu3 %v2020_v58  ;;  %v3765_v58 = vld [vmem:[%s5252_s11 + $0x80] sm:$0xff] }
 0xaba   : > { %v1895_v63 = vadd.f32 %v1893_v61, %v4239_v12  ;;  %v2018_v61 = vld [vmem:[%s5260_s19 + $0x20] sm:$0xff] }
 0xabb   : > { %2044 = vmatpush.msra.mxu3 %v2019_v60  ;;  %v3786_v60 = vld [vmem:[%s5300_s30 + $0xa0] sm:$0xff] }
 0xabc   : > { %v4586_v0 = vadd.f32 %v3934_v62, %v1895_v63  ;;  %v2016_v63 = vld [vmem:[%s5260_s19 + $0x10] sm:$0xff] }
 0xabd   : > { %2045 = vmatpush.msra.mxu3 %v2018_v61 }
 0xabe   : > { %v1905_v1 = vsel %vm852_vm1, %v4586_v0, 0.0 }
 0xabf   : > { %1906 = vadd.xlane.f32.xlu2 %v1905_v1  ;;  %v1890_v15 = vpop.f32.mrf.mxu1  ;;  %v2015_v1 = vld [vmem:[%s5260_s19 + $0x8] sm:$0xff] }
 0xac0   : > { %v1894_v21 = vadd.f32 %v1890_v15, %v4566_v7  ;;  %v2014_v15 = vld [vmem:[%s5260_s19] sm:$0xff] }
 0xac2   : > { %v1896_v55 = vadd.f32 %v1894_v21, %v4246_v17  ;;  %v3937_v21 = vld [vmem:[%s5259_s18] ss:$0 sm:$0xff] }
 0xac4   : > { %v4592_v56 = vadd.f32 %v3934_v62, %v1896_v55  ;;  %v2017_v62 = vld [vmem:[%s5260_s19 + $0x18] sm:$0xff] }
 0xac5   : > { %2046 = vmatpush.msra.mxu3 %v2017_v62 }
 0xac6   : > { %v1908_v2 = vsel %vm852_vm1, %v4592_v56, 0.0 }
 0xac7   : > { %1909 = vadd.xlane.f32.xlu0 %v1908_v2  ;;  %2047 = vmatpush.msra.mxu3 %v2016_v63 }
 0xac9   : > { %2048 = vmatpush.msra.mxu3 %v2015_v1  ;;  %v3782_v1 = vld [vmem:[%s5299_s29 + $0xb8] sm:$0xff] }
 0xacb   : > { %2049 = vmatpush.msra.mxu3 %v2014_v15  ;;  %v3781_v15 = vld [vmem:[%s5299_s29 + $0xb0] sm:$0xff] }
 0xb32   : > { %v1907_v3 = vpop.xlane.xlu2 %1906 }
 0xb33   : > { %v1911_v12 = vmul.f32 %v1907_v3, %v4250_v25 }
 0xb35   : > { %v1913_v4 = vsub.f32 %v4586_v0, %v1911_v12 }
 0xb37   : > { %v1915_v5 = vmul.f32 %v1913_v4, %v1913_v4 }
 0xb39   : > { %v1917_v6 = vsel %vm852_vm1, %v1915_v5, 0.0 }
 0xb3a   : > { %1918 = vadd.xlane.f32.xlu1 %v1917_v6  ;;  %v1910_v8 = vpop.xlane.xlu0 %1909 }
 0xb3b   : > { %v1912_v7 = vmul.f32 %v1910_v8, %v4250_v25 }
 0xb3d   : > { %v1914_v17 = vsub.f32 %v4592_v56, %v1912_v7 }
 0xb3f   : > { %v1916_v9 = vmul.f32 %v1914_v17, %v1914_v17 }
 0xb41   : > { %v1920_v10 = vsel %vm852_vm1, %v1916_v9, 0.0 }
 0xb42   : > { %1921 = vadd.xlane.f32.xlu2 %v1920_v10 }
 0xbad   : > { %v1919_v18 = vpop.xlane.xlu1 %1918 }
 0xbae   : > { %v1923_v19 = vmul.f32 %v1919_v18, %v4250_v25 }
 0xbb0   : > { %v1925_v20 = vadd.f32 1e-05, %v1923_v19 }
 0xbb2   : > { %3998 = vrsqrt.f32 %v1925_v20  ;;  %vm1933_vm3 = vweird.f32 %v1925_v20 }
 0xbb5   : > { %v1922_v59 = vpop.xlane.xlu2 %1921 }
 0xbb6   : > { %v1924_v26 = vmul.f32 %v1922_v59, %v4250_v25  ;;  %v3938_v59 = vld [vmem:[%s5261_s20] ss:$0 sm:$0xff] }
 0xbb8   : > { %v3999_v27 = vpop.eup %3998  ;;  %v1926_v28 = vadd.f32 1e-05, %v1924_v26 }
 0xbb9   : > { %v1928_v29 = vmul.f32 %v3999_v27, %v1925_v20  ;;  %vm1934_vm2 = vweird.f32 %v3999_v27 }
 0xbba   : > { %4000 = vrsqrt.f32 %v1926_v28  ;;  %vm1935_vm4 = vmor %vm1933_vm3, %vm1934_vm2  ;;  %vm1943_vm6 = vweird.f32 %v1926_v28 }
 0xbbb   : > { %v1929_v30 = vmul.f32 %v3999_v27, %v1928_v29 }
 0xbbd   : > { %v1930_v31 = vmul.f32 0.5, %v1929_v30 }
 0xbbf   : > { %v1931_v32 = vsub.f32 1.5, %v1930_v31 }
 0xbc0   : > { %v4001_v33 = vpop.eup %4000 }
 0xbc1   : > { %v1932_v34 = vmul.f32 %v3999_v27, %v1931_v32  ;;  %v1938_v35 = vmul.f32 %v4001_v33, %v1926_v28  ;;  %vm1944_vm5 = vweird.f32 %v4001_v33 }
 0xbc2   : > { %vm1945_vm7 = vmor %vm1943_vm6, %vm1944_vm5 }
 0xbc3   : > { %v1936_v37 = vsel %vm1935_vm4, %v3999_v27, %v1932_v34  ;;  %v1939_v38 = vmul.f32 %v4001_v33, %v1938_v35 }
 0xbc4   : > { %v1947_v39 = vmul.f32 %v1936_v37, %v1913_v4 }
 0xbc5   : > { %v1940_v41 = vmul.f32 0.5, %v1939_v38 }
 0xbc6   : > { %v1952_v42 = vmul.f32 %v3935_v36, %v1947_v39 }
 0xbc7   : > { %v1941_v43 = vsub.f32 1.5, %v1940_v41 }
 0xbc8   : > { %v1957_v44 = vadd.f32 %v3936_v40, %v1952_v42  ;;  %v3754_v42 = vld [vmem:[%s5299_s29 + $0x98] sm:$0xff] }
 0xbc9   : > { %v1942_v45 = vmul.f32 %v4001_v33, %v1941_v43  ;;  %v3761_v43 = vld [vmem:[%s5300_s30 + $0x98] sm:$0xff]  ;;  %2145 = vmatpush.msra.mxu0 %v3754_v42 }
 0xbca   : > { %3747 = vmatmul.msk.f32.vlgmr.msra.gmra.mxu2 %vm852_vm1, %v1957_v44  ;;  %v3768_v44 = vld [vmem:[%s5252_s11 + $0x98] sm:$0xff]  ;;  %2178 = vmatpush.msrb.mxu1 %v3761_v43 }
 0xbcb   : > { %v1946_v46 = vsel %vm1945_vm7, %v4001_v33, %v1942_v45  ;;  %v3789_v45 = vld [vmem:[%s5300_s30 + $0xb8] sm:$0xff]  ;;  %2211 = vmatpush.msrb.mxu2 %v3768_v44  ;;  %v3795_v44 = vld [vmem:[%s5252_s11 + $0xb0] sm:$0xff] }
 0xbcc   : > { %v1948_v47 = vmul.f32 %v1946_v46, %v1914_v17  ;;  %2393 = vmatpush.msrb.mxu3 %v3789_v45  ;;  %v3753_v46 = vld [vmem:[%s5299_s29 + $0x90] sm:$0xff]  ;;  %v3944_v45 = vld [vmem:[%s5303_s6 + $0x5] ss:$0 sm:$0xff] }
 0xbcd   : > { %2146 = vmatpush.msra.mxu0 %v3753_v46 }
 0xbce   : > { %v1953_v48 = vmul.f32 %v3935_v36, %v1948_v47  ;;  %v3760_v47 = vld [vmem:[%s5300_s30 + $0x90] sm:$0xff] }
 0xbcf   : > { %2179 = vmatpush.msrb.mxu1 %v3760_v47  ;;  %2147 = vmatpush.msra.mxu0 %v3752_v50  ;;  %v3794_v47 = vld [vmem:[%s5252_s11 + $0xa8] sm:$0xff] }
 0xbd0   : > { %v1958_v49 = vadd.f32 %v3936_v40, %v1953_v48  ;;  %v3767_v48 = vld [vmem:[%s5252_s11 + $0x90] sm:$0xff] }
 0xbd1   : > { %2212 = vmatpush.msrb.mxu2 %v3767_v48  ;;  %2180 = vmatpush.msrb.mxu1 %v3759_v51 }
 0xbd2   : > { %3748 = vmatmul.msk.f32.gmra.mxu2 %vm852_vm1, %v1958_v49  ;;  %v3788_v49 = vld [vmem:[%s5300_s30 + $0xb0] sm:$0xff]  ;;  %2148 = vmatpush.msra.mxu0 %v3751_v54 }
 0xbd3   : > { %2394 = vmatpush.msrb.mxu3 %v3788_v49  ;;  %2213 = vmatpush.msrb.mxu2 %v3766_v52  ;;  %v3793_v49 = vld [vmem:[%s5252_s11 + $0xa0] sm:$0xff] }
 0xbd4   : > { %2181 = vmatpush.msrb.mxu1 %v3758_v57 }
 0xbd5   : > { %2395 = vmatpush.msrb.mxu3 %v3787_v53  ;;  %2214 = vmatpush.msrb.mxu2 %v3765_v58 }
 0xbd7   : > { %2396 = vmatpush.msrb.mxu3 %v3786_v60  ;;  %2360 = vmatpush.msra.mxu2 %v3782_v1 }
 0xbd9   : > { %2361 = vmatpush.msra.mxu2 %v3781_v15 }
 0xc4d   : > { %v1990_v55 = vpop.f32.mrf.mxu2 }
 0xc4e   : > { %v1991_v2 = vadd.f32 %v3937_v21, %v1990_v55  ;;  %v3780_v55 = vld [vmem:[%s5299_s29 + $0xa8] sm:$0xff] }
 0xc4f   : > { %2362 = vmatpush.msra.mxu2 %v3780_v55 }
 0xc50   : > { %v1996_v3 = vmul.f32 %v1991_v2, %v1991_v2 }
 0xc52   : > { %v1998_v12 = vmul.f32 %v1996_v3, %v1991_v2  ;;  %v3779_v3 = vld [vmem:[%s5299_s29 + $0xa0] sm:$0xff] }
 0xc53   : > { %2363 = vmatpush.msra.mxu2 %v3779_v3 }
 0xc54   : > { %v2000_v4 = vmul.f32 0.044715, %v1998_v12 }
 0xc55   : > { %v1993_v5 = vpop.f32.mrf.mxu2 }
 0xc56   : > { %v2002_v6 = vadd.f32 %v2000_v4, %v1991_v2  ;;  %v1994_v8 = vadd.f32 %v3937_v21, %v1993_v5 }
 0xc58   : > { %v2004_v7 = vmul.f32 0.7978846, %v2002_v6  ;;  %v1997_v17 = vmul.f32 %v1994_v8, %v1994_v8 }
 0xc5a   : > { %4002 = vtanh.f32 %v2004_v7  ;;  %v1999_v9 = vmul.f32 %v1997_v17, %v1994_v8 }
 0xc5c   : > { %v2001_v10 = vmul.f32 0.044715, %v1999_v9 }
 0xc5e   : > { %v2003_v11 = vadd.f32 %v2001_v10, %v1994_v8 }
 0xc60   : > { %v4003_v13 = vpop.eup %4002  ;;  %v2005_v14 = vmul.f32 0.7978846, %v2003_v11  ;;  %v3939_v11 = vld [vmem:[%s5301_s0 + $0x1] ss:$0 sm:$0xff]  ;;  %s803_s0 = scalar_lea.vmem %s5307_s7, %s3640_s8 }
 0xc61   : > { %v2008_v16 = vadd.f32 1.0, %v4003_v13 }
 0xc62   : > { %4004 = vtanh.f32 %v2005_v14 }
 0xc63   : > { %v2010_v18 = vmul.f32 0.5, %v2008_v16  ;;  %v3940_v16 = vld [vmem:[%s5302_s5 + $0x1] ss:$0 sm:$0xff] }
 0xc65   : > { %v2012_v19 = vmul.f32 %v2010_v18, %v1991_v2 }
 0xc67   : > { %2050 = vmatmul.f32.vlgmr.msra.gmra.mxu3 %v2012_v19 }
 0xc68   : > { %v4005_v20 = vpop.eup %4004 }
 0xc69   : > { %v2009_v22 = vadd.f32 1.0, %v4005_v20 }
 0xc6b   : > { %v2011_v23 = vmul.f32 0.5, %v2009_v22 }
 0xc6d   : > { %v2013_v24 = vmul.f32 %v2011_v23, %v1994_v8 }
 0xc6f   : > { %2053 = vmatmul.f32.gmra.mxu3 %v2013_v24 }
 0xcea   : > { %v2051_v26 = vpop.f32.mrf.mxu3 }
 0xceb   : > { %v2052_v27 = vadd.f32 %v3938_v59, %v2051_v26 }
 0xced   : > { %v4679_v28 = vadd.f32 %v2052_v27, %v4586_v0 }
 0xcef   : > { %v2063_v29 = vsel %vm852_vm1, %v4679_v28, 0.0 }
 0xcf0   : > { %2064 = vadd.xlane.f32.xlu0 %v2063_v29 }
 0xcf2   : > { %v2054_v30 = vpop.f32.mrf.mxu3 }
 0xcf3   : > { %v2055_v31 = vadd.f32 %v3938_v59, %v2054_v30 }
 0xcf5   : > { %v4684_v32 = vadd.f32 %v2055_v31, %v4592_v56  ;;  %v3942_v31 = vld [vmem:[%s5303_s6 + $0x4] ss:$0 sm:$0xff] }
 0xcf7   : > { %v2066_v33 = vsel %vm852_vm1, %v4684_v32, 0.0 }
 0xcf8   : > { %2067 = vadd.xlane.f32.xlu1 %v2066_v33 }
 0xd63   : > { %v2065_v34 = vpop.xlane.xlu0 %2064 }
 0xd64   : > { %v2069_v35 = vmul.f32 %v2065_v34, %v4250_v25 }
 0xd66   : > { %v4690_v36 = vsub.f32 %v4679_v28, %v2069_v35 }
 0xd68   : > { %v2073_v0 = vmul.f32 %v4690_v36, %v4690_v36 }
 0xd6a   : > { %v2075_v37 = vsel %vm852_vm1, %v2073_v0, 0.0 }
 0xd6b   : > { %v2068_v38 = vpop.xlane.xlu1 %2067  ;;  %2076 = vadd.xlane.f32.xlu2 %v2075_v37  ;;  %v3941_v37 = vld [vmem:[%s5304_s1 + $0x4] ss:$0 sm:$0xff] }
 0xd6c   : > { %v2070_v56 = vmul.f32 %v2068_v38, %v4250_v25 }
 0xd6e   : > { %v4697_v39 = vsub.f32 %v4684_v32, %v2070_v56  ;;  %v3796_v56 = vld [vmem:[%s5252_s11 + $0xb8] sm:$0xff] }
 0xd70   : > { %v2074_v40 = vmul.f32 %v4697_v39, %v4697_v39 }
 0xd72   : > { %v2078_v41 = vsel %vm852_vm1, %v2074_v40, 0.0 }
 0xd73   : > { %2079 = vadd.xlane.f32.xlu0 %v2078_v41 }
 0xdde   : > { %v2077_v61 = vpop.xlane.xlu2 %2076 }
 0xddf   : > { %v2081_v62 = vmul.f32 %v2077_v61, %v4250_v25 }
 0xde1   : > { %v2083_v63 = vadd.f32 1e-05, %v2081_v62 }
 0xde3   : > { %4006 = vrsqrt.f32 %v2083_v63  ;;  %vm2091_vm11 = vweird.f32 %v2083_v63 }
 0xde6   : > { %v2080_v21 = vpop.xlane.xlu0 %2079 }
 0xde7   : > { %v2082_v2 = vmul.f32 %v2080_v21, %v4250_v25 }
 0xde9   : > { %v4007_v12 = vpop.eup %4006  ;;  %v2084_v4 = vadd.f32 1e-05, %v2082_v2 }
 0xdea   : > { %v2086_v5 = vmul.f32 %v4007_v12, %v2083_v63  ;;  %vm2092_vm8 = vweird.f32 %v4007_v12  ;;  %v3946_v63 = vld [vmem:[%s5253_s12 + $0x5] ss:$0 sm:$0xff] }
 0xdeb   : > { %4008 = vrsqrt.f32 %v2084_v4  ;;  %vm2093_vm12 = vmor %vm2091_vm11, %vm2092_vm8  ;;  %vm2101_vm14 = vweird.f32 %v2084_v4 }
 0xdec   : > { %v2087_v6 = vmul.f32 %v4007_v12, %v2086_v5 }
 0xdee   : > { %v2088_v8 = vmul.f32 0.5, %v2087_v6 }
 0xdf0   : > { %v2089_v7 = vsub.f32 1.5, %v2088_v8 }
 0xdf1   : > { %v4009_v17 = vpop.eup %4008 }
 0xdf2   : > { %v2090_v9 = vmul.f32 %v4007_v12, %v2089_v7  ;;  %v2096_v10 = vmul.f32 %v4009_v17, %v2084_v4  ;;  %vm2102_vm13 = vweird.f32 %v4009_v17 }
 0xdf3   : > { %vm2103_vm15 = vmor %vm2101_vm14, %vm2102_vm13 }
 0xdf4   : > { %v2094_v13 = vsel %vm2093_vm12, %v4007_v12, %v2090_v9  ;;  %v2097_v14 = vmul.f32 %v4009_v17, %v2096_v10 }
 0xdf5   : > { %v2105_v18 = vmul.f32 %v2094_v13, %v4690_v36 }
 0xdf6   : > { %v2098_v19 = vmul.f32 0.5, %v2097_v14 }
 0xdf7   : > { %v2110_v20 = vmul.f32 %v3939_v11, %v2105_v18 }
 0xdf8   : > { %v2099_v22 = vsub.f32 1.5, %v2098_v19 }
 0xdf9   : > { %v4771_v23 = vadd.f32 %v3940_v16, %v2110_v20 }
 0xdfa   : > { %v2100_v24 = vmul.f32 %v4009_v17, %v2099_v22 }
 0xdfb   : > { %3756 = vmatmul.msk.f32.vlgmr.msra.gmra.mxu0 %vm852_vm1, %v4771_v23  ;;  %3763 = vmatmul.msk.f32.vlgmr.msrb.gmra.mxu1 %vm852_vm1, %v4771_v23 }
 0xdfc   : > { %v2104_v59 = vsel %vm2103_vm15, %v4009_v17, %v2100_v24  ;;  %3770 = vmatmul.msk.f32.vlgmr.msrb.gmra.mxu2 %vm852_vm1, %v4771_v23  ;;  %3791 = vmatmul.msk.f32.vlgmr.msrb.gmra.mxu3 %vm852_vm1, %v4771_v23 }
 0xdfd   : > { %v2106_v26 = vmul.f32 %v2104_v59, %v4697_v39  ;;  %v3943_v39 = vld [vmem:[%s5253_s12 + $0x4] ss:$0 sm:$0xff] }
 0xdff   : > { %v2111_v27 = vmul.f32 %v3939_v11, %v2106_v26 }
 0xe01   : > { %v4782_v29 = vadd.f32 %v3940_v16, %v2111_v27 }
 0xe03   : > { %3757 = vmatmul.msk.f32.gmra.mxu0 %vm852_vm1, %v4782_v29  ;;  %3764 = vmatmul.msk.f32.gmra.mxu1 %vm852_vm1, %v4782_v29 }
 0xe04   : > { %3771 = vmatmul.msk.f32.gmra.mxu2 %vm852_vm1, %v4782_v29  ;;  %3792 = vmatmul.msk.f32.gmra.mxu3 %vm852_vm1, %v4782_v29 }
 0xe0c   : > { %3784 = vmatmul.msk.f32.vlgmr.msra.gmra.mxu2 %vm852_vm1, %v4771_v23 }
 0xe14   : > { %3785 = vmatmul.msk.f32.gmra.mxu2 %vm852_vm1, %v4782_v29 }
 0xe78   : > { %v2183_v30 = vpop.f32.mrf.mxu1  ;;  %v2150_v0 = vpop.f32.mrf.mxu0 }
 0xe79   : > { %v2184_v38 = vadd.f32 %v3942_v31, %v2183_v30  ;;  %v2151_v41 = vadd.f32 %v3941_v37, %v2150_v0  ;;  %v3813_v0 = vld [vmem:[%s5299_s29 + $0xd0] sm:$0xff] }
 0xe7f   : > { %v2216_v33 = vpop.f32.mrf.mxu2  ;;  %v2398_v34 = vpop.f32.mrf.mxu3 }
 0xe80   : > { %v2186_v35 = vpop.f32.mrf.mxu1  ;;  %v2217_v46 = vadd.f32 %v3943_v39, %v2216_v33  ;;  %v2153_v50 = vpop.f32.mrf.mxu0  ;;  %v2399_v51 = vadd.f32 %v3944_v45, %v2398_v34  ;;  %v3814_v33 = vld [vmem:[%s5299_s29 + $0xd8] sm:$0xff] }
 0xe81   : > { %v2187_v36 = vadd.f32 %v3942_v31, %v2186_v35  ;;  %v2154_v52 = vadd.f32 %v3941_v37, %v2153_v50 }
 0xe83   : > { %3772 = vmatpush.xpose.msk.msrb.mxu0 %vm1013_vm9, %v2187_v36 }
 0xe87   : > { %v2219_v40 = vpop.f32.mrf.mxu2  ;;  %3773 = vmatpush.xpose.msk.msrb.mxu0 %vm1013_vm9, %v2184_v38  ;;  %v2401_v43 = vpop.f32.mrf.mxu3  ;;  %v3812_v38 = vld [vmem:[%s5299_s29 + $0xc8] sm:$0xff] }
 0xe88   : > { %v2220_v42 = vadd.f32 %v3943_v39, %v2219_v40  ;;  %v2402_v48 = vadd.f32 %v3944_v45, %v2401_v43  ;;  %v3811_v40 = vld [vmem:[%s5299_s29 + $0xc0] sm:$0xff] }
 0xe8a   : > { %2327 = vmatpush.msra.mxu1 %v2220_v42  ;;  %3774 = vmatmul.msk.f32.vlgmr.msrb.gmra.mxu0 %vm1013_vm9, %v2151_v41 }
 0xe8b   : > { %2426 = vmatpush.msra.mxu0 %v3796_v56 }
 0xe8c   : > { %2328 = vmatpush.msra.mxu1 %v2217_v46 }
 0xe8d   : > { %2427 = vmatpush.msra.mxu0 %v3795_v44  ;;  %v3945_v44 = vld [vmem:[%s5304_s1 + $0x5] ss:$0 sm:$0xff] }
 0xe8e   : > { %3800 = vmatpush.xpose.msk.msrb.mxu1 %vm1013_vm9, %v2402_v48  ;;  %v3778_v48 = vld [vmem:[%s5254_s13 + $0x20] sm:$0xff] }
 0xe8f   : > { %2428 = vmatpush.msra.mxu0 %v3794_v47  ;;  %v2365_v43 = vpop.f32.mrf.mxu2 }
 0xe90   : > { %v2366_v45 = vadd.f32 %v3945_v44, %v2365_v43  ;;  %v3843_v43 = vld [vmem:[%s5299_s29 + $0xf0] sm:$0xff] }
 0xe91   : > { %2429 = vmatpush.msra.mxu0 %v3793_v49 }
 0xe92   : > { %3801 = vmatpush.xpose.msk.msrb.mxu1 %vm1013_vm9, %v2399_v51  ;;  %3775 = vmatmul.msk.f32.gmra.mxu0 %vm1013_vm9, %v2154_v52 }
 0xe93   : > { %2603 = vmatpush.msrb.mxu0 %v3778_v48  ;;  %v3948_v48 = vld [vmem:[%s5303_s6 + $0x6] ss:$0 sm:$0xff] }
 0xe97   : > { %v2368_v46 = vpop.f32.mrf.mxu2 }
 0xe98   : > { %v2369_v47 = vadd.f32 %v3945_v44, %v2368_v46  ;;  %v3842_v44 = vld [vmem:[%s5299_s29 + $0xe8] sm:$0xff] }
 0xe9a   : > { %3798 = vmatmul.msk.f32.vlgmr.msra.gmra.mxu0 %vm852_vm1, %v4771_v23 }
 0xea2   : > { %3799 = vmatmul.msk.f32.gmra.mxu0 %vm852_vm1, %v4782_v29 }
 0xf07   : > { %v2251_v53 = vpop.f32.mrf.mxu0 }
 0xf08   : > { %v2257_v54 = vmul.f32 0.35355338, %v2251_v53 }
 0xf0a   : > { %v2259_v57 = vsel %vm1051_vm10, %v2257_v54, -inf }
 0xf0b   : > { %2260 = vmax.xlane.f32.xlu1 %v2259_v57 }
 0xf0f   : > { %v2254_v58 = vpop.f32.mrf.mxu0 }
 0xf10   : > { %v2258_v60 = vmul.f32 0.35355338, %v2254_v58 }
 0xf12   : > { %v2262_v61 = vsel %vm1051_vm10, %v2258_v60, -inf }
 0xf13   : > { %2263 = vmax.xlane.f32.xlu2 %v2262_v61 }
 0xf17   : > { %v2431_v62 = vpop.f32.mrf.mxu0 }
 0xf18   : > { %v2432_v21 = vadd.f32 %v3946_v63, %v2431_v62 }
 0xf1f   : > { %v2434_v1 = vpop.f32.mrf.mxu0 }
 0xf20   : > { %v2435_v15 = vadd.f32 %v3946_v63, %v2434_v1 }
 0xf22   : > { %2542 = vmatpush.msrb.mxu2 %v2435_v15 }
 0xf24   : > { %2543 = vmatpush.msrb.mxu2 %v2432_v21 }
 0xf7e   : > { %v2261_v55 = vpop.xlane.xlu1 %2260 }
 0xf7f   : > { %v2265_v2 = vsub.f32 %v2257_v54, %v2261_v55 }
 0xf81   : > { %v2267_v3 = vmul.f32 1.442695, %v2265_v2 }
 0xf83   : > { %4010 = vpow2.f32 %v2267_v3 }
 0xf86   : > { %v2264_v12 = vpop.xlane.xlu2 %2263 }
 0xf87   : > { %v2266_v4 = vsub.f32 %v2258_v60, %v2264_v12  ;;  %v3821_v12 = vld [vmem:[%s5300_s30 + $0xd8] sm:$0xff] }
 0xf88   : > { %2666 = vmatpush.msra.mxu2 %v3821_v12  ;;  %v3838_v12 = vld [vmem:[%s5254_s13 + $0x30] sm:$0xff] }
 0xf89   : > { %v4011_v5 = vpop.eup %4010  ;;  %v2269_v6 = vmul.f32 1.442695, %v2266_v4  ;;  %v3820_v4 = vld [vmem:[%s5300_s30 + $0xd0] sm:$0xff] }
 0xf8a   : > { %v2271_v8 = vsel %vm1051_vm10, %v4011_v5, 0.0  ;;  %2667 = vmatpush.msra.mxu2 %v3820_v4  ;;  %v3949_v4 = vld [vmem:[%s5253_s12 + $0x6] ss:$0 sm:$0xff] }
 0xf8b   : > { %4012 = vpow2.f32 %v2269_v6  ;;  %2272 = vadd.xlane.f32.xlu0 %v2271_v8  ;;  %v3818_v8 = vld [vmem:[%s5300_s30 + $0xc0] sm:$0xff] }
 0xf91   : > { %v4013_v7 = vpop.eup %4012 }
 0xf92   : > { %v2274_v17 = vsel %vm1051_vm10, %v4013_v7, 0.0 }
 0xf93   : > { %2275 = vadd.xlane.f32.xlu1 %v2274_v17 }
 0xffe   : > { %v2273_v9 = vpop.xlane.xlu0 %2272 }
 0xfff   : > { %4014 = vrcp.f32 %v2273_v9  ;;  %v2288_v16 = vand.u32 2147483648, %v2273_v9  ;;  %v2286_v19 = vand.u32 2147483647, %v2273_v9  ;;  %vm2282_vm2 = vweird.f32 %v2273_v9 }
0x1001   : > { %v2289_v24 = vor.u32 1.1754944e-38, %v2288_v16  ;;  %vm2287_vm4 = vcmp.eq.f32.partialorder %v2286_v19, 8.507059e+37 }
0x1005   : > { %v4015_v10 = vpop.eup %4014 }
0x1006   : > { %v2278_v11 = vmul.f32 %v4015_v10, %v2273_v9  ;;  %v2276_v13 = vpop.xlane.xlu1 %2275  ;;  %vm2283_vm0 = vweird.f32 %v4015_v10 }
0x1007   : > { %4016 = vrcp.f32 %v2276_v13  ;;  %vm2284_vm3 = vmor %vm2282_vm2, %vm2283_vm0  ;;  %v2303_v34 = vand.u32 2147483648, %v2276_v13  ;;  %v2301_v36 = vand.u32 2147483647, %v2276_v13  ;;  %vm2297_vm6 = vweird.f32 %v2276_v13 }
0x1008   : > { %v2279_v14 = vsub.f32 1.0, %v2278_v11 }
0x1009   : > { %v2304_v56 = vor.u32 1.1754944e-38, %v2303_v34  ;;  %vm2302_vm8 = vcmp.eq.f32.partialorder %v2301_v36, 8.507059e+37 }
0x100a   : > { %v2280_v18 = vmul.f32 %v4015_v10, %v2279_v14 }
0x100c   : > { %v2281_v20 = vadd.f32 %v4015_v10, %v2280_v18 }
0x100d   : > { %v4017_v22 = vpop.eup %4016 }
0x100e   : > { %v2285_v59 = vsel %vm2284_vm3, %v4015_v10, %v2281_v20  ;;  %v2293_v26 = vmul.f32 %v4017_v22, %v2276_v13  ;;  %vm2298_vm5 = vweird.f32 %v4017_v22 }
0x100f   : > { %v2290_v27 = vsel %vm2287_vm4, %v2289_v24, %v2285_v59  ;;  %vm2299_vm7 = vmor %vm2297_vm6, %vm2298_vm5 }
0x1010   : > { %v2294_v30 = vsub.f32 1.0, %v2293_v26  ;;  %v2291_v31 = vmul.f32 %v4011_v5, %v2290_v27  ;;  %v3819_v5 = vld [vmem:[%s5300_s30 + $0xc8] sm:$0xff] }
0x1011   : > { %2668 = vmatpush.msra.mxu2 %v3819_v5 }
0x1012   : > { %v2295_v35 = vmul.f32 %v4017_v22, %v2294_v30  ;;  %3776 = vmatmul.msk.f32.vlgmr.msra.gmra.mxu1 %vm1051_vm10, %v2291_v31 }
0x1013   : > { %2633 = vmatpush.msra.mxu1 %v3814_v33  ;;  %2669 = vmatpush.msra.mxu2 %v3818_v8 }
0x1014   : > { %v2296_v37 = vadd.f32 %v4017_v22, %v2295_v35 }
0x1015   : > { %2634 = vmatpush.msra.mxu1 %v3813_v0 }
0x1016   : > { %v2300_v39 = vsel %vm2299_vm7, %v4017_v22, %v2296_v37  ;;  %v3806_v37 = vld [vmem:[%s5254_s13 + $0x28] sm:$0xff] }
0x1017   : > { %v2305_v41 = vsel %vm2302_vm8, %v2304_v56, %v2300_v39  ;;  %2635 = vmatpush.msra.mxu1 %v3812_v38  ;;  %2574 = vmatpush.msra.mxu3 %v3806_v37  ;;  %v3828_v38 = vld [vmem:[%s5252_s11 + $0xd8] sm:$0xff]  ;;  %v3827_v56 = vld [vmem:[%s5252_s11 + $0xd0] sm:$0xff]  ;;  %v3826_v39 = vld [vmem:[%s5252_s11 + $0xc8] sm:$0xff] }
0x1018   : > { %v2306_v42 = vmul.f32 %v4013_v7, %v2305_v41  ;;  %v3844_v41 = vld [vmem:[%s5299_s29 + $0xf8] sm:$0xff]  ;;  %v3856_v37 = vld [vmem:[%s5252_s11 + $0xe8] sm:$0xff] }
0x1019   : > { %2636 = vmatpush.msra.mxu1 %v3811_v40  ;;  %2699 = vmatpush.msrb.mxu3 %v3828_v38  ;;  %v3825_v40 = vld [vmem:[%s5252_s11 + $0xc0] sm:$0xff] }
0x101a   : > { %3777 = vmatmul.msk.f32.gmra.mxu1 %vm1051_vm10, %v2306_v42 }
0x101b   : > { %2700 = vmatpush.msrb.mxu3 %v3827_v56  ;;  %v3855_v56 = vld [vmem:[%s5252_s11 + $0xe0] sm:$0xff] }
0x101d   : > { %2701 = vmatpush.msrb.mxu3 %v3826_v39 }
0x101f   : > { %2702 = vmatpush.msrb.mxu3 %v3825_v40 }
0x1022   : > { %3802 = vmatmul.msk.f32.vlgmr.msrb.gmra.mxu1 %vm1013_vm9, %v2366_v45  ;;  %v3841_v45 = vld [vmem:[%s5299_s29 + $0xe0] sm:$0xff] }
0x102a   : > { %3803 = vmatmul.msk.f32.gmra.mxu1 %vm1013_vm9, %v2369_v47 }
0x1032   : > { %3816 = vmatmul.msk.f32.vlgmr.msra.gmra.mxu1 %vm852_vm1, %v4771_v23 }
0x103a   : > { %3817 = vmatmul.msk.f32.gmra.mxu1 %vm852_vm1, %v4782_v29 }
0x108f   : > { %v2330_v49 = vpop.f32.mrf.mxu1 }
0x1090   : > { %3809 = vmatmul.msk.f32.vlgmr.msrb.gmra.mxu0 %vm1013_vm9, %v2330_v49 }
0x1097   : > { %v2333_v50 = vpop.f32.mrf.mxu1 }
0x1098   : > { %3810 = vmatmul.msk.f32.gmra.mxu0 %vm1013_vm9, %v2333_v50 }
0x109f   : > { %v2466_v51 = vpop.f32.mrf.mxu1 }
0x10a0   : > { %v2472_v52 = vmul.f32 0.35355338, %v2466_v51 }
0x10a2   : > { %v2474_v53 = vsel %vm1051_vm10, %v2472_v52, -inf }
0x10a3   : > { %2475 = vmax.xlane.f32.xlu2 %v2474_v53 }
0x10a7   : > { %v2469_v54 = vpop.f32.mrf.mxu1 }
0x10a8   : > { %v2473_v57 = vmul.f32 0.35355338, %v2469_v54  ;;  %v3851_v54 = vld [vmem:[%s5300_s30 + $0xf8] sm:$0xff] }
0x10aa   : > { %v2477_v58 = vsel %vm1051_vm10, %v2473_v57, -inf }
0x10ab   : > { %2478 = vmax.xlane.f32.xlu0 %v2477_v58  ;;  %v3850_v58 = vld [vmem:[%s5300_s30 + $0xf0] sm:$0xff] }
0x10af   : > { %v2638_v51 = vpop.f32.mrf.mxu1 }
0x1116   : > { %v2476_v60 = vpop.xlane.xlu2 %2475 }
0x1117   : > { %v2480_v61 = vsub.f32 %v2472_v52, %v2476_v60  ;;  %v3947_v52 = vld [vmem:[%s5304_s1 + $0x6] ss:$0 sm:$0xff]  ;;  %v3849_v60 = vld [vmem:[%s5300_s30 + $0xe8] sm:$0xff] }
0x1119   : > { %v2482_v62 = vmul.f32 1.442695, %v2480_v61  ;;  %v3848_v61 = vld [vmem:[%s5300_s30 + $0xe0] sm:$0xff] }
0x111b   : > { %4018 = vpow2.f32 %v2482_v62  ;;  %v2641_v62 = vpop.f32.mrf.mxu1 }
0x111e   : > { %v2479_v63 = vpop.xlane.xlu0 %2478 }
0x111f   : > { %v2481_v1 = vsub.f32 %v2473_v57, %v2479_v63  ;;  %v2639_v57 = vadd.f32 %v3947_v52, %v2638_v51  ;;  %v2642_v63 = vadd.f32 %v3947_v52, %v2641_v62 }
0x1121   : > { %v4019_v15 = vpop.eup %4018  ;;  %v2484_v21 = vmul.f32 1.442695, %v2481_v1  ;;  %v4950_v1 = vpop.f32.mrf.mxu0 }
0x1122   : > { %v2486_v55 = vsel %vm1051_vm10, %v4019_v15, 0.0 }
0x1123   : > { %4020 = vpow2.f32 %v2484_v21  ;;  %2487 = vadd.xlane.f32.xlu1 %v2486_v55 }
0x1129   : > { %v4021_v2 = vpop.eup %4020  ;;  %v2608_v21 = vpop.f32.mrf.mxu0 }
0x112a   : > { %v2489_v3 = vsel %vm1051_vm10, %v4021_v2, 0.0 }
0x112b   : > { %2490 = vadd.xlane.f32.xlu2 %v2489_v3 }
0x1196   : > { %v2488_v6 = vpop.xlane.xlu1 %2487 }
0x1197   : > { %4022 = vrcp.f32 %v2488_v6  ;;  %v2503_v11 = vand.u32 2147483648, %v2488_v6  ;;  %v2501_v14 = vand.u32 2147483647, %v2488_v6  ;;  %vm2497_vm12 = vweird.f32 %v2488_v6 }
0x1199   : > { %v2504_v19 = vor.u32 1.1754944e-38, %v2503_v11  ;;  %vm2502_vm14 = vcmp.eq.f32.partialorder %v2501_v14, 8.507059e+37 }
0x119d   : > { %v4023_v7 = vpop.eup %4022 }
0x119e   : > { %v2493_v17 = vmul.f32 %v4023_v7, %v2488_v6  ;;  %v2491_v9 = vpop.xlane.xlu2 %2490  ;;  %vm2498_vm11 = vweird.f32 %v4023_v7 }
0x119f   : > { %4024 = vrcp.f32 %v2491_v9  ;;  %vm2499_vm13 = vmor %vm2497_vm12, %vm2498_vm11  ;;  %v2518_v27 = vand.u32 2147483648, %v2491_v9  ;;  %v2516_v31 = vand.u32 2147483647, %v2491_v9  ;;  %vm2512_vm0 = vweird.f32 %v2491_v9 }
0x11a0   : > { %v2494_v10 = vsub.f32 1.0, %v2493_v17 }
0x11a1   : > { %v2519_v34 = vor.u32 1.1754944e-38, %v2518_v27  ;;  %vm2517_vm3 = vcmp.eq.f32.partialorder %v2516_v31, 8.507059e+37 }
0x11a2   : > { %v2495_v13 = vmul.f32 %v4023_v7, %v2494_v10 }
0x11a4   : > { %v2496_v16 = vadd.f32 %v4023_v7, %v2495_v13 }
0x11a5   : > { %v4025_v18 = vpop.eup %4024 }
0x11a6   : > { %v2500_v20 = vsel %vm2499_vm13, %v4023_v7, %v2496_v16  ;;  %v2508_v22 = vmul.f32 %v4025_v18, %v2491_v9  ;;  %vm2513_vm15 = vweird.f32 %v4025_v18  ;;  %v3951_v16 = vld [vmem:[%s5303_s6 + $0x7] ss:$0 sm:$0xff] }
0x11a7   : > { %v2505_v24 = vsel %vm2502_vm14, %v2504_v19, %v2500_v20  ;;  %vm2514_vm2 = vmor %vm2512_vm0, %vm2513_vm15 }
0x11a8   : > { %v2509_v59 = vsub.f32 1.0, %v2508_v22  ;;  %v2506_v26 = vmul.f32 %v4019_v15, %v2505_v24 }
0x11aa   : > { %v2510_v30 = vmul.f32 %v4025_v18, %v2509_v59  ;;  %3804 = vmatmul.msk.f32.vlgmr.msrb.gmra.mxu2 %vm1051_vm10, %v2506_v26 }
0x11ab   : > { %2847 = vmatpush.msrb.mxu2 %v3838_v12 }
0x11ac   : > { %v2511_v33 = vadd.f32 %v4025_v18, %v2510_v30 }
0x11ae   : > { %v2515_v35 = vsel %vm2514_vm2, %v4025_v18, %v2511_v33 }
0x11af   : > { %v2520_v36 = vsel %vm2517_vm3, %v2519_v34, %v2515_v35 }
0x11b0   : > { %v2521_v0 = vmul.f32 %v4021_v2, %v2520_v36  ;;  %v3858_v36 = vld [vmem:[%s5252_s11 + $0xf8] sm:$0xff] }
0x11b2   : > { %3805 = vmatmul.msk.f32.gmra.mxu2 %vm1051_vm10, %v2521_v0  ;;  %v3857_v0 = vld [vmem:[%s5252_s11 + $0xf0] sm:$0xff] }
0x11ba   : > { %3823 = vmatmul.msk.f32.vlgmr.msra.gmra.mxu2 %vm852_vm1, %v4771_v23 }
0x11c2   : > { %3824 = vmatmul.msk.f32.gmra.mxu2 %vm852_vm1, %v4782_v29 }
0x122d   : > { %v2545_v42 = vpop.f32.mrf.mxu2 }
0x122e   : > { %3807 = vmatmul.msk.f32.vlgmr.msra.gmra.mxu3 %vm1013_vm9, %v2545_v42 }
0x122f   : > { %2879 = vmatpush.msra.mxu3 %v3844_v41 }
0x1231   : > { %2880 = vmatpush.msra.mxu3 %v3843_v43 }
0x1233   : > { %2881 = vmatpush.msra.mxu3 %v3842_v44 }
0x1235   : > { %v2548_v46 = vpop.f32.mrf.mxu2  ;;  %2882 = vmatpush.msra.mxu3 %v3841_v45 }
0x1236   : > { %3808 = vmatmul.msk.f32.gmra.mxu3 %vm1013_vm9, %v2548_v46 }
0x123d   : > { %v2671_v47 = vpop.f32.mrf.mxu2 }
0x123e   : > { %3830 = vmatmul.msk.f32.vlgmr.msrb.gmra.mxu3 %vm852_vm1, %v4771_v23  ;;  %v2672_v53 = vadd.f32 %v3948_v48, %v2671_v47 }
0x1245   : > { %v2674_v49 = vpop.f32.mrf.mxu2 }
0x1246   : > { %v2675_v50 = vadd.f32 %v3948_v48, %v2674_v49  ;;  %3831 = vmatmul.msk.f32.gmra.mxu3 %vm852_vm1, %v4782_v29 }
0x1248   : > { %3832 = vmatpush.xpose.msk.msra.mxu0 %vm1013_vm9, %v2675_v50 }
0x124c   : > { %3833 = vmatpush.xpose.msk.msra.mxu0 %vm1013_vm9, %v2672_v53 }
0x124e   : > { %3846 = vmatmul.msk.f32.vlgmr.msra.gmra.mxu3 %vm852_vm1, %v4771_v23 }
0x124f   : > { %3834 = vmatmul.msk.f32.vlgmr.msra.gmra.mxu0 %vm1013_vm9, %v2639_v57 }
0x1250   : > { %2912 = vmatpush.msrb.mxu0 %v3851_v54 }
0x1252   : > { %2913 = vmatpush.msrb.mxu0 %v3850_v58 }
0x1254   : > { %2914 = vmatpush.msrb.mxu0 %v3849_v60 }
0x1256   : > { %2915 = vmatpush.msrb.mxu0 %v3848_v61  ;;  %3847 = vmatmul.msk.f32.gmra.mxu3 %vm852_vm1, %v4782_v29 }
0x1257   : > { %3835 = vmatmul.msk.f32.gmra.mxu0 %vm1013_vm9, %v2642_v63 }
0x125f   : > { %3853 = vmatmul.msk.f32.vlgmr.msrb.gmra.mxu0 %vm852_vm1, %v4771_v23 }
0x1267   : > { %3854 = vmatmul.msk.f32.gmra.mxu0 %vm852_vm1, %v4782_v29 }
0x12b1   : > { %v4952_v15 = vpop.f32.mrf.mxu3 }
0x12b9   : > { %v2579_v55 = vpop.f32.mrf.mxu3 }
0x12ba   : > { %v4954_v2 = vadd.f32 %v2608_v21, %v2579_v55 }
0x12c1   : > { %v2704_v3 = vpop.f32.mrf.mxu3 }
0x12c2   : > { %v2705_v8 = vadd.f32 %v3949_v4, %v2704_v3 }
0x12c9   : > { %v2707_v5 = vpop.f32.mrf.mxu3 }
0x12ca   : > { %v2708_v6 = vadd.f32 %v3949_v4, %v2707_v5  ;;  %v3950_v4 = vld [vmem:[%s5304_s1 + $0x7] ss:$0 sm:$0xff] }
0x12cc   : > { %v2739_v7 = vpop.f32.mrf.mxu0  ;;  %2815 = vmatpush.msrb.mxu1 %v2708_v6 }
0x12cd   : > { %v2745_v17 = vmul.f32 0.35355338, %v2739_v7 }
0x12ce   : > { %2816 = vmatpush.msrb.mxu1 %v2705_v8 }
0x12cf   : > { %v2747_v9 = vsel %vm1051_vm10, %v2745_v17, -inf }
0x12d0   : > { %2748 = vmax.xlane.f32.xlu0 %v2747_v9  ;;  %2945 = vmatpush.msra.mxu1 %v3858_v36  ;;  %v3868_v36 = vld [vmem:[%s5254_s13 + $0x38] sm:$0xff] }
0x12d1   : > { %v2884_v12 = vpop.f32.mrf.mxu3  ;;  %3093 = vmatpush.msra.mxu0 %v3868_v36 }
0x12d2   : > { %2946 = vmatpush.msra.mxu1 %v3857_v0  ;;  %v2885_v5 = vadd.f32 %v3950_v4, %v2884_v12 }
0x12d4   : > { %v2742_v10 = vpop.f32.mrf.mxu0  ;;  %2947 = vmatpush.msra.mxu1 %v3856_v37 }
0x12d5   : > { %v2746_v11 = vmul.f32 0.35355338, %v2742_v10  ;;  %v2606_v10 = vadd.f32 %v4950_v1, %v4952_v15 }
0x12d6   : > { %2948 = vmatpush.msra.mxu1 %v3855_v56 }
0x12d7   : > { %v2750_v13 = vsel %vm1051_vm10, %v2746_v11, -inf }
0x12d8   : > { %2751 = vmax.xlane.f32.xlu1 %v2750_v13 }
0x12d9   : > { %v2887_v8 = vpop.f32.mrf.mxu3 }
0x12dc   : > { %v2917_v14 = vpop.f32.mrf.mxu0 }
0x12dd   : > { %v2918_v20 = vadd.f32 %v3951_v16, %v2917_v14 }
0x12e4   : > { %v2920_v18 = vpop.f32.mrf.mxu0 }
0x12e5   : > { %v2921_v19 = vadd.f32 %v3951_v16, %v2920_v18 }
0x12e7   : > { %3862 = vmatpush.xpose.msk.msra.mxu2 %vm1013_vm9, %v2921_v19 }
0x12eb   : > { %3863 = vmatpush.xpose.msk.msra.mxu2 %vm1013_vm9, %v2918_v20 }
0x1343   : > { %v2749_v22 = vpop.xlane.xlu0 %2748 }
0x1344   : > { %v2753_v24 = vsub.f32 %v2745_v17, %v2749_v22 }
0x1346   : > { %v2755_v59 = vmul.f32 1.442695, %v2753_v24 }
0x1348   : > { %4026 = vpow2.f32 %v2755_v59 }
0x134b   : > { %v2752_v26 = vpop.xlane.xlu1 %2751 }
0x134c   : > { %v2754_v27 = vsub.f32 %v2746_v11, %v2752_v26 }
0x134e   : > { %v4027_v30 = vpop.eup %4026  ;;  %v2757_v31 = vmul.f32 1.442695, %v2754_v27 }
0x134f   : > { %v2759_v33 = vsel %vm1051_vm10, %v4027_v30, 0.0 }
0x1350   : > { %4028 = vpow2.f32 %v2757_v31  ;;  %2760 = vadd.xlane.f32.xlu2 %v2759_v33 }
0x1356   : > { %v4029_v34 = vpop.eup %4028 }
0x1357   : > { %v2762_v35 = vsel %vm1051_vm10, %v4029_v34, 0.0 }
0x1358   : > { %2763 = vadd.xlane.f32.xlu0 %v2762_v35 }
0x13c3   : > { %v2761_v38 = vpop.xlane.xlu2 %2760 }
0x13c4   : > { %4030 = vrcp.f32 %v2761_v38  ;;  %v2776_v43 = vand.u32 2147483648, %v2761_v38  ;;  %v2774_v45 = vand.u32 2147483647, %v2761_v38  ;;  %vm2770_vm5 = vweird.f32 %v2761_v38 }
0x13c6   : > { %v2777_v48 = vor.u32 1.1754944e-38, %v2776_v43  ;;  %vm2775_vm7 = vcmp.eq.f32.partialorder %v2774_v45, 8.507059e+37 }
0x13ca   : > { %v4031_v39 = vpop.eup %4030 }
0x13cb   : > { %v2766_v40 = vmul.f32 %v4031_v39, %v2761_v38  ;;  %v2764_v41 = vpop.xlane.xlu0 %2763  ;;  %vm2771_vm4 = vweird.f32 %v4031_v39 }
0x13cc   : > { %4032 = vrcp.f32 %v2764_v41  ;;  %vm2772_vm6 = vmor %vm2770_vm5, %vm2771_vm4  ;;  %v2791_v54 = vand.u32 2147483648, %v2764_v41  ;;  %v2789_v58 = vand.u32 2147483647, %v2764_v41  ;;  %vm2785_vm11 = vweird.f32 %v2764_v41 }
0x13cd   : > { %v2767_v42 = vsub.f32 1.0, %v2766_v40 }
0x13ce   : > { %v2792_v61 = vor.u32 1.1754944e-38, %v2791_v54  ;;  %vm2790_vm13 = vcmp.eq.f32.partialorder %v2789_v58, 8.507059e+37 }
0x13cf   : > { %v2768_v44 = vmul.f32 %v4031_v39, %v2767_v42 }
0x13d1   : > { %v2769_v46 = vadd.f32 %v4031_v39, %v2768_v44 }
0x13d2   : > { %v4033_v47 = vpop.eup %4032 }
0x13d3   : > { %v2773_v49 = vsel %vm2772_vm6, %v4031_v39, %v2769_v46  ;;  %v2781_v50 = vmul.f32 %v4033_v47, %v2764_v41  ;;  %vm2786_vm8 = vweird.f32 %v4033_v47 }
0x13d4   : > { %v2778_v51 = vsel %vm2775_vm7, %v2777_v48, %v2773_v49  ;;  %vm2787_vm12 = vmor %vm2785_vm11, %vm2786_vm8 }
0x13d5   : > { %v2782_v52 = vsub.f32 1.0, %v2781_v50  ;;  %v2779_v53 = vmul.f32 %v4027_v30, %v2778_v51 }
0x13d7   : > { %v2783_v57 = vmul.f32 %v4033_v47, %v2782_v52  ;;  %3836 = vmatmul.msk.f32.vlgmr.msrb.gmra.mxu1 %vm1051_vm10, %v2779_v53 }
0x13d9   : > { %v2784_v60 = vadd.f32 %v4033_v47, %v2783_v57 }
0x13db   : > { %v2788_v62 = vsel %vm2787_vm12, %v4033_v47, %v2784_v60 }
0x13dc   : > { %v2793_v63 = vsel %vm2790_vm13, %v2792_v61, %v2788_v62 }
0x13dd   : > { %v2794_v21 = vmul.f32 %v4029_v34, %v2793_v63 }
0x13df   : > { %3837 = vmatmul.msk.f32.gmra.mxu1 %vm1051_vm10, %v2794_v21 }
0x13e7   : > { %3860 = vmatmul.msk.f32.vlgmr.msra.gmra.mxu1 %vm852_vm1, %v4771_v23  ;;  %v2888_v23 = vadd.f32 %v3950_v4, %v2887_v8 }
0x13ef   : > { %3861 = vmatmul.msk.f32.gmra.mxu1 %vm852_vm1, %v4782_v29  ;;  %v3952_v29 = vld [vmem:[%s5253_s12 + $0x7] ss:$0 sm:$0xff] }
0x1454   : > { %v2818_v55 = vpop.f32.mrf.mxu1 }
0x1455   : > { %3839 = vmatmul.msk.f32.vlgmr.msrb.gmra.mxu2 %vm1013_vm9, %v2818_v55 }
0x145c   : > { %v2821_v3 = vpop.f32.mrf.mxu1 }
0x145d   : > { %3840 = vmatmul.msk.f32.gmra.mxu2 %vm1013_vm9, %v2821_v3  ;;  %v3953_v3 = vld [vmem:[%s5255_s14 + $0x1] ss:$0 sm:$0xff] }
0x1464   : > { %v2950_v6 = vpop.f32.mrf.mxu1 }
0x1465   : > { %3864 = vmatmul.msk.f32.vlgmr.msra.gmra.mxu2 %vm1013_vm9, %v2885_v5  ;;  %v2951_v9 = vadd.f32 %v3952_v29, %v2950_v6 }
0x146c   : > { %v2953_v7 = vpop.f32.mrf.mxu1 }
0x146d   : > { %v2954_v17 = vadd.f32 %v3952_v29, %v2953_v7  ;;  %3865 = vmatmul.msk.f32.gmra.mxu2 %vm1013_vm9, %v2888_v23 }
0x146f   : > { %3061 = vmatpush.msrb.mxu3 %v2954_v17 }
0x1471   : > { %3062 = vmatpush.msrb.mxu3 %v2951_v9 }
0x14d8   : > { %v2849_v11 = vpop.f32.mrf.mxu2 }
0x14d9   : > { %v5001_v13 = vadd.f32 %v2849_v11, %v2606_v10 }
0x14e0   : > { %v2852_v14 = vpop.f32.mrf.mxu2 }
0x14e1   : > { %v5004_v16 = vadd.f32 %v2852_v14, %v4954_v2 }
0x14e8   : > { %v2985_v18 = vpop.f32.mrf.mxu2 }
0x14e9   : > { %v2991_v19 = vmul.f32 0.35355338, %v2985_v18 }
0x14eb   : > { %v2993_v20 = vsel %vm1051_vm10, %v2991_v19, -inf }
0x14ec   : > { %2994 = vmax.xlane.f32.xlu1 %v2993_v20  ;;  %v3876_v20 = vld [vmem:[%s5258_s17 + $0x30] sm:$0xff] }
0x14f0   : > { %v2988_v22 = vpop.f32.mrf.mxu2 }
0x14f1   : > { %v2992_v24 = vmul.f32 0.35355338, %v2988_v22  ;;  %v3875_v22 = vld [vmem:[%s5258_s17 + $0x28] sm:$0xff] }
0x14f3   : > { %v2996_v59 = vsel %vm1051_vm10, %v2992_v24, -inf }
0x14f4   : > { %2997 = vmax.xlane.f32.xlu2 %v2996_v59 }
0x155f   : > { %v2995_v26 = vpop.xlane.xlu1 %2994 }
0x1560   : > { %v2999_v27 = vsub.f32 %v2991_v19, %v2995_v26  ;;  %v3877_v19 = vld [vmem:[%s5258_s17 + $0x38] sm:$0xff] }
0x1561   : > { %3198 = vmatpush.msrb.mxu1 %v3877_v19 }
0x1562   : > { %v3001_v1 = vmul.f32 1.442695, %v2999_v27 }
0x1563   : > { %3199 = vmatpush.msrb.mxu1 %v3876_v20 }
0x1564   : > { %4034 = vpow2.f32 %v3001_v1  ;;  %v3896_v1 = vld [vmem:[%s5260_s19 + $0xf8] sm:$0xff] }
0x1565   : > { %3200 = vmatpush.msrb.mxu1 %v3875_v22  ;;  %3249 = vmatpush.msrb.mxu2 %v3896_v1 }
0x1567   : > { %v2998_v15 = vpop.xlane.xlu2 %2997 }
0x1568   : > { %v3000_v30 = vsub.f32 %v2992_v24, %v2998_v15  ;;  %v3874_v24 = vld [vmem:[%s5258_s17 + $0x20] sm:$0xff]  ;;  %v3895_v15 = vld [vmem:[%s5260_s19 + $0xf0] sm:$0xff] }
0x1569   : > { %3201 = vmatpush.msrb.mxu1 %v3874_v24  ;;  %3250 = vmatpush.msrb.mxu2 %v3895_v15 }
0x156a   : > { %v4035_v31 = vpop.eup %4034  ;;  %v3003_v33 = vmul.f32 1.442695, %v3000_v30  ;;  %v3894_v30 = vld [vmem:[%s5260_s19 + $0xe8] sm:$0xff] }
0x156b   : > { %v3005_v2 = vsel %vm1051_vm10, %v4035_v31, 0.0  ;;  %3251 = vmatpush.msrb.mxu2 %v3894_v30 }
0x156c   : > { %4036 = vpow2.f32 %v3003_v33  ;;  %3006 = vadd.xlane.f32.xlu0 %v3005_v2 }
0x1572   : > { %v4037_v34 = vpop.eup %4036 }
0x1573   : > { %v3008_v35 = vsel %vm1051_vm10, %v4037_v34, 0.0 }
0x1574   : > { %3009 = vadd.xlane.f32.xlu1 %v3008_v35 }
0x15df   : > { %v3007_v0 = vpop.xlane.xlu0 %3006 }
0x15e0   : > { %4038 = vrcp.f32 %v3007_v0  ;;  %v3022_v40 = vand.u32 2147483648, %v3007_v0  ;;  %v3020_v42 = vand.u32 2147483647, %v3007_v0  ;;  %vm3016_vm15 = vweird.f32 %v3007_v0 }
0x15e2   : > { %v3023_v45 = vor.u32 1.1754944e-38, %v3022_v40  ;;  %vm3021_vm2 = vcmp.eq.f32.partialorder %v3020_v42, 8.507059e+37  ;;  %v3954_v40 = vld [vmem:[%s5256_s15 + $0x1] ss:$0 sm:$0xff] }
0x15e6   : > { %v4039_v37 = vpop.eup %4038 }
0x15e7   : > { %v3012_v38 = vmul.f32 %v4039_v37, %v3007_v0  ;;  %v3010_v56 = vpop.xlane.xlu1 %3009  ;;  %vm3017_vm14 = vweird.f32 %v4039_v37 }
0x15e8   : > { %4040 = vrcp.f32 %v3010_v56  ;;  %vm3018_vm0 = vmor %vm3016_vm15, %vm3017_vm14  ;;  %v3037_v51 = vand.u32 2147483648, %v3010_v56  ;;  %v3035_v53 = vand.u32 2147483647, %v3010_v56  ;;  %vm3031_vm4 = vweird.f32 %v3010_v56 }
0x15e9   : > { %v3013_v39 = vsub.f32 1.0, %v3012_v38 }
0x15ea   : > { %v3038_v57 = vor.u32 1.1754944e-38, %v3037_v51  ;;  %vm3036_vm6 = vcmp.eq.f32.partialorder %v3035_v53, 8.507059e+37 }
0x15eb   : > { %v3014_v41 = vmul.f32 %v4039_v37, %v3013_v39 }
0x15ed   : > { %v3015_v43 = vadd.f32 %v4039_v37, %v3014_v41 }
0x15ee   : > { %v4041_v44 = vpop.eup %4040 }
0x15ef   : > { %v3019_v46 = vsel %vm3018_vm0, %v4039_v37, %v3015_v43  ;;  %v3027_v47 = vmul.f32 %v4041_v44, %v3010_v56  ;;  %vm3032_vm3 = vweird.f32 %v4041_v44  ;;  %v3955_v43 = vld [vmem:[%s5257_s16 + $0x1] ss:$0 sm:$0xff] }
0x15f0   : > { %v3024_v48 = vsel %vm3021_vm2, %v3023_v45, %v3019_v46  ;;  %vm3033_vm5 = vmor %vm3031_vm4, %vm3032_vm3 }
0x15f1   : > { %v3028_v49 = vsub.f32 1.0, %v3027_v47  ;;  %v3025_v50 = vmul.f32 %v4035_v31, %v3024_v48 }
0x15f3   : > { %v3029_v52 = vmul.f32 %v4041_v44, %v3028_v49  ;;  %3866 = vmatmul.msk.f32.vlgmr.msrb.gmra.mxu3 %vm1051_vm10, %v3025_v50 }
0x15f5   : > { %v3030_v54 = vadd.f32 %v4041_v44, %v3029_v52 }
0x15f7   : > { %v3034_v58 = vsel %vm3033_vm5, %v4041_v44, %v3030_v54  ;;  %v3893_v54 = vld [vmem:[%s5260_s19 + $0xe0] sm:$0xff]  ;;  %vm3561_vm5 = vcmask 1042434  }
0x15f8   : > { %v3039_v60 = vsel %vm3036_vm6, %v3038_v57, %v3034_v58  ;;  %3252 = vmatpush.msrb.mxu2 %v3893_v54  ;;  %v3892_v57 = vld [vmem:[%s5260_s19 + $0xd8] sm:$0xff]  ;;  %v3891_v58 = vld [vmem:[%s5260_s19 + $0xd0] sm:$0xff]  ;;  %vm3563_vm6 = vcmask 1041408  }
0x15f9   : > { %v3040_v61 = vmul.f32 %v4037_v34, %v3039_v60  ;;  %v3890_v60 = vld [vmem:[%s5260_s19 + $0xc8] sm:$0xff] }
0x15fa   : > { %3253 = vmatpush.msrb.mxu2 %v3892_v57 }
0x15fb   : > { %3867 = vmatmul.msk.f32.gmra.mxu3 %vm1051_vm10, %v3040_v61  ;;  %v3889_v61 = vld [vmem:[%s5260_s19 + $0xc0] sm:$0xff] }
0x15fc   : > { %3254 = vmatpush.msrb.mxu2 %v3891_v58 }
0x15fe   : > { %3255 = vmatpush.msrb.mxu2 %v3890_v60 }
0x1600   : > { %3256 = vmatpush.msrb.mxu2 %v3889_v61  ;;  %v3370_v61 = vld [vmem:[%s5265_s24 + $0x30] sm:$0xff] }
0x1676   : > { %v3064_v62 = vpop.f32.mrf.mxu3 }
0x1677   : > { %3869 = vmatmul.msk.f32.vlgmr.msra.gmra.mxu0 %vm1013_vm9, %v3064_v62  ;;  %v3888_v62 = vld [vmem:[%s5260_s19 + $0xb8] sm:$0xff] }
0x1678   : > { %3257 = vmatpush.msrb.mxu2 %v3888_v62  ;;  %v3371_v62 = vld [vmem:[%s5265_s24 + $0x38] sm:$0xff] }
0x167e   : > { %v3067_v63 = vpop.f32.mrf.mxu3 }
0x167f   : > { %3870 = vmatmul.msk.f32.gmra.mxu0 %vm1013_vm9, %v3067_v63  ;;  %v3887_v63 = vld [vmem:[%s5260_s19 + $0xb0] sm:$0xff] }
0x1680   : > { %3258 = vmatpush.msrb.mxu2 %v3887_v63 }
0x16f4   : > { %v3095_v21 = vpop.f32.mrf.mxu0 }
0x16f5   : > { %v3101_v55 = vadd.f32 %v3095_v21, %v5001_v13  ;;  %v3886_v21 = vld [vmem:[%s5260_s19 + $0xa8] sm:$0xff] }
0x16f6   : > { %3259 = vmatpush.msrb.mxu2 %v3886_v21  ;;  %v3367_v21 = vld [vmem:[%s5265_s24 + $0x18] sm:$0xff] }
0x16f7   : > { %v3103_v12 = vadd.f32 %v3101_v55, %v4679_v28  ;;  %v3885_v55 = vld [vmem:[%s5260_s19 + $0xa0] sm:$0xff] }
0x16f8   : > { %3260 = vmatpush.msrb.mxu2 %v3885_v55 }
0x16f9   : > { %v5022_v4 = vadd.f32 %v3953_v3, %v3103_v12  ;;  %v3883_v12 = vld [vmem:[%s5260_s19 + $0x90] sm:$0xff] }
0x16fb   : > { %v3116_v5 = vsel %vm852_vm1, %v5022_v4, 0.0 }
0x16fc   : > { %3117 = vadd.xlane.f32.xlu2 %v3116_v5  ;;  %v3098_v6 = vpop.f32.mrf.mxu0  ;;  %v3882_v5 = vld [vmem:[%s5260_s19 + $0x88] sm:$0xff] }
0x16fd   : > { %v3102_v8 = vadd.f32 %v3098_v6, %v5004_v16  ;;  %v3881_v6 = vld [vmem:[%s5260_s19 + $0x80] sm:$0xff] }
0x16ff   : > { %v3104_v23 = vadd.f32 %v3102_v8, %v4684_v32  ;;  %v3956_v8 = vld [vmem:[%s5259_s18 + $0x1] ss:$0 sm:$0xff] }
0x1701   : > { %v5028_v29 = vadd.f32 %v3953_v3, %v3104_v23  ;;  %v3884_v3 = vld [vmem:[%s5260_s19 + $0x98] sm:$0xff] }
0x1702   : > { %3261 = vmatpush.msrb.mxu2 %v3884_v3  ;;  %v3359_v3 = vld [vmem:[%s5264_s23 + $0x60] sm:$0xff] }
0x1703   : > { %v3119_v7 = vsel %vm852_vm1, %v5028_v29, 0.0  ;;  %3470 = vmatpush.msra.mxu1 %v3359_v3 }
0x1704   : > { %3120 = vadd.xlane.f32.xlu0 %v3119_v7  ;;  %3262 = vmatpush.msrb.mxu2 %v3883_v12  ;;  %v3360_v12 = vld [vmem:[%s5264_s23 + $0x68] sm:$0xff] }
0x1706   : > { %3263 = vmatpush.msrb.mxu2 %v3882_v5  ;;  %v3361_v5 = vld [vmem:[%s5264_s23 + $0x70] sm:$0xff] }
0x1708   : > { %3264 = vmatpush.msrb.mxu2 %v3881_v6  ;;  %v3355_v6 = vld [vmem:[%s5264_s23 + $0x40] sm:$0xff] }
0x1709   : > { %3471 = vmatpush.msra.mxu1 %v3355_v6 }
0x176f   : > { %v3118_v17 = vpop.xlane.xlu2 %3117 }
0x1770   : > { %v3122_v28 = vmul.f32 %v3118_v17, %v4250_v25 }
0x1772   : > { %v3124_v9 = vsub.f32 %v5022_v4, %v3122_v28 }
0x1774   : > { %v3126_v10 = vmul.f32 %v3124_v9, %v3124_v9 }
0x1776   : > { %v3128_v11 = vsel %vm852_vm1, %v3126_v10, 0.0 }
0x1777   : > { %3129 = vadd.xlane.f32.xlu1 %v3128_v11  ;;  %v3121_v13 = vpop.xlane.xlu0 %3120 }
0x1778   : > { %v3123_v14 = vmul.f32 %v3121_v13, %v4250_v25 }
0x177a   : > { %v3125_v32 = vsub.f32 %v5028_v29, %v3123_v14 }
0x177c   : > { %v3127_v16 = vmul.f32 %v3125_v32, %v3125_v32 }
0x177e   : > { %v3131_v18 = vsel %vm852_vm1, %v3127_v16, 0.0 }
0x177f   : > { %3132 = vadd.xlane.f32.xlu2 %v3131_v18 }
0x17ea   : > { %v3130_v59 = vpop.xlane.xlu1 %3129 }
0x17eb   : > { %v3134_v26 = vmul.f32 %v3130_v59, %v4250_v25 }
0x17ed   : > { %v3136_v27 = vadd.f32 1e-05, %v3134_v26 }
0x17ef   : > { %4042 = vrsqrt.f32 %v3136_v27  ;;  %vm3144_vm7 = vweird.f32 %v3136_v27 }
0x17f2   : > { %v3133_v31 = vpop.xlane.xlu2 %3132 }
0x17f3   : > { %v3135_v33 = vmul.f32 %v3133_v31, %v4250_v25  ;;  %v3957_v31 = vld [vmem:[%s5261_s20 + $0x1] ss:$0 sm:$0xff] }
0x17f5   : > { %v4043_v2 = vpop.eup %4042  ;;  %v3137_v34 = vadd.f32 1e-05, %v3135_v33 }
0x17f6   : > { %v3139_v35 = vmul.f32 %v4043_v2, %v3136_v27  ;;  %vm3145_vm9 = vweird.f32 %v4043_v2 }
0x17f7   : > { %4044 = vrsqrt.f32 %v3137_v34  ;;  %vm3146_vm8 = vmor %vm3144_vm7, %vm3145_vm9  ;;  %vm3154_vm12 = vweird.f32 %v3137_v34 }
0x17f8   : > { %v3140_v36 = vmul.f32 %v4043_v2, %v3139_v35 }
0x17fa   : > { %v3141_v0 = vmul.f32 0.5, %v3140_v36 }
0x17fc   : > { %v3142_v37 = vsub.f32 1.5, %v3141_v0 }
0x17fd   : > { %v4045_v38 = vpop.eup %4044 }
0x17fe   : > { %v3143_v56 = vmul.f32 %v4043_v2, %v3142_v37  ;;  %v3149_v39 = vmul.f32 %v4045_v38, %v3137_v34  ;;  %vm3155_vm11 = vweird.f32 %v4045_v38 }
0x17ff   : > { %vm3156_vm13 = vmor %vm3154_vm12, %vm3155_vm11 }
0x1800   : > { %v3147_v41 = vsel %vm3146_vm8, %v4043_v2, %v3143_v56  ;;  %v3150_v42 = vmul.f32 %v4045_v38, %v3149_v39 }
0x1801   : > { %v3158_v44 = vmul.f32 %v3147_v41, %v3124_v9 }
0x1802   : > { %v3151_v45 = vmul.f32 0.5, %v3150_v42 }
0x1803   : > { %v3163_v46 = vmul.f32 %v3954_v40, %v3158_v44 }
0x1804   : > { %v3152_v47 = vsub.f32 1.5, %v3151_v45 }
0x1805   : > { %v3168_v48 = vadd.f32 %v3955_v43, %v3163_v46 }
0x1806   : > { %v3153_v49 = vmul.f32 %v4045_v38, %v3152_v47 }
0x1807   : > { %3879 = vmatmul.msk.f32.vlgmr.msrb.gmra.mxu1 %vm852_vm1, %v3168_v48 }
0x1808   : > { %v3157_v50 = vsel %vm3156_vm13, %v4045_v38, %v3153_v49  ;;  %v3368_v49 = vld [vmem:[%s5265_s24 + $0x20] sm:$0xff] }
0x1809   : > { %v3159_v51 = vmul.f32 %v3157_v50, %v3125_v32  ;;  %v3369_v50 = vld [vmem:[%s5265_s24 + $0x28] sm:$0xff]  ;;  %3389 = vmatpush.msra.mxu3 %v3368_v49 }
0x180a   : > { %3409 = vmatpush.msrb.mxu0 %v3369_v50 }
0x180b   : > { %v3164_v52 = vmul.f32 %v3954_v40, %v3159_v51  ;;  %v3364_v51 = vld [vmem:[%s5265_s24] sm:$0xff] }
0x180c   : > { %3390 = vmatpush.msra.mxu3 %v3364_v51 }
0x180d   : > { %v3169_v53 = vadd.f32 %v3955_v43, %v3164_v52  ;;  %v3365_v52 = vld [vmem:[%s5265_s24 + $0x8] sm:$0xff] }
0x180e   : > { %3410 = vmatpush.msrb.mxu0 %v3365_v52  ;;  %3429 = vmatpush.msrb.mxu3 %v3370_v61 }
0x180f   : > { %3880 = vmatmul.msk.f32.gmra.mxu1 %vm852_vm1, %v3169_v53  ;;  %v3363_v53 = vld [vmem:[%s799_s9] sm:$0x1] }
0x1810   : > { %3898 = vmatmul.msk.f32.vlgmr.msra.gmra.mxu3 %vm1051_vm10, %v3363_v53  ;;  %3899 = vmatmul.msk.f32.vlgmr.msrb.gmra.mxu0 %vm1051_vm10, %v3363_v53 }
0x1811   : > { %3449 = vmatpush.msra.mxu0 %v3371_v62 }
0x1813   : > { %3450 = vmatpush.msra.mxu0 %v3367_v21 }
0x1815   : > { %3510 = vmatpush.msrb.mxu0 %v3361_v5 }
0x1818   : > { %3901 = vmatmul.msk.f32.vlgmr.msra.gmra.mxu0 %vm1051_vm10, %v3363_v53 }
0x1884   : > { %v3203_v23 = vpop.f32.mrf.mxu1 }
0x1885   : > { %v3204_v7 = vadd.f32 %v3956_v8, %v3203_v23 }
0x1887   : > { %v3209_v17 = vmul.f32 %v3204_v7, %v3204_v7 }
0x1889   : > { %v3211_v28 = vmul.f32 %v3209_v17, %v3204_v7  ;;  %v3351_v17 = vld [vmem:[%s5264_s23 + $0x20] sm:$0xff] }
0x188a   : > { %3472 = vmatpush.msra.mxu1 %v3351_v17  ;;  %v3566_v17 = vlaneseq }
0x188b   : > { %v3213_v9 = vmul.f32 0.044715, %v3211_v28  ;;  %v3352_v28 = vld [vmem:[%s5264_s23 + $0x28] sm:$0xff] }
0x188c   : > { %v3206_v10 = vpop.f32.mrf.mxu1  ;;  %vm3568_vm9 = vcmp.lt.s32.totalorder %v3566_v17, 432 }
0x188d   : > { %v3215_v11 = vadd.f32 %v3213_v9, %v3204_v7  ;;  %v3207_v13 = vadd.f32 %v3956_v8, %v3206_v10  ;;  %v3356_v8 = vld [vmem:[%s5264_s23 + $0x48] sm:$0xff]  ;;  %v3353_v10 = vld [vmem:[%s5264_s23 + $0x30] sm:$0xff]  ;;  %v3412_v52 = vpop.f32.mrf.mxu0 }
0x188f   : > { %v3217_v14 = vmul.f32 0.7978846, %v3215_v11  ;;  %v3210_v32 = vmul.f32 %v3207_v13, %v3207_v13 }
0x1891   : > { %4046 = vtanh.f32 %v3217_v14  ;;  %v3212_v16 = vmul.f32 %v3210_v32, %v3207_v13  ;;  %v3348_v14 = vld [vmem:[%s5264_s23 + $0x8] sm:$0xff] }
0x1893   : > { %v3214_v18 = vmul.f32 0.044715, %v3212_v16 }
0x1895   : > { %v3216_v19 = vadd.f32 %v3214_v18, %v3207_v13  ;;  %v3349_v18 = vld [vmem:[%s5264_s23 + $0x10] sm:$0xff] }
0x1897   : > { %v4047_v20 = vpop.eup %4046  ;;  %v3218_v22 = vmul.f32 0.7978846, %v3216_v19 }
0x1898   : > { %v3221_v24 = vadd.f32 1.0, %v4047_v20 }
0x1899   : > { %4048 = vtanh.f32 %v3218_v22  ;;  %v3362_v22 = vld [vmem:[%s5264_s23 + $0x78] sm:$0xff] }
0x189a   : > { %v3223_v59 = vmul.f32 0.5, %v3221_v24  ;;  %v3358_v24 = vld [vmem:[%s5264_s23 + $0x58] sm:$0xff] }
0x189c   : > { %v3225_v26 = vmul.f32 %v3223_v59, %v3204_v7  ;;  %v3357_v7 = vld [vmem:[%s5264_s23 + $0x50] sm:$0xff] }
0x189d   : > { %3511 = vmatpush.msrb.mxu0 %v3357_v7 }
0x189e   : > { %3265 = vmatmul.f32.vlgmr.msrb.gmra.mxu2 %v3225_v26  ;;  %v4065_v26 = vmov 16.0  }
0x189f   : > { %v4049_v27 = vpop.eup %4048  ;;  %3512 = vmatpush.msrb.mxu0 %v3353_v10 }
0x18a0   : > { %v3222_v1 = vadd.f32 1.0, %v4049_v27  ;;  %v3958_v27 = vld [vmem:[%s5262_s21] ss:$0 sm:$0xff] }
0x18a1   : > { %3513 = vmatpush.msrb.mxu0 %v3349_v18 }
0x18a2   : > { %v3224_v15 = vmul.f32 0.5, %v3222_v1 }
0x18a4   : > { %v3226_v30 = vmul.f32 %v3224_v15, %v3207_v13  ;;  %v3347_v13 = vld [vmem:[%s5264_s23] sm:$0xff]  ;;  %v3354_v15 = vld [vmem:[%s5264_s23 + $0x38] sm:$0xff] }
0x18a5   : > { %3473 = vmatpush.msra.mxu1 %v3347_v13 }
0x18a6   : > { %3268 = vmatmul.f32.gmra.mxu2 %v3226_v30 }
0x18a7   : > { %3530 = vmatpush.msrb.mxu1 %v3362_v22 }
0x18a9   : > { %3531 = vmatpush.msrb.mxu1 %v3358_v24 }
0x18ab   : > { %3532 = vmatpush.msrb.mxu1 %v3354_v15 }
0x1921   : > { %v3266_v33 = vpop.f32.mrf.mxu2 }
0x1922   : > { %v3267_v2 = vadd.f32 %v3957_v31, %v3266_v33 }
0x1924   : > { %v3272_v34 = vadd.f32 %v3267_v2, %v5022_v4  ;;  %v3959_v2 = vld [vmem:[%s5263_s22] ss:$0 sm:$0xff] }
0x1926   : > { %v3276_v35 = vsel %vm852_vm1, %v3272_v34, 0.0 }
0x1927   : > { %3277 = vadd.xlane.f32.xlu0 %v3276_v35 }
0x1929   : > { %v3269_v36 = vpop.f32.mrf.mxu2 }
0x192a   : > { %v3270_v0 = vadd.f32 %v3957_v31, %v3269_v36  ;;  %v3350_v31 = vld [vmem:[%s5264_s23 + $0x18] sm:$0xff] }
0x192b   : > { %3533 = vmatpush.msrb.mxu1 %v3350_v31 }
0x192c   : > { %v3273_v37 = vadd.f32 %v3270_v0, %v5028_v29 }
0x192e   : > { %v3279_v38 = vsel %vm852_vm1, %v3273_v37, 0.0 }
0x192f   : > { %3280 = vadd.xlane.f32.xlu1 %v3279_v38 }
0x199a   : > { %v3278_v56 = vpop.xlane.xlu0 %3277 }
0x199b   : > { %v3282_v39 = vmul.f32 %v3278_v56, %v4250_v25 }
0x199d   : > { %v5119_v40 = vsub.f32 %v3272_v34, %v3282_v39 }
0x199f   : > { %v3286_v41 = vmul.f32 %v5119_v40, %v5119_v40 }
0x19a1   : > { %v3288_v4 = vsel %vm852_vm1, %v3286_v41, 0.0 }
0x19a2   : > { %v3281_v42 = vpop.xlane.xlu1 %3280  ;;  %3289 = vadd.xlane.f32.xlu2 %v3288_v4 }
0x19a3   : > { %v3283_v43 = vmul.f32 %v3281_v42, %v4250_v25 }
0x19a5   : > { %v5125_v44 = vsub.f32 %v3273_v37, %v3283_v43 }
0x19a7   : > { %v3287_v29 = vmul.f32 %v5125_v44, %v5125_v44 }
0x19a9   : > { %v3291_v45 = vsel %vm852_vm1, %v3287_v29, 0.0 }
0x19aa   : > { %3292 = vadd.xlane.f32.xlu0 %v3291_v45 }
0x1a15   : > { %v3290_v46 = vpop.xlane.xlu2 %3289 }
0x1a16   : > { %v3294_v47 = vmul.f32 %v3290_v46, %v4250_v25 }
0x1a18   : > { %v3296_v48 = vadd.f32 1e-05, %v3294_v47 }
0x1a1a   : > { %4050 = vrsqrt.f32 %v3296_v48  ;;  %vm3304_vm14 = vweird.f32 %v3296_v48 }
0x1a1d   : > { %v3293_v54 = vpop.xlane.xlu0 %3292 }
0x1a1e   : > { %v3295_v57 = vmul.f32 %v3293_v54, %v4250_v25  ;;  %v3366_v25 = vld [vmem:[%s5265_s24 + $0x10] sm:$0xff]  ;;  %v3452_v54 = vpop.f32.mrf.mxu0 }
0x1a1f   : > { %3430 = vmatpush.msrb.mxu3 %v3366_v25 }
0x1a20   : > { %v4051_v58 = vpop.eup %4050  ;;  %v5150_v60 = vadd.f32 1e-05, %v3295_v57  ;;  %3900 = vmatmul.msk.f32.vlgmr.msrb.gmra.mxu3 %vm1051_vm10, %v3363_v53  ;;  %v3392_v53 = vpop.f32.mrf.mxu3 }
0x1a21   : > { %v3299_v63 = vmul.f32 %v4051_v58, %v3296_v48  ;;  %3490 = vmatpush.msra.mxu3 %v3360_v12  ;;  %vm3305_vm10 = vweird.f32 %v4051_v58 }
0x1a22   : > { %4052 = vrsqrt.f32 %v5150_v60  ;;  %vm3306_vm15 = vmor %vm3304_vm14, %vm3305_vm10  ;;  %vm3314_vm2 = vweird.f32 %v5150_v60 }
0x1a23   : > { %v3300_v55 = vmul.f32 %v4051_v58, %v3299_v63  ;;  %3491 = vmatpush.msra.mxu3 %v3356_v8  ;;  %4054 = vrcp.f32 %v4065_v26 }
0x1a25   : > { %v3301_v23 = vmul.f32 0.5, %v3300_v55  ;;  %3492 = vmatpush.msra.mxu3 %v3352_v28 }
0x1a27   : > { %v3302_v9 = vsub.f32 1.5, %v3301_v23  ;;  %3493 = vmatpush.msra.mxu3 %v3348_v14 }
0x1a28   : > { %v4053_v11 = vpop.eup %4052 }
0x1a29   : > { %v3303_v32 = vmul.f32 %v4051_v58, %v3302_v9  ;;  %v3309_v16 = vmul.f32 %v4053_v11, %v5150_v60  ;;  %vm3315_vm0 = vweird.f32 %v4053_v11  ;;  %v4055_v35 = vpop.eup %4054  ;;  %v3538_v60 = vld [vmem:[%s5306_s27] sm:$0xf] }
0x1a2a   : > { %vm3316_vm3 = vmor %vm3314_vm2, %vm3315_vm0  ;;  %v3340_v56 = vmul.f32 16.0, %v4055_v35  ;;  %vm3344_vm4 = vweird.f32 %v4055_v35  ;;  %v3542_v63 = vperm.slane %v3538_v60, 2  ;;  %v3541_v25 = vperm.slane %v3538_v60, 1 }
0x1a2b   : > { %v3307_v19 = vsel %vm3306_vm15, %v4051_v58, %v3303_v32  ;;  %v3310_v20 = vmul.f32 %v4053_v11, %v3309_v16  ;;  %v3543_v3 = vperm.slane %v3538_v60, 3  ;;  %v3540_v12 = vperm.slane %v3538_v60, 0 }
0x1a2c   : > { %v3318_v1 = vmul.f32 %v3307_v19, %v5119_v40  ;;  %v3341_v4 = vsub.f32 1.0, %v3340_v56 }
0x1a2d   : > { %v3311_v59 = vmul.f32 0.5, %v3310_v20 }
0x1a2e   : > { %v3323_v34 = vmul.f32 %v3958_v27, %v3318_v1  ;;  %v3342_v29 = vmul.f32 %v4055_v35, %v3341_v4 }
0x1a2f   : > { %v3312_v30 = vsub.f32 1.5, %v3311_v59 }
0x1a30   : > { %v3328_v37 = vadd.f32 %v3959_v2, %v3323_v34  ;;  %v3343_v47 = vadd.f32 %v4055_v35, %v3342_v29 }
0x1a31   : > { %v3313_v33 = vmul.f32 %v4053_v11, %v3312_v30 }
0x1a32   : > { %v3330_v40 = vsel %vm852_vm1, %v3328_v37, 0.0  ;;  %v3345_v50 = vsel %vm3344_vm4, %v4055_v35, %v3343_v47 }
0x1a33   : > { %v3317_v36 = vsel %vm3316_vm3, %v4053_v11, %v3313_v33 }
0x1a34   : > { %v3319_v0 = vmul.f32 %v3317_v36, %v5125_v44 }
0x1a36   : > { %v3324_v38 = vmul.f32 %v3958_v27, %v3319_v0 }
0x1a38   : > { %v3329_v39 = vadd.f32 %v3959_v2, %v3324_v38 }
0x1a3a   : > { %v3331_v41 = vsel %vm852_vm1, %v3329_v39, 0.0 }
0x1a3b   : > { %v3332_v42 = vadd.f32 %v3331_v41, %v3330_v40 }
0x1a3d   : > { %v3333_v43 = vrot.slane %v3332_v42, 4 }
0x1a3f   : > { %v3334_v45 = vadd.f32 %v3333_v43, %v3332_v42 }
0x1a41   : > { %v3335_v46 = vrot.slane %v3334_v45, 2 }
0x1a43   : > { %v3336_v48 = vadd.f32 %v3335_v46, %v3334_v45 }
0x1a45   : > { %v3337_v49 = vrot.slane %v3336_v48, 1 }
0x1a47   : > { %v3338_v44 = vadd.f32 %v3337_v49, %v3336_v48 }
0x1a49   : > { %v3346_v51 = vmul.f32 %v3345_v50, %v3338_v44 }
0x1a4b   : > { %3902 = vmatmul.msk.f32.vlgmr.msra.gmra.mxu1 %vm852_vm1, %v3346_v51  ;;  %3903 = vmatmul.msk.f32.vlgmr.msra.gmra.mxu3 %vm852_vm1, %v3346_v51 }
0x1a4c   : > { %3904 = vmatmul.msk.f32.vlgmr.msrb.gmra.mxu0 %vm852_vm1, %v3346_v51 }
0x1a53   : > { %3905 = vmatmul.msk.f32.vlgmr.msrb.gmra.mxu1 %vm852_vm1, %v3346_v51  ;;  %vm3559_vm1 = vcmask 1040384  }
0x1aa3   : > { %v3432_v57 = vpop.f32.mrf.mxu3 }
0x1ac8   : > { %v3475_v58 = vpop.f32.mrf.mxu1 }
0x1ac9   : > { %v3515_v61 = vpop.f32.mrf.mxu0  ;;  %v3476_v6 = vadd.f32 %v3475_v58, %v3392_v53 }
0x1aca   : > { %v3516_v62 = vadd.f32 %v3515_v61, %v3432_v57 }
0x1acb   : > { %v3548_v10 = vadd.f32 %v3540_v12, %v3476_v6 }
0x1acc   : > { %v3550_v8 = vadd.f32 %v3542_v63, %v3516_v62 }
0x1ace   : > { %v3495_v21 = vpop.f32.mrf.mxu3  ;;  %v3557_v11 = vrot.slane %v3550_v8, 6 }
0x1acf   : > { %v3496_v55 = vadd.f32 %v3495_v21, %v3412_v52 }
0x1ad0   : > { %v3535_v5 = vpop.f32.mrf.mxu1 }
0x1ad1   : > { %v3549_v23 = vadd.f32 %v3541_v25, %v3496_v55  ;;  %v3536_v7 = vadd.f32 %v3535_v5, %v3452_v54 }
0x1ad3   : > { %v3556_v28 = vrot.slane %v3549_v23, 7  ;;  %v3551_v9 = vadd.f32 %v3543_v3, %v3536_v7 }
0x1ad5   : > { %v3558_v13 = vrot.slane %v3551_v9, 5  ;;  %v3560_v14 = vsel %vm3559_vm1, %v3548_v10, %v3556_v28 }
0x1ad7   : > { %v3562_v32 = vsel %vm3561_vm5, %v3557_v11, %v3558_v13 }
0x1ad8   : > { %v3564_v16 = vsel %vm3563_vm6, %v3560_v14, %v3562_v32 }
0x1ad9   : > { %3570 = vst.msk [vmem:[%s803_s0] sm:$0xf] %vm3568_vm9, %v3564_v16 }
0x1ada PF: > { %s5308_s1 = sld [smem:[#allocation2_spill]] }
0x1ae0   : > { %s36_s27 = sadd.s32 1, %s5308_s1  }
0x1ae1   : > { %p33_p4 = scmp.ge.s32.totalorder %s36_s27, 4  }
0x1ae3   :  { %35 = sbr.rel (!%p33_p4) target bundleno = 14 (0xe), region = 215 }

// kernel: model_forward.3
= control target key start
LH: loop header
LB: loop body
LE: loop exit
PB: predicated region body
PF: predicated region fallthrough
CT: control target
= control target key end

     0   :  { %s1580_s15 = smov 0   ;;  %s2622_s0 = inlined_call_operand.vmem [shape: f32[2,3,64,16], index: 0, kind: input, shape index: {}]   ;;  %s2623_s1 = inlined_call_operand.vmem [shape: f32[2,64,16], index: 1, kind: input, shape index: {}]   ;;  %s2624_s2 = inlined_call_operand.vmem [shape: f32[2,64,16], index: 2, kind: input, shape index: {}]   ;;  %s2625_s3 = inlined_call_operand.vmem [shape: f32[2,64,16], index: 3, kind: input, shape index: {}]   ;;  %s2626_s4 = inlined_call_operand.vmem [shape: f32[2,64,8], index: 4, kind: output, shape index: {}]  }
   0x1 LB: > { %s1314_s16 = sadd.s32 4294967295, %s1552_s15   ;;  %p1318_p0 = scmp.ge.s32.totalorder %s1552_s15, 1  ;;  %s1552_s15 = sphi %s1580_s15, %s14_s15  }
   0x2   : > { %p192_p1 = scmp.lt.s32.totalorder %s1552_s15, 3 }
   0x4   : > { %p193_p2 = pnand %p1318_p0, %p192_p1 }
   0x5   : > { %p233_p3 = scmp.lt.s32.totalorder (!%p193_p2), %s1314_s16, 1 }
   0x6   : > { %196 = sbr.rel (%p193_p2) target bundleno = 411 (0x19b), region = 36 }
   0xb   : > { %v362_v0 = vlaneseq  ;;  %s2706_s16 = smov (!%p233_p3, %s1314_s16), 1  ;;  %v1554_v6 = vmov 1.0   ;;  %vm373_vm2 = vcmask 130048  }
   0xc   : > { %s1593_s17 = sshll.u32 %s2706_s16, 6  ;;  %s1392_s24 = smul.u32 192, %s2706_s16 }
   0xd   : > { %v363_v1 = vshrl.u32 %v362_v0, 7  ;;  %v1588_v2 = vand.u32 127, %v362_v0  ;;  %s1599_s20 = scalar_lea.vmem %s2623_s1, %s1593_s17  ;;  %s1605_s23 = scalar_lea.vmem %s2624_s2, %s1593_s17 }
   0xe   : > { %v258_v4 = vld [vmem:[%s1599_s20] sm:$0xff]  ;;  %v260_v5 = vld [vmem:[%s1599_s20 + $0x10] sm:$0xff]  ;;  %v259_v14 = vld [vmem:[%s1599_s20 + $0x8] sm:$0xff]  ;;  %s1685_s27 = scalar_lea.vmem %s2622_s0, %s1392_s24  ;;  %s1821_s30 = scalar_lea.vmem %s2625_s3, %s1593_s17 }
   0xf   : > { %v364_v3 = vadd.s32 8, %v363_v1  ;;  %vm367_vm1 = vcmp.lt.s32.totalorder %v363_v1, %v1588_v2  ;;  %v266_v7 = vmax.f32 %v258_v4, 0.0  ;;  %v282_v8 = vld [vmem:[%s1605_s23] sm:$0xff]  ;;  %v268_v9 = vmax.f32 %v260_v5, 0.0  ;;  %v264_v10 = vld [vmem:[%s1599_s20 + $0x30] sm:$0xff]  ;;  %v261_v20 = vld [vmem:[%s1599_s20 + $0x18] sm:$0xff]  ;;  %s2530_s7 = scalar_lea.vmem %s2626_s4, %s1593_s17 }
  0x10   : > { %v284_v11 = vld [vmem:[%s1605_s23 + $0x10] sm:$0xff]  ;;  %v272_v12 = vmax.f32 %v264_v10, 0.0  ;;  %v262_v13 = vld [vmem:[%s1599_s20 + $0x20] sm:$0xff]  ;;  %v267_v19 = vmax.f32 %v259_v14, 0.0  ;;  %v283_v23 = vld [vmem:[%s1605_s23 + $0x8] sm:$0xff]  ;;  %v269_v24 = vmax.f32 %v261_v20, 0.0 }
  0x11   : > { %vm368_vm0 = vcmp.lt.s32.totalorder %v364_v3, %v1588_v2  ;;  %v274_v15 = vsub.f32 0.0, %v266_v7  ;;  %v276_v16 = vsub.f32 0.0, %v268_v9  ;;  %v288_v17 = vld [vmem:[%s1605_s23 + $0x30] sm:$0xff]  ;;  %v270_v18 = vmax.f32 %v262_v13, 0.0  ;;  %v286_v22 = vld [vmem:[%s1605_s23 + $0x20] sm:$0xff]  ;;  %v285_v29 = vld [vmem:[%s1605_s23 + $0x18] sm:$0xff] }
  0x12   : > { %1330 = vmatpush.msk.msra.mxu0 %vm368_vm0, %v1554_v6  ;;  %1386 = vmatpush.msk.msra.mxu1 %vm368_vm0, %v1554_v6  ;;  %v280_v21 = vsub.f32 0.0, %v272_v12  ;;  %v275_v28 = vsub.f32 0.0, %v267_v19  ;;  %v277_v31 = vsub.f32 0.0, %v269_v24  ;;  %v265_v41 = vld [vmem:[%s1599_s20 + $0x38] sm:$0xff]  ;;  %v263_v43 = vld [vmem:[%s1599_s20 + $0x28] sm:$0xff] }
  0x13   : > { %1388 = vmatpush.msk.msra.mxu3 %vm368_vm0, %v1554_v6  ;;  %1387 = vmatpush.msk.msra.mxu2 %vm368_vm0, %v1554_v6  ;;  %v290_v25 = vmul.f32 %v282_v8, %v274_v15  ;;  %v292_v26 = vmul.f32 %v284_v11, %v276_v16  ;;  %v278_v27 = vsub.f32 0.0, %v270_v18  ;;  %v273_v42 = vmax.f32 %v265_v41, 0.0  ;;  %v289_v44 = vld [vmem:[%s1605_s23 + $0x38] sm:$0xff]  ;;  %v287_v47 = vld [vmem:[%s1605_s23 + $0x28] sm:$0xff] }
  0x14   : > { %1331 = vmatpush.msk.msra.mxu0 %vm367_vm1, %v1554_v6  ;;  %1389 = vmatpush.msk.msra.mxu1 %vm367_vm1, %v1554_v6  ;;  %v296_v30 = vmul.f32 %v288_v17, %v280_v21  ;;  %v291_v35 = vmul.f32 %v283_v23, %v275_v28  ;;  %v293_v37 = vmul.f32 %v285_v29, %v277_v31  ;;  %v271_v45 = vmax.f32 %v263_v43, 0.0 }
  0x15   : > { %1391 = vmatpush.msk.msra.mxu3 %vm367_vm1, %v1554_v6  ;;  %1390 = vmatpush.msk.msra.mxu2 %vm367_vm1, %v1554_v6  ;;  %v298_v32 = vmul.f32 1.442695, %v290_v25  ;;  %v302_v33 = vmul.f32 1.442695, %v292_v26  ;;  %v294_v34 = vmul.f32 %v286_v22, %v278_v27  ;;  %v281_v46 = vsub.f32 0.0, %v273_v42 }
  0x16   : > { %v310_v36 = vmul.f32 1.442695, %v296_v30  ;;  %v300_v39 = vmul.f32 1.442695, %v291_v35  ;;  %v304_v40 = vmul.f32 1.442695, %v293_v37 }
  0x17   : > { %1402 = vpow2.f32 %v298_v32  ;;  %v306_v38 = vmul.f32 1.442695, %v294_v34  ;;  %v279_v48 = vsub.f32 0.0, %v271_v45  ;;  %v297_v50 = vmul.f32 %v289_v44, %v281_v46  ;;  %v1348_v46 = vld [vmem:[%s1685_s27 + $0x40] sm:$0xff] }
  0x18   : > { %1404 = vpow2.f32 %v302_v33 }
  0x19   : > { %1406 = vpow2.f32 %v310_v36  ;;  %v295_v53 = vmul.f32 %v287_v47, %v279_v48  ;;  %v312_v56 = vmul.f32 1.442695, %v297_v50  ;;  %v563_v47 = vld [vmem:[%s1685_s27 + $0x10] sm:$0xff]  ;;  %v1356_v48 = vmul.f32 -1.442695, %v1348_v46  ;;  %v561_v50 = vld [vmem:[%s1685_s27] sm:$0xff] }
  0x1a   : > { %1408 = vpow2.f32 %v306_v38 }
  0x1b   : > { %1410 = vpow2.f32 %v300_v39  ;;  %v308_v60 = vmul.f32 1.442695, %v295_v53  ;;  %v1342_v53 = vmul.f32 -1.442695, %v563_v47 }
  0x1c   : > { %1412 = vpow2.f32 %v304_v40 }
  0x1d   : > { %v1633_v49 = vpop.eup %1402  ;;  %1414 = vpow2.f32 %v312_v56  ;;  %v1350_v56 = vld [vmem:[%s1685_s27 + $0x50] sm:$0xff] }
  0x1e   : > { %v1635_v51 = vpop.eup %1404  ;;  %v314_v52 = vsub.f32 1.0, %v1633_v49  ;;  %1416 = vpow2.f32 %v308_v60  ;;  %v1364_v60 = vld [vmem:[%s1685_s27 + $0x80] sm:$0xff]  ;;  %v1349_v49 = vld [vmem:[%s1685_s27 + $0x48] sm:$0xff] }
  0x1f   : > { %v1638_v54 = vpop.eup %1406  ;;  %v316_v55 = vsub.f32 1.0, %v1635_v51 }
  0x20   : > { %v1641_v57 = vpop.eup %1408  ;;  %v322_v58 = vsub.f32 1.0, %v314_v52  ;;  %v320_v59 = vsub.f32 1.0, %v1638_v54 }
  0x21   : > { %v1646_v61 = vpop.eup %1410  ;;  %v324_v62 = vsub.f32 1.0, %v316_v55  ;;  %v318_v63 = vsub.f32 1.0, %v1641_v57 }
  0x22   : > { %v1651_v0 = vpop.eup %1412  ;;  %v330_v1 = vmax.f32 %v322_v58, 1e-10  ;;  %v328_v3 = vsub.f32 1.0, %v320_v59  ;;  %v315_v4 = vsub.f32 1.0, %v1646_v61  ;;  %v1340_v58 = vmul.f32 -1.442695, %v561_v50 }
  0x23   : > { %v332_v5 = vmax.f32 %v324_v62, 1e-10  ;;  %v326_v6 = vsub.f32 1.0, %v318_v63  ;;  %v317_v7 = vsub.f32 1.0, %v1651_v0  ;;  %v1663_v16 = vpop.eup %1414  ;;  %v1358_v62 = vmul.f32 -1.442695, %v1350_v56 }
  0x24   : > { %v338_v8 = vmin.f32 %v330_v1, 1.0  ;;  %v336_v9 = vmax.f32 %v328_v3, 1e-10  ;;  %v323_v10 = vsub.f32 1.0, %v315_v4  ;;  %v1665_v19 = vpop.eup %1416  ;;  %v321_v21 = vsub.f32 1.0, %v1663_v16 }
  0x25   : > { %v340_v11 = vmin.f32 %v332_v5, 1.0  ;;  %v334_v12 = vmax.f32 %v326_v6, 1e-10  ;;  %v325_v13 = vsub.f32 1.0, %v317_v7  ;;  %v319_v23 = vsub.f32 1.0, %v1665_v19 }
  0x26   : > { %1418 = vlog2.f32 %v338_v8  ;;  %v344_v14 = vmin.f32 %v336_v9, 1.0  ;;  %v331_v15 = vmax.f32 %v323_v10, 1e-10  ;;  %v329_v24 = vsub.f32 1.0, %v321_v21  ;;  %v1366_v10 = vld [vmem:[%s1685_s27 + $0x90] sm:$0xff] }
  0x27   : > { %1420 = vlog2.f32 %v340_v11  ;;  %v342_v17 = vmin.f32 %v334_v12, 1.0  ;;  %v333_v18 = vmax.f32 %v325_v13, 1e-10  ;;  %v327_v25 = vsub.f32 1.0, %v319_v23 }
  0x28   : > { %1422 = vlog2.f32 %v344_v14  ;;  %v339_v20 = vmin.f32 %v331_v15, 1.0  ;;  %v337_v27 = vmax.f32 %v329_v24, 1e-10  ;;  %v1372_v1 = vmul.f32 -1.442695, %v1364_v60 }
  0x29   : > { %1424 = vlog2.f32 %v342_v17  ;;  %v341_v22 = vmin.f32 %v333_v18, 1.0  ;;  %v335_v30 = vmax.f32 %v327_v25, 1e-10  ;;  %v1374_v14 = vmul.f32 -1.442695, %v1366_v10 }
  0x2a   : > { %1426 = vlog2.f32 %v339_v20  ;;  %v345_v33 = vmin.f32 %v337_v27, 1.0 }
  0x2b   : > { %1428 = vlog2.f32 %v341_v22  ;;  %v343_v36 = vmin.f32 %v335_v30, 1.0  ;;  %v567_v30 = vld [vmem:[%s1685_s27 + $0x30] sm:$0xff] }
  0x2c   : > { %v1419_v26 = vpop.eup %1418  ;;  %1430 = vlog2.f32 %v345_v33  ;;  %v565_v33 = vld [vmem:[%s1685_s27 + $0x20] sm:$0xff] }
  0x2d   : > { %v1421_v28 = vpop.eup %1420  ;;  %v347_v29 = vmul.f32 0.6931472, %v1419_v26  ;;  %1432 = vlog2.f32 %v343_v36  ;;  %v1346_v36 = vmul.f32 -1.442695, %v567_v30 }
  0x2e   : > { %v1423_v31 = vpop.eup %1422  ;;  %v351_v32 = vmul.f32 0.6931472, %v1421_v28  ;;  %1434 = vpow2.f32 %v1356_v48 }
  0x2f   : > { %v1425_v34 = vpop.eup %1424  ;;  %1332 = vmatmul.msk.f32.vlgmr.msra.gmra.mxu0 %vm373_vm2, %v347_v29  ;;  %v359_v35 = vmul.f32 0.6931472, %v1423_v31  ;;  %1436 = vpow2.f32 %v1342_v53 }
  0x30   : > { %v1427_v37 = vpop.eup %1426  ;;  %1334 = vmatmul.msk.f32.vlgmr.msra.gmra.mxu1 %vm373_vm2, %v351_v32  ;;  %v355_v38 = vmul.f32 0.6931472, %v1425_v34  ;;  %1438 = vpow2.f32 %v1340_v58 }
  0x31   : > { %v1429_v39 = vpop.eup %1428  ;;  %1338 = vmatmul.msk.f32.vlgmr.msra.gmra.mxu3 %vm373_vm2, %v359_v35  ;;  %v349_v40 = vmul.f32 0.6931472, %v1427_v37  ;;  %1440 = vpow2.f32 %v1358_v62 }
  0x32   : > { %1336 = vmatmul.msk.f32.vlgmr.msra.gmra.mxu2 %vm373_vm2, %v355_v38  ;;  %v353_v41 = vmul.f32 0.6931472, %v1429_v39  ;;  %v1431_v42 = vpop.eup %1430  ;;  %1442 = vpow2.f32 %v1372_v1 }
  0x33   : > { %v1433_v43 = vpop.eup %1432  ;;  %v361_v44 = vmul.f32 0.6931472, %v1431_v42 }
  0x34   : > { %v357_v45 = vmul.f32 0.6931472, %v1433_v43  ;;  %v1435_v3 = vpop.eup %1434 }
  0x35   : > { %v1437_v5 = vpop.eup %1436  ;;  %v1692_v6 = vadd.f32 1.0, %v1435_v3 }
  0x36   : > { %v1439_v8 = vpop.eup %1438  ;;  %v1694_v9 = vadd.f32 1.0, %v1437_v5  ;;  %v1352_v5 = vld [vmem:[%s1685_s27 + $0x60] sm:$0xff] }
  0x37   : > { %1333 = vmatmul.msk.f32.gmra.mxu0 %vm373_vm2, %v349_v40  ;;  %v1441_v11 = vpop.eup %1440  ;;  %1444 = vrcp.f32 %v1692_v6  ;;  %v1698_v12 = vadd.f32 1.0, %v1439_v8  ;;  %v1344_v40 = vmul.f32 -1.442695, %v565_v33  ;;  %vm824_vm3 = vweird.f32 %v1692_v6 }
  0x38   : > { %1335 = vmatmul.msk.f32.gmra.mxu1 %vm373_vm2, %v353_v41  ;;  %v1443_v13 = vpop.eup %1442  ;;  %1446 = vrcp.f32 %v1694_v9  ;;  %v1701_v15 = vadd.f32 1.0, %v1441_v11  ;;  %v830_v41 = vand.u32 2147483648, %v1692_v6  ;;  %v828_v46 = vand.u32 2147483647, %v1692_v6 }
  0x39   : > { %1339 = vmatmul.msk.f32.gmra.mxu3 %vm373_vm2, %v361_v44  ;;  %1448 = vrcp.f32 %v1698_v12  ;;  %v1704_v17 = vadd.f32 1.0, %v1443_v13  ;;  %v1354_v44 = vld [vmem:[%s1685_s27 + $0x70] sm:$0xff]  ;;  %vm636_vm5 = vweird.f32 %v1694_v9  ;;  %v642_v50 = vand.u32 2147483648, %v1694_v9 }
  0x3a   : > { %1337 = vmatmul.msk.f32.gmra.mxu2 %vm373_vm2, %v357_v45  ;;  %1450 = vpow2.f32 %v1374_v14  ;;  %v831_v56 = vor.u32 1.1754944e-38, %v830_v41  ;;  %vm606_vm8 = vweird.f32 %v1698_v12  ;;  %v612_v58 = vand.u32 2147483648, %v1698_v12  ;;  %v564_v41 = vld [vmem:[%s1685_s27 + $0x18] sm:$0xff] }
  0x3b   : > { %1452 = vrcp.f32 %v1701_v15  ;;  %v1362_v60 = vmul.f32 -1.442695, %v1354_v44  ;;  %v640_v1 = vand.u32 2147483647, %v1694_v9  ;;  %vm1774_vm11 = vcmp.eq.f32.partialorder %v828_v46, 8.507059e+37 }
  0x3c   : > { %1454 = vrcp.f32 %v1704_v17  ;;  %vm854_vm12 = vweird.f32 %v1701_v15  ;;  %v1360_v33 = vmul.f32 -1.442695, %v1352_v5  ;;  %v1046_v10 = vand.u32 2147483647, %v1704_v17 }
  0x3d   : > { %v1706_v18 = vpop.eup %1444  ;;  %vm1795_vm15 = vcmp.eq.f32.partialorder %v640_v1, 8.507059e+37  ;;  %v487_v1 = vld [vmem:[%s1821_s30] sm:$0xff] }
  0x3e   : > { %v1710_v20 = vpop.eup %1446  ;;  %v820_v22 = vmul.f32 %v1706_v18, %v1692_v6  ;;  %vm825_vm4 = vweird.f32 %v1706_v18 }
  0x3f   : > { %v1714_v24 = vpop.eup %1448  ;;  %v632_v26 = vmul.f32 %v1710_v20, %v1694_v9  ;;  %vm637_vm6 = vweird.f32 %v1710_v20  ;;  %vm1750_vm7 = vmor %vm824_vm3, %vm825_vm4  ;;  %vm1042_vm4 = vweird.f32 %v1704_v17 }
  0x40   : > { %v1451_v25 = vpop.eup %1450  ;;  %v821_v28 = vsub.f32 1.0, %v820_v22  ;;  %v602_v29 = vmul.f32 %v1714_v24, %v1698_v12  ;;  %vm607_vm9 = vweird.f32 %v1714_v24  ;;  %vm1767_vm10 = vmor %vm636_vm5, %vm637_vm6  ;;  %v610_v22 = vand.u32 2147483647, %v1698_v12 }
  0x41   : > { %v1718_v27 = vpop.eup %1452  ;;  %v1725_v32 = vadd.f32 1.0, %v1451_v25  ;;  %v633_v34 = vsub.f32 1.0, %v632_v26  ;;  %vm1787_vm14 = vmor %vm606_vm8, %vm607_vm9  ;;  %vm1892_vm9 = vcmp.eq.f32.partialorder %v1046_v10, 8.507059e+37 }
  0x42   : > { %v1723_v31 = vpop.eup %1454  ;;  %v850_v35 = vmul.f32 %v1718_v27, %v1701_v15  ;;  %v822_v37 = vmul.f32 %v1706_v18, %v821_v28  ;;  %v603_v38 = vsub.f32 1.0, %v602_v29  ;;  %v643_v28 = vor.u32 1.1754944e-38, %v642_v50 }
  0x43   : > { %v1733_v39 = vmul.f32 %v1723_v31, %v1704_v17  ;;  %1456 = vrcp.f32 %v1725_v32  ;;  %v634_v42 = vmul.f32 %v1710_v20, %v633_v34  ;;  %v860_v29 = vand.u32 2147483648, %v1701_v15  ;;  %v1368_v34 = vld [vmem:[%s1685_s27 + $0xa0] sm:$0xff] }
  0x44   : > { %v851_v43 = vsub.f32 1.0, %v850_v35  ;;  %1458 = vpow2.f32 %v1346_v36  ;;  %v823_v45 = vadd.f32 %v1706_v18, %v822_v37  ;;  %v604_v47 = vmul.f32 %v1714_v24, %v603_v38 }
  0x45   : > { %v1039_v48 = vsub.f32 1.0, %v1733_v39  ;;  %1460 = vpow2.f32 %v1344_v40  ;;  %v635_v62 = vadd.f32 %v1710_v20, %v634_v42  ;;  %vm855_vm13 = vweird.f32 %v1718_v27 }
  0x46   : > { %v852_v3 = vmul.f32 %v1718_v27, %v851_v43  ;;  %v827_v11 = vsel %vm1750_vm7, %v1706_v18, %v823_v45  ;;  %v605_v14 = vadd.f32 %v1714_v24, %v604_v47  ;;  %1462 = vpow2.f32 %v1362_v60  ;;  %vm1810_vm0 = vmor %vm854_vm12, %vm855_vm13 }
  0x47   : > { %v639_v36 = vsel %vm1767_vm10, %v1710_v20, %v635_v62  ;;  %v858_v38 = vand.u32 2147483647, %v1701_v15  ;;  %v613_v43 = vor.u32 1.1754944e-38, %v612_v58  ;;  %v1376_v44 = vmul.f32 -1.442695, %v1368_v34 }
  0x48   : > { %v853_v12 = vadd.f32 %v1718_v27, %v852_v3  ;;  %v609_v42 = vsel %vm1787_vm14, %v1714_v24, %v605_v14  ;;  %vm611_vm1 = vcmp.eq.f32.partialorder %v610_v22, 8.507059e+37  ;;  %v1040_v45 = vmul.f32 %v1723_v31, %v1039_v48 }
  0x49   : > { %v1761_v6 = vpop.eup %1456  ;;  %v644_v46 = vsel %vm1795_vm15, %v643_v28, %v639_v36  ;;  %v861_v47 = vor.u32 1.1754944e-38, %v860_v29  ;;  %v1830_v24 = vsel %vm1774_vm11, %v831_v56, %v827_v11  ;;  %v1343_v50 = vmul.f32 -1.442695, %v564_v41  ;;  %v562_v56 = vld [vmem:[%s1685_s27 + $0x8] sm:$0xff] }
  0x4a   : > { %v1459_v25 = vpop.eup %1458  ;;  %v1068_v39 = vmul.f32 %v1761_v6, %v1725_v32  ;;  %v857_v58 = vsel %vm1810_vm0, %v1718_v27, %v853_v12  ;;  %vm1835_vm3 = vcmp.eq.f32.partialorder %v858_v38, 8.507059e+37  ;;  %v1841_v3 = vsel %vm611_vm1, %v613_v43, %v609_v42 }
  0x4b   : > { %v1461_v35 = vpop.eup %1460  ;;  %v1803_v40 = vadd.f32 1.0, %v1459_v25  ;;  %vm1043_vm5 = vweird.f32 %v1723_v31  ;;  %v862_v13 = vsel %vm1835_vm3, %v861_v47, %v857_v58  ;;  %v1048_v14 = vand.u32 2147483648, %v1704_v17 }
  0x4c   : > { %v1824_v15 = vadd.f32 1.0, %v1461_v35  ;;  %v1463_v53 = vpop.eup %1462  ;;  %v1069_v60 = vsub.f32 1.0, %v1068_v39  ;;  %vm1871_vm6 = vmor %vm1042_vm4, %vm1043_vm5  ;;  %vm1072_vm7 = vweird.f32 %v1725_v32  ;;  %v1078_v29 = vand.u32 2147483648, %v1725_v32 }
  0x4d   : > { %vm1073_vm8 = vweird.f32 %v1761_v6  ;;  %v1357_v35 = vmul.f32 -1.442695, %v1349_v49  ;;  %v1049_v42 = vor.u32 1.1754944e-38, %v1048_v14  ;;  %v702_v10 = vand.u32 2147483648, %v1803_v40 }
  0x4e   : > { %vm1906_vm10 = vmor %vm1072_vm7, %vm1073_vm8  ;;  %v1079_v47 = vor.u32 1.1754944e-38, %v1078_v29  ;;  %vm696_vm12 = vweird.f32 %v1803_v40  ;;  %vm666_vm0 = vweird.f32 %v1824_v15 }
  0xac   : > { %v415_v8 = vpop.f32.mrf.mxu0 }
  0xad   : > { %v439_v26 = vmul.f32 1.442695, %v415_v8  ;;  %v421_v9 = vpop.f32.mrf.mxu1  ;;  %v1851_v8 = vadd.f32 %v1723_v31, %v1040_v45 }
  0xae   : > { %v443_v30 = vmul.f32 1.442695, %v421_v9  ;;  %v1341_v9 = vmul.f32 -1.442695, %v562_v56 }
  0xaf   : > { %1464 = vpow2.f32 %v439_v26  ;;  %v489_v26 = vld [vmem:[%s1821_s30 + $0x10] sm:$0xff]  ;;  %v1045_v38 = vsel %vm1871_vm6, %v1723_v31, %v1851_v8 }
  0xb0   : > { %1466 = vpow2.f32 %v443_v30  ;;  %v1880_v30 = vadd.f32 1.0, %v1463_v53  ;;  %v1050_v14 = vsel %vm1892_vm9, %v1049_v42, %v1045_v38 }
  0xb1   : > { %1468 = vpow2.f32 %v1360_v33 }
  0xb2   : > { %1470 = vrcp.f32 %v1803_v40  ;;  %vm914_vm15 = vweird.f32 %v1880_v30 }
  0xb3   : > { %1472 = vpow2.f32 %v1376_v44  ;;  %v1076_v44 = vand.u32 2147483647, %v1725_v32 }
  0xb4   : > { %1474 = vrcp.f32 %v1824_v15  ;;  %v433_v34 = vpop.f32.mrf.mxu3 }
  0xb5   : > { %v1465_v62 = vpop.eup %1464  ;;  %1476 = vpow2.f32 %v1343_v50  ;;  %v427_v12 = vpop.f32.mrf.mxu2  ;;  %vm1924_vm11 = vcmp.eq.f32.partialorder %v1076_v44, 8.507059e+37 }
  0xb6   : > { %v1467_v27 = vpop.eup %1466  ;;  %v1848_v5 = vmul.f32 %v1465_v62, %v314_v52  ;;  %1478 = vpow2.f32 %v1341_v9  ;;  %v447_v48 = vmul.f32 1.442695, %v427_v12  ;;  %v418_v62 = vpop.f32.mrf.mxu0  ;;  %v918_v12 = vand.u32 2147483647, %v1880_v30 }
  0xb7   : > { %v1857_v11 = vmul.f32 %v1467_v27, %v316_v55  ;;  %v1469_v52 = vpop.eup %1468  ;;  %v1070_v55 = vmul.f32 %v1761_v6, %v1069_v60  ;;  %1480 = vrcp.f32 %v1880_v30  ;;  %v424_v56 = vpop.f32.mrf.mxu1 }
  0xb8   : > { %v463_v22 = vsel %vm373_vm2, %v1848_v5, 0.0  ;;  %v495_v25 = vmul.f32 %v487_v1, %v1848_v5  ;;  %v1882_v18 = vpop.eup %1470  ;;  %v1896_v41 = vadd.f32 1.0, %v1469_v52  ;;  %1482 = vpow2.f32 %v1357_v35 }
  0xb9   : > { %v469_v28 = vsel %vm373_vm2, %v1857_v11, 0.0  ;;  %464 = vadd.xlane.f32.xlu0 %v463_v22  ;;  %v723_v33 = vmul.f32 %v644_v46, %v1857_v11  ;;  %v1473_v36 = vpop.eup %1472  ;;  %v497_v37 = vmul.f32 %v489_v26, %v1857_v11  ;;  %v1071_v43 = vadd.f32 %v1761_v6, %v1070_v55 }
  0xba   : > { %470 = vadd.xlane.f32.xlu1 %v469_v28  ;;  %v503_v17 = vsel %vm373_vm2, %v495_v25, 0.0  ;;  %v1898_v20 = vpop.eup %1474  ;;  %v451_v46 = vmul.f32 1.442695, %v433_v34  ;;  %v692_v50 = vmul.f32 %v1882_v18, %v1803_v40  ;;  %v941_v58 = vmul.f32 %v862_v13, %v1857_v11 }
  0xbb   : > { %504 = vadd.xlane.f32.xlu2 %v503_v17  ;;  %v1477_v45 = vpop.eup %1476  ;;  %v735_v53 = vsel %vm373_vm2, %v723_v33, 0.0  ;;  %v509_v60 = vsel %vm373_vm2, %v497_v37, 0.0  ;;  %v662_v32 = vmul.f32 %v1898_v20, %v1824_v15  ;;  %1484 = vrcp.f32 %v1896_v41 }
  0xbc   : > { %v1919_v1 = vadd.f32 1.0, %v1473_v36  ;;  %v1075_v27 = vsel %vm1906_vm10, %v1761_v6, %v1071_v43  ;;  %v1929_v13 = vadd.f32 1.0, %v1477_v45  ;;  %1486 = vpow2.f32 %v451_v46  ;;  %v1479_v22 = vpop.eup %1478 }
  0xbd   : > { %v693_v49 = vsub.f32 1.0, %v692_v50  ;;  %v700_v52 = vand.u32 2147483647, %v1803_v40  ;;  %v953_v6 = vsel %vm373_vm2, %v941_v58, 0.0  ;;  %1488 = vpow2.f32 %v447_v48  ;;  %v1936_v51 = vpop.eup %1480  ;;  %v1351_v50 = vld [vmem:[%s1685_s27 + $0x58] sm:$0xff] }
  0xbe   : > { %v441_v25 = vmul.f32 1.442695, %v418_v62  ;;  %v920_v26 = vand.u32 2147483648, %v1880_v30  ;;  %v445_v55 = vmul.f32 1.442695, %v424_v56  ;;  %v1080_v9 = vsel %vm1924_vm11, %v1079_v47, %v1075_v27  ;;  %v1483_v29 = vpop.eup %1482  ;;  %v1367_v47 = vld [vmem:[%s1685_s27 + $0x98] sm:$0xff] }
  0xbf   : > { %v663_v28 = vsub.f32 1.0, %v662_v32  ;;  %1490 = vrcp.f32 %v1919_v1  ;;  %v939_v17 = vmul.f32 %v1830_v24, %v1848_v5  ;;  %v1944_v33 = vor.u32 1.1754944e-38, %v702_v10  ;;  %v1370_v62 = vld [vmem:[%s1685_s27 + $0xb0] sm:$0xff] }
  0xc0   : > { %1492 = vrcp.f32 %v1929_v13  ;;  %v721_v35 = vmul.f32 %v1841_v3, %v1848_v5  ;;  %v694_v36 = vmul.f32 %v1882_v18, %v693_v49  ;;  %vm1952_vm13 = vcmp.eq.f32.partialorder %v700_v52, 8.507059e+37 }
  0xc1   : > { %736 = vadd.xlane.f32.xlu0 %v735_v53  ;;  %v1947_v34 = vpop.eup %1484  ;;  %v1157_v24 = vmul.f32 %v1050_v14, %v1848_v5  ;;  %1494 = vpow2.f32 %v441_v25  ;;  %v910_v38 = vmul.f32 %v1936_v51, %v1880_v30  ;;  %v1960_v39 = vor.u32 1.1754944e-38, %v920_v26 }
  0xc2   : > { %510 = vadd.xlane.f32.xlu1 %v509_v60  ;;  %v1487_v42 = vpop.eup %1486  ;;  %1496 = vpow2.f32 %v445_v55  ;;  %vm697_vm14 = vweird.f32 %v1882_v18  ;;  %v664_v3 = vmul.f32 %v1898_v20, %v663_v28  ;;  %v1964_v43 = vadd.f32 1.0, %v1479_v22  ;;  %v1365_v60 = vld [vmem:[%s1685_s27 + $0x88] sm:$0xff] }
  0xc3   : > { %954 = vadd.xlane.f32.xlu2 %v953_v6  ;;  %v1489_v44 = vpop.eup %1488  ;;  %v947_v5 = vsel %vm373_vm2, %v939_v17, 0.0  ;;  %v672_v45 = vand.u32 2147483648, %v1824_v15  ;;  %v880_v46 = vmul.f32 %v1947_v34, %v1896_v41  ;;  %v1971_v31 = vadd.f32 1.0, %v1483_v29  ;;  %vm1994_vm3 = vmor %vm696_vm12, %vm697_vm14 }
  0xc4   : > { %v729_v58 = vsel %vm373_vm2, %v721_v35, 0.0  ;;  %v695_v48 = vadd.f32 %v1882_v18, %v694_v36  ;;  %vm667_vm1 = vweird.f32 %v1898_v20  ;;  %v1987_v56 = vmul.f32 %v1487_v42, %v320_v59  ;;  %v493_v35 = vld [vmem:[%s1821_s30 + $0x30] sm:$0xff]  ;;  %v491_v42 = vld [vmem:[%s1821_s30 + $0x20] sm:$0xff] }
  0xc5   : > { %v1975_v53 = vpop.eup %1490  ;;  %v1165_v27 = vsel %vm373_vm2, %v1157_v24, 0.0  ;;  %v670_v10 = vand.u32 2147483647, %v1824_v15  ;;  %v911_v14 = vsub.f32 1.0, %v910_v38  ;;  %v2001_v49 = vmul.f32 %v1489_v44, %v318_v63  ;;  %vm2010_vm4 = vmor %vm666_vm0, %vm667_vm1 }
  0xc6   : > { %v1983_v32 = vpop.eup %1492  ;;  %v665_v54 = vadd.f32 %v1898_v20, %v664_v3  ;;  %v1375_v59 = vmul.f32 -1.442695, %v1367_v47  ;;  %v2004_v52 = vmul.f32 -1.442695, %v1351_v50  ;;  %v881_v6 = vsub.f32 1.0, %v880_v46 }
  0xc7   : > { %v1495_v22 = vpop.eup %1494  ;;  %v1098_v57 = vmul.f32 %v1975_v53, %v1919_v1  ;;  %v2016_v63 = vmul.f32 -1.442695, %v1365_v60  ;;  %v2018_v25 = vmul.f32 -1.442695, %v1370_v62  ;;  %v1159_v55 = vmul.f32 %v1080_v9, %v1857_v11 }
  0xc8   : > { %v1497_v26 = vpop.eup %1496  ;;  %v699_v15 = vsel %vm1994_vm3, %v1882_v18, %v695_v48  ;;  %v673_v28 = vor.u32 1.1754944e-38, %v672_v45  ;;  %v647_v29 = vmul.f32 %v1983_v32, %v1929_v13  ;;  %v481_v17 = vsel %vm373_vm2, %v1987_v56, 0.0 }
  0xc9   : > { %948 = vadd.xlane.f32.xlu0 %v947_v5  ;;  %vm2029_vm5 = vcmp.eq.f32.partialorder %v670_v10, 8.507059e+37  ;;  %v912_v24 = vmul.f32 %v1936_v51, %v911_v14  ;;  %1498 = vrcp.f32 %v1964_v43  ;;  %v2037_v11 = vmul.f32 %v1495_v22, %v315_v4 }
  0xca   : > { %730 = vadd.xlane.f32.xlu1 %v729_v58  ;;  %v475_v18 = vsel %vm373_vm2, %v2001_v49, 0.0  ;;  %v669_v9 = vsel %vm2010_vm4, %v1898_v20, %v665_v54  ;;  %vm915_vm6 = vweird.f32 %v1936_v51  ;;  %v2047_v38 = vmul.f32 %v1497_v26, %v317_v7 }
  0xcb   : > { %1166 = vadd.xlane.f32.xlu2 %v1165_v27  ;;  %v704_v61 = vsel %vm1952_vm13, %v1944_v33, %v699_v15  ;;  %vm2053_vm7 = vcmp.eq.f32.partialorder %v918_v12, 8.507059e+37  ;;  %v882_v3 = vmul.f32 %v1947_v34, %v881_v6  ;;  %v1099_v44 = vsub.f32 1.0, %v1098_v57  ;;  %vm2073_vm10 = vmor %vm914_vm15, %vm915_vm6 }
  0xcc   : > { %v1171_v20 = vsel %vm373_vm2, %v1159_v55, 0.0  ;;  %v501_v5 = vmul.f32 %v493_v35, %v1987_v56  ;;  %vm884_vm8 = vweird.f32 %v1896_v41  ;;  %v648_v0 = vsub.f32 1.0, %v647_v29  ;;  %v490_v29 = vld [vmem:[%s1821_s30 + $0x18] sm:$0xff] }
  0xcd   : > { %v913_v7 = vadd.f32 %v1936_v51, %v912_v24  ;;  %vm885_vm9 = vweird.f32 %v1947_v34  ;;  %v888_v33 = vand.u32 2147483647, %v1896_v41  ;;  %v890_v37 = vand.u32 2147483648, %v1896_v41 }
  0xce   : > { %v499_v12 = vmul.f32 %v491_v42, %v2001_v49  ;;  %v727_v45 = vmul.f32 %v704_v61, %v1987_v56  ;;  %v674_v46 = vsel %vm2029_vm5, %v673_v28, %v669_v9  ;;  %1500 = vrcp.f32 %v1971_v31  ;;  %vm2088_vm11 = vmor %vm884_vm8, %vm885_vm9 }
  0xcf   : > { %v2078_v50 = vpop.eup %1498  ;;  %v466_v58 = vsel %vm373_vm2, %v2037_v11, 0.0  ;;  %v472_v48 = vsel %vm373_vm2, %v2047_v38, 0.0  ;;  %v883_v60 = vadd.f32 %v1947_v34, %v882_v3  ;;  %v1100_v62 = vmul.f32 %v1975_v53, %v1099_v44 }
  0xd0   : > { %vm1102_vm12 = vweird.f32 %v1919_v1  ;;  %v649_v27 = vmul.f32 %v1983_v32, %v648_v0  ;;  %v617_v8 = vmul.f32 %v2078_v50, %v1964_v43  ;;  %1502 = vpow2.f32 %v1375_v59 }
  0xd1   : > { %482 = vadd.xlane.f32.xlu0 %v481_v17  ;;  %v917_v10 = vsel %vm2073_vm10, %v1936_v51, %v913_v7  ;;  %vm2099_vm13 = vcmp.eq.f32.partialorder %v888_v33, 8.507059e+37  ;;  %v891_v41 = vor.u32 1.1754944e-38, %v890_v37  ;;  %vm1103_vm14 = vweird.f32 %v1975_v53  ;;  %v436_v33 = vpop.f32.mrf.mxu3  ;;  %v1353_v17 = vld [vmem:[%s1685_s27 + $0x68] sm:$0xff] }
  0xd2   : > { %1172 = vadd.xlane.f32.xlu1 %v1171_v20  ;;  %v1106_v54 = vand.u32 2147483647, %v1919_v1  ;;  %v1108_v22 = vand.u32 2147483648, %v1919_v1  ;;  %vm651_vm15 = vweird.f32 %v1929_v13  ;;  %vm652_vm0 = vweird.f32 %v1983_v32  ;;  %vm2118_vm1 = vmor %vm1102_vm12, %vm1103_vm14 }
  0xd3   : > { %476 = vadd.xlane.f32.xlu2 %v475_v18  ;;  %v887_v59 = vsel %vm2088_vm11, %v1947_v34, %v883_v60  ;;  %v1101_v51 = vadd.f32 %v1975_v53, %v1100_v62  ;;  %v657_v40 = vand.u32 2147483648, %v1929_v13  ;;  %1504 = vpow2.f32 %v2004_v52  ;;  %vm2134_vm3 = vmor %vm651_vm15, %vm652_vm0 }
  0xd4   : > { %v2114_v6 = vpop.eup %1500  ;;  %v650_v26 = vadd.f32 %v1983_v32, %v649_v27  ;;  %v655_v34 = vand.u32 2147483647, %v1929_v13  ;;  %v618_v55 = vsub.f32 1.0, %v617_v8  ;;  %1506 = vpow2.f32 %v2016_v63  ;;  %v488_v8 = vld [vmem:[%s1821_s30 + $0x8] sm:$0xff] }
  0xd5   : > { %v521_v15 = vsel %vm373_vm2, %v501_v5, 0.0  ;;  %v515_v52 = vsel %vm373_vm2, %v499_v12, 0.0  ;;  %v747_v28 = vsel %vm373_vm2, %v727_v45, 0.0  ;;  %v725_v1 = vmul.f32 %v674_v46, %v2001_v49  ;;  %v430_v12 = vpop.f32.mrf.mxu2 }
  0xd6   : > { %v1503_v35 = vpop.eup %1502  ;;  %v922_v63 = vsel %vm2053_vm7, %v1960_v39, %v917_v10  ;;  %v892_v36 = vsel %vm2099_vm13, %v891_v41, %v887_v59  ;;  %vm2143_vm4 = vcmp.eq.f32.partialorder %v1106_v54, 8.507059e+37  ;;  %v1109_v18 = vor.u32 1.1754944e-38, %v1108_v22 }
  0xd7   : > { %v1105_v13 = vsel %vm2118_vm1, %v1975_v53, %v1101_v51  ;;  %v658_v9 = vor.u32 1.1754944e-38, %v657_v40  ;;  %v835_v42 = vmul.f32 %v2114_v6, %v1971_v31  ;;  %v2152_v61 = vadd.f32 1.0, %v1503_v35 }
  0xd8   : > { %v498_v39 = vmul.f32 %v490_v29, %v2047_v38  ;;  %v654_v4 = vsel %vm2134_vm3, %v1983_v32, %v650_v26  ;;  %vm656_vm5 = vcmp.eq.f32.partialorder %v655_v34, 8.507059e+37  ;;  %v619_v3 = vmul.f32 %v2078_v50, %v618_v55  ;;  %v1355_v29 = vld [vmem:[%s1685_s27 + $0x78] sm:$0xff] }
  0xd9   : > { %467 = vadd.xlane.f32.xlu0 %v466_v58  ;;  %v1505_v44 = vpop.eup %1504  ;;  %v741_v20 = vsel %vm373_vm2, %v725_v1, 0.0  ;;  %v945_v53 = vmul.f32 %v922_v63, %v1987_v56  ;;  %v943_v5 = vmul.f32 %v892_v36, %v2001_v49  ;;  %1508 = vrcp.f32 %v2152_v61  ;;  %v568_v1 = vld [vmem:[%s1685_s27 + $0x38] sm:$0xff] }
  0xda   : > { %473 = vadd.xlane.f32.xlu1 %v472_v48  ;;  %v1507_v0 = vpop.eup %1506  ;;  %v1110_v7 = vsel %vm2143_vm4, %v1109_v18, %v1105_v13  ;;  %vm621_vm6 = vweird.f32 %v1964_v43  ;;  %vm622_vm7 = vweird.f32 %v2078_v50  ;;  %v627_v32 = vand.u32 2147483648, %v1964_v43 }
  0xdb   : > { %522 = vadd.xlane.f32.xlu2 %v521_v15  ;;  %v659_v37 = vsel %vm656_vm5, %v658_v9, %v654_v4  ;;  %v836_v45 = vsub.f32 1.0, %v835_v42  ;;  %v2168_v46 = vadd.f32 1.0, %v1505_v44  ;;  %v2170_v47 = vadd.f32 1.0, %v1507_v0  ;;  %vm2181_vm8 = vmor %vm621_vm6, %vm622_vm7  ;;  %v566_v4 = vld [vmem:[%s1685_s27 + $0x28] sm:$0xff] }
  0xdc   : > { %v512_v58 = vsel %vm373_vm2, %v498_v39, 0.0  ;;  %v620_v48 = vadd.f32 %v2078_v50, %v619_v3  ;;  %v625_v60 = vand.u32 2147483647, %v1964_v43  ;;  %1510 = vpow2.f32 %v2018_v25 }
  0xdd   : > { %v1161_v62 = vmul.f32 %v1110_v7, %v2001_v49  ;;  %v453_v27 = vmul.f32 1.442695, %v436_v33  ;;  %v845_v10 = vand.u32 2147483648, %v1971_v31  ;;  %1512 = vrcp.f32 %v2168_v46 }
  0xde   : > { %v724_v25 = vmul.f32 %v659_v37, %v2047_v38  ;;  %v449_v14 = vmul.f32 1.442695, %v430_v12  ;;  %v843_v49 = vand.u32 2147483647, %v1971_v31  ;;  %1514 = vrcp.f32 %v2170_v47 }
  0xdf   : > { %v2191_v41 = vpop.eup %1508  ;;  %v965_v43 = vsel %vm373_vm2, %v945_v53, 0.0  ;;  %v959_v54 = vsel %vm373_vm2, %v943_v5, 0.0  ;;  %v628_v22 = vor.u32 1.1754944e-38, %v627_v32  ;;  %v837_v59 = vmul.f32 %v2114_v6, %v836_v45  ;;  %v1369_v53 = vld [vmem:[%s1685_s27 + $0xa8] sm:$0xff] }
  0xe0   : > { %v624_v51 = vsel %vm2181_vm8, %v2078_v50, %v620_v48  ;;  %vm2199_vm9 = vcmp.eq.f32.partialorder %v625_v60, 8.507059e+37  ;;  %v2204_v57 = vmul.f32 %v488_v8, %v2037_v11  ;;  %v1083_v26 = vmul.f32 %v2191_v41, %v2152_v61 }
  0xe1   : > { %516 = vadd.xlane.f32.xlu0 %v515_v52  ;;  %v1177_v34 = vsel %vm373_vm2, %v1161_v62, 0.0  ;;  %1516 = vpow2.f32 %v453_v27  ;;  %vm839_vm10 = vweird.f32 %v1971_v31  ;;  %v2210_v55 = vor.u32 1.1754944e-38, %v845_v10 }
  0xe2   : > { %748 = vadd.xlane.f32.xlu1 %v747_v28  ;;  %v1511_v15 = vpop.eup %1510  ;;  %v738_v50 = vsel %vm373_vm2, %v724_v25, 0.0  ;;  %1518 = vpow2.f32 %v449_v14  ;;  %vm840_vm11 = vweird.f32 %v2114_v6  ;;  %vm2214_vm12 = vcmp.eq.f32.partialorder %v843_v49, 8.507059e+37 }
  0xe3   : > { %742 = vadd.xlane.f32.xlu2 %v741_v20  ;;  %v1084_v28 = vsub.f32 1.0, %v1083_v26  ;;  %v2221_v35 = vpop.eup %1512  ;;  %v629_v63 = vsel %vm2199_vm9, %v628_v22, %v624_v51  ;;  %v838_v36 = vadd.f32 %v2114_v6, %v837_v59  ;;  %v1347_v24 = vmul.f32 -1.442695, %v568_v1  ;;  %vm2237_vm14 = vmor %vm839_vm10, %vm840_vm11  ;;  %v492_v1 = vld [vmem:[%s1821_s30 + $0x28] sm:$0xff] }
  0xe4   : > { %v1363_v18 = vmul.f32 -1.442695, %v1355_v29  ;;  %v2226_v13 = vpop.eup %1514  ;;  %vm1087_vm13 = vweird.f32 %v2152_v61  ;;  %v865_v42 = vmul.f32 %v2221_v35, %v2168_v46  ;;  %v1361_v39 = vmul.f32 -1.442695, %v1353_v17 }
  0xe5   : > { %v1085_v9 = vmul.f32 %v2191_v41, %v1084_v28  ;;  %vm1088_vm15 = vweird.f32 %v2191_v41  ;;  %v1091_v44 = vand.u32 2147483647, %v2152_v61  ;;  %v1053_v20 = vmul.f32 %v2226_v13, %v2170_v47 }
  0xe6   : > { %1520 = vpow2.f32 %v1347_v24  ;;  %v1093_v5 = vand.u32 2147483648, %v2152_v61  ;;  %v866_v0 = vsub.f32 1.0, %v865_v42  ;;  %v1345_v7 = vmul.f32 -1.442695, %v566_v4  ;;  %vm2258_vm0 = vmor %vm1087_vm13, %vm1088_vm15 }
  0xe7   : > { %1522 = vpow2.f32 %v1363_v18  ;;  %v1517_v31 = vpop.eup %1516  ;;  %v722_v32 = vmul.f32 %v629_v63, %v2037_v11  ;;  %v1086_v33 = vadd.f32 %v2191_v41, %v1085_v9  ;;  %v1054_v37 = vsub.f32 1.0, %v1053_v20 }
  0xe8   : > { %v2249_v12 = vadd.f32 1.0, %v1511_v15  ;;  %v1519_v45 = vpop.eup %1518  ;;  %v842_v48 = vsel %vm2237_vm14, %v2114_v6, %v838_v36  ;;  %v867_v60 = vmul.f32 %v2221_v35, %v866_v0  ;;  %1524 = vpow2.f32 %v1361_v39 }
  0xe9   : > { %966 = vadd.xlane.f32.xlu0 %v965_v43  ;;  %v1377_v62 = vmul.f32 -1.442695, %v1369_v53  ;;  %vm2263_vm1 = vcmp.eq.f32.partialorder %v1091_v44, 8.507059e+37  ;;  %vm869_vm3 = vweird.f32 %v2168_v46  ;;  %vm870_vm4 = vweird.f32 %v2221_v35 }
  0xea   : > { %960 = vadd.xlane.f32.xlu1 %v959_v54  ;;  %1526 = vpow2.f32 %v1345_v7  ;;  %v1094_v6 = vor.u32 1.1754944e-38, %v1093_v5  ;;  %v875_v61 = vand.u32 2147483648, %v2168_v46  ;;  %v1055_v27 = vmul.f32 %v2226_v13, %v1054_v37  ;;  %vm2280_vm5 = vmor %vm869_vm3, %vm870_vm4 }
  0xeb   : > { %513 = vadd.xlane.f32.xlu2 %v512_v58  ;;  %1528 = vpow2.f32 %v1377_v62  ;;  %v1090_v10 = vsel %vm2258_vm0, %v2191_v41, %v1086_v33  ;;  %v868_v25 = vadd.f32 %v2221_v35, %v867_v60  ;;  %v873_v14 = vand.u32 2147483647, %v2168_v46  ;;  %v1371_v33 = vld [vmem:[%s1685_s27 + $0xb8] sm:$0xff] }
  0xec   : > { %v1521_v8 = vpop.eup %1520  ;;  %1530 = vrcp.f32 %v2249_v12  ;;  %v732_v43 = vsel %vm373_vm2, %v722_v32, 0.0  ;;  %vm1057_vm6 = vweird.f32 %v2170_v47  ;;  %vm1058_vm7 = vweird.f32 %v2226_v13 }
  0xed   : > { %v1523_v49 = vpop.eup %1522  ;;  %v2286_v41 = vadd.f32 1.0, %v1521_v8  ;;  %v847_v22 = vsel %vm2214_vm12, %v2210_v55, %v842_v48  ;;  %v1061_v59 = vand.u32 2147483647, %v2170_v47  ;;  %v1063_v46 = vand.u32 2147483648, %v2170_v47  ;;  %vm2310_vm9 = vmor %vm1057_vm6, %vm1058_vm7 }
  0xee   : > { %v2293_v51 = vadd.f32 1.0, %v1523_v49  ;;  %v1525_v40 = vpop.eup %1524  ;;  %v1095_v26 = vsel %vm2263_vm1, %v1094_v6, %v1090_v10  ;;  %v1056_v15 = vadd.f32 %v2226_v13, %v1055_v27  ;;  %v2301_v55 = vmul.f32 %v1517_v31, %v321_v21 }
  0xef   : > { %1532 = vrcp.f32 %v2286_v41  ;;  %v872_v52 = vsel %vm2280_vm5, %v2221_v35, %v868_v25  ;;  %vm874_vm8 = vcmp.eq.f32.partialorder %v873_v14, 8.507059e+37  ;;  %v2318_v16 = vmul.f32 %v1519_v45, %v319_v23 }
  0xf0   : > { %1534 = vrcp.f32 %v2293_v51  ;;  %v940_v21 = vmul.f32 %v847_v22, %v2037_v11  ;;  %v1160_v35 = vmul.f32 %v1095_v26, %v2047_v38  ;;  %vm2324_vm10 = vcmp.eq.f32.partialorder %v1061_v59, 8.507059e+37 }
  0xf1   : > { %1178 = vadd.xlane.f32.xlu0 %v1177_v34  ;;  %v876_v34 = vor.u32 1.1754944e-38, %v875_v61  ;;  %v1064_v63 = vor.u32 1.1754944e-38, %v1063_v46  ;;  %v2328_v36 = vadd.f32 1.0, %v1525_v40  ;;  %v1060_v19 = vsel %vm2310_vm9, %v2226_v13, %v1056_v15 }
  0xf2   : > { %739 = vadd.xlane.f32.xlu1 %v738_v50  ;;  %v1527_v50 = vpop.eup %1526  ;;  %v500_v23 = vmul.f32 %v492_v1, %v2318_v16  ;;  %v506_v9 = vsel %vm373_vm2, %v2204_v57, 0.0  ;;  %v484_v42 = vsel %vm373_vm2, %v2301_v55, 0.0  ;;  %v950_v3 = vsel %vm373_vm2, %v940_v21, 0.0 }
  0xf3   : > { %733 = vadd.xlane.f32.xlu2 %v732_v43  ;;  %v1529_v29 = vpop.eup %1528  ;;  %v877_v24 = vsel %vm874_vm8, %v876_v34, %v872_v52  ;;  %v2334_v18 = vadd.f32 1.0, %v1527_v50  ;;  %1536 = vrcp.f32 %v2328_v36  ;;  %v478_v13 = vsel %vm373_vm2, %v2318_v16, 0.0 }
  0xf4   : > { %v2321_v17 = vpop.eup %1530  ;;  %v2341_v39 = vadd.f32 1.0, %v1529_v29  ;;  %v1174_v20 = vsel %vm373_vm2, %v1160_v35, 0.0  ;;  %v942_v53 = vmul.f32 %v877_v24, %v2047_v38  ;;  %v1065_v5 = vsel %vm2324_vm10, %v1064_v63, %v1060_v19 }
  0xf5   : > { %v1533_v4 = vpop.eup %1532  ;;  %1538 = vrcp.f32 %v2334_v18  ;;  %v2349_v57 = vmul.f32 %v2321_v17, %v2249_v12  ;;  %v2359_v7 = vsel %vm373_vm2, %v500_v23, 0.0  ;;  %vm711_vm11 = vweird.f32 %v2286_v41 }
  0xf6   : > { %v2351_v44 = vpop.eup %1534  ;;  %v707_v0 = vmul.f32 %v1533_v4, %v2286_v41  ;;  %v717_v31 = vand.u32 2147483648, %v2286_v41  ;;  %vm712_vm12 = vweird.f32 %v1533_v4  ;;  %v715_v38 = vand.u32 2147483647, %v2286_v41 }
  0xf7   : > { %v925_v32 = vmul.f32 %v2351_v44, %v2293_v51  ;;  %1540 = vrcp.f32 %v2341_v39  ;;  %v1158_v45 = vmul.f32 %v1065_v5, %v2037_v11  ;;  %v1129_v58 = vsub.f32 1.0, %v2349_v57  ;;  %vm2379_vm14 = vmor %vm711_vm11, %vm712_vm12 }
  0xf8   : > { %v708_v37 = vsub.f32 1.0, %v707_v0  ;;  %v1379_v60 = vmul.f32 -1.442695, %v1371_v33  ;;  %v956_v30 = vsel %vm373_vm2, %v942_v53, 0.0  ;;  %vm929_vm13 = vweird.f32 %v2293_v51  ;;  %v494_v53 = vld [vmem:[%s1821_s30 + $0x38] sm:$0xff] }
  0xf9   : > { %507 = vadd.xlane.f32.xlu0 %v506_v9  ;;  %v926_v48 = vsub.f32 1.0, %v925_v32  ;;  %v2370_v62 = vpop.eup %1536  ;;  %v933_v61 = vand.u32 2147483647, %v2293_v51  ;;  %v718_v11 = vor.u32 1.1754944e-38, %v717_v31  ;;  %v935_v25 = vand.u32 2147483648, %v2293_v51 }
  0xfa   : > { %951 = vadd.xlane.f32.xlu1 %v950_v3  ;;  %v709_v6 = vmul.f32 %v1533_v4, %v708_v37  ;;  %v895_v14 = vmul.f32 %v2370_v62, %v2328_v36  ;;  %vm1132_vm15 = vweird.f32 %v2249_v12  ;;  %vm716_vm0 = vcmp.eq.f32.partialorder %v715_v38, 8.507059e+37 }
  0xfb   : > { %1175 = vadd.xlane.f32.xlu2 %v1174_v20  ;;  %v2375_v27 = vpop.eup %1538  ;;  %v927_v10 = vmul.f32 %v2351_v44, %v926_v48  ;;  %vm899_vm1 = vweird.f32 %v2328_v36  ;;  %vm930_vm3 = vweird.f32 %v2351_v44  ;;  %v903_v41 = vand.u32 2147483647, %v2328_v36 }
  0xfc   : > { %v710_v49 = vadd.f32 %v1533_v4, %v709_v6  ;;  %v677_v43 = vmul.f32 %v2375_v27, %v2334_v18  ;;  %v896_v54 = vsub.f32 1.0, %v895_v14  ;;  %1542 = vpow2.f32 %v1379_v60  ;;  %vm2408_vm5 = vmor %vm929_vm13, %vm930_vm3 }
  0xfd   : > { %v2393_v22 = vpop.eup %1540  ;;  %vm900_vm4 = vweird.f32 %v2370_v62  ;;  %v905_v46 = vand.u32 2147483648, %v2328_v36  ;;  %v928_v34 = vadd.f32 %v2351_v44, %v927_v10  ;;  %vm1133_vm6 = vweird.f32 %v2321_v17 }
  0xfe   : > { %v714_v59 = vsel %vm2379_vm14, %v1533_v4, %v710_v49  ;;  %v678_v40 = vsub.f32 1.0, %v677_v43  ;;  %v897_v15 = vmul.f32 %v2370_v62, %v896_v54  ;;  %v1113_v50 = vmul.f32 %v2393_v22, %v2341_v39  ;;  %vm2425_vm8 = vmor %vm899_vm1, %vm900_vm4 }
  0xff   : > { %v719_v26 = vsel %vm716_vm0, %v718_v11, %v714_v59  ;;  %v1136_v1 = vand.u32 2147483647, %v2249_v12  ;;  %v1138_v29 = vand.u32 2147483648, %v2249_v12  ;;  %v1168_v21 = vsel %vm373_vm2, %v1158_v45, 0.0  ;;  %vm2459_vm14 = vmor %vm1132_vm15, %vm1133_vm6 }
 0x100   : > { %v728_v52 = vmul.f32 %v719_v26, %v2301_v55  ;;  %vm2416_vm7 = vcmp.eq.f32.partialorder %v933_v61, 8.507059e+37  ;;  %v898_v47 = vadd.f32 %v2370_v62, %v897_v15  ;;  %v1114_v63 = vsub.f32 1.0, %v1113_v50 }
 0x101   : > { %957 = vadd.xlane.f32.xlu0 %v956_v30  ;;  %v936_v24 = vor.u32 1.1754944e-38, %v935_v25  ;;  %vm2429_vm9 = vcmp.eq.f32.partialorder %v903_v41, 8.507059e+37  ;;  %v679_v23 = vmul.f32 %v2375_v27, %v678_v40  ;;  %vm681_vm10 = vweird.f32 %v2334_v18 }
 0x102   : > { %485 = vadd.xlane.f32.xlu1 %v484_v42  ;;  %v1543_v9 = vpop.eup %1542  ;;  %v932_v36 = vsel %vm2408_vm5, %v2351_v44, %v928_v34  ;;  %v906_v42 = vor.u32 1.1754944e-38, %v905_v46  ;;  %v1115_v4 = vmul.f32 %v2393_v22, %v1114_v63  ;;  %v1130_v3 = vmul.f32 %v2321_v17, %v1129_v58 }
 0x103   : > { %479 = vadd.xlane.f32.xlu2 %v478_v13  ;;  %v750_v13 = vsel %vm373_vm2, %v728_v52, 0.0  ;;  %v902_v57 = vsel %vm2425_vm8, %v2370_v62, %v898_v47  ;;  %vm682_vm11 = vweird.f32 %v2375_v27  ;;  %v1036_v20 = vadd.f32 1.0, %v1543_v9 }
 0x104   : > { %v685_v5 = vand.u32 2147483647, %v2334_v18  ;;  %v687_v44 = vand.u32 2147483648, %v2334_v18  ;;  %vm1117_vm12 = vweird.f32 %v2341_v39  ;;  %vm1118_vm13 = vweird.f32 %v2393_v22  ;;  %vm2469_vm0 = vmor %vm681_vm10, %vm682_vm11 }
 0x105   : > { %v937_v0 = vsel %vm2416_vm7, %v936_v24, %v932_v36  ;;  %v680_v31 = vadd.f32 %v2375_v27, %v679_v23  ;;  %v1123_v32 = vand.u32 2147483648, %v2341_v39  ;;  %1544 = vrcp.f32 %v1036_v20  ;;  %vm2479_vm15 = vmor %vm1117_vm12, %vm1118_vm13 }
 0x106   : > { %v1116_v38 = vadd.f32 %v2393_v22, %v1115_v4  ;;  %v1121_v12 = vand.u32 2147483647, %v2341_v39  ;;  %v1131_v45 = vadd.f32 %v2321_v17, %v1130_v3  ;;  %v502_v48 = vmul.f32 %v494_v53, %v2301_v55 }
 0x107   : > { %v946_v18 = vmul.f32 %v937_v0, %v2301_v55  ;;  %v688_v60 = vor.u32 1.1754944e-38, %v687_v44  ;;  %v1139_v62 = vor.u32 1.1754944e-38, %v1138_v29  ;;  %v684_v6 = vsel %vm2469_vm0, %v2375_v27, %v680_v31 }
 0x108   : > { %vm686_vm1 = vcmp.eq.f32.partialorder %v685_v5, 8.507059e+37  ;;  %v1124_v61 = vor.u32 1.1754944e-38, %v1123_v32  ;;  %v1120_v39 = vsel %vm2479_vm15, %v2393_v22, %v1116_v38  ;;  %vm1122_vm3 = vcmp.eq.f32.partialorder %v1121_v12, 8.507059e+37 }
 0x109   : > { %1169 = vadd.xlane.f32.xlu0 %v1168_v21  ;;  %v1135_v8 = vsel %vm2459_vm14, %v2321_v17, %v1131_v45  ;;  %vm1137_vm4 = vcmp.eq.f32.partialorder %v1136_v1, 8.507059e+37  ;;  %v524_v10 = vsel %vm373_vm2, %v502_v48, 0.0  ;;  %v968_v25 = vsel %vm373_vm2, %v946_v18, 0.0 }
 0x10a   : > { %519 = vadd.xlane.f32.xlu1 %v2359_v7  ;;  %v907_v7 = vsel %vm2429_vm9, %v906_v42, %v902_v57  ;;  %v689_v14 = vsel %vm686_vm1, %v688_v60, %v684_v6  ;;  %v1125_v43 = vsel %vm1122_vm3, %v1124_v61, %v1120_v39  ;;  %v1140_v54 = vsel %vm1137_vm4, %v1139_v62, %v1135_v8 }
 0x10b   : > { %751 = vadd.xlane.f32.xlu2 %v750_v13  ;;  %v944_v30 = vmul.f32 %v907_v7, %v2318_v16  ;;  %v1545_v11 = vpop.eup %1544  ;;  %v1153_v41 = vand.u32 2147483648, %v1036_v20  ;;  %vm1147_vm5 = vweird.f32 %v1036_v20  ;;  %v1151_v17 = vand.u32 2147483647, %v1036_v20 }
 0x10c   : > { %v1143_v27 = vmul.f32 %v1545_v11, %v1036_v20  ;;  %vm1148_vm6 = vweird.f32 %v1545_v11  ;;  %v726_v59 = vmul.f32 %v689_v14, %v2318_v16  ;;  %v1162_v46 = vmul.f32 %v1125_v43, %v2318_v16 }
 0x10d   : > { %v962_v49 = vsel %vm373_vm2, %v944_v30, 0.0  ;;  %v1163_v26 = vmul.f32 %v1140_v54, %v1987_v56  ;;  %vm1149_vm7 = vmor %vm1147_vm5, %vm1148_vm6  ;;  %v1154_v34 = vor.u32 1.1754944e-38, %v1153_v41  ;;  %vm1152_vm8 = vcmp.eq.f32.partialorder %v1151_v17, 8.507059e+37 }
 0x10e   : > { %v1144_v22 = vsub.f32 1.0, %v1143_v27  ;;  %v744_v50 = vsel %vm373_vm2, %v726_v59, 0.0  ;;  %v1180_v52 = vsel %vm373_vm2, %v1162_v46, 0.0  ;;  %vm535_vm9 = vcmp.eq.s32.totalorder %v1588_v2, 3 }
 0x10f   : > { %v1183_v1 = vsel %vm373_vm2, %v1163_v26, 0.0  ;;  %vm544_vm10 = vcmp.eq.s32.totalorder %v1588_v2, 4  ;;  %vm979_vm11 = vcmp.eq.s32.totalorder %v1588_v2, 1  ;;  %vm1197_vm12 = vcmp.eq.s32.totalorder %v1588_v2, 2 }
 0x110   : > { %v1145_v40 = vmul.f32 %v1545_v11, %v1144_v22  ;;  %vm1214_vm13 = vcmask 64512  }
 0x111   : > { %525 = vadd.xlane.f32.xlu0 %v524_v10 }
 0x112   : > { %969 = vadd.xlane.f32.xlu1 %v968_v25  ;;  %v1146_v15 = vadd.f32 %v1545_v11, %v1145_v40 }
 0x113   : > { %963 = vadd.xlane.f32.xlu2 %v962_v49 }
 0x114   : > { %v1150_v28 = vsel %vm1149_vm7, %v1545_v11, %v1146_v15 }
 0x115   : > { %v1155_v29 = vsel %vm1152_vm8, %v1154_v34, %v1150_v28 }
 0x116   : > { %v1164_v16 = vmul.f32 %v1155_v29, %v2301_v55 }
 0x118   : > { %v1186_v21 = vsel %vm373_vm2, %v1164_v16, 0.0  ;;  %vm761_vm2 = vcmp.eq.s32.totalorder %v1588_v2, 0 }
 0x119   : > { %745 = vadd.xlane.f32.xlu0 %v744_v50 }
 0x11a   : > { %1181 = vadd.xlane.f32.xlu1 %v1180_v52 }
 0x11b   : > { %1184 = vadd.xlane.f32.xlu2 %v1183_v1 }
 0x121   : > { %1187 = vadd.xlane.f32.xlu0 %v1186_v21 }
 0x12c   : > { %v465_v56 = vpop.xlane.xlu0 %464 }
 0x12d   : > { %v471_v35 = vpop.xlane.xlu1 %470  ;;  %v527_v23 = vsub.f32 1.0, %v465_v56  ;;  %v545_v13 = vsel %vm544_vm10, %v465_v56, 0.0 }
 0x12e   : > { %v505_v47 = vpop.xlane.xlu2 %504  ;;  %v529_v19 = vsub.f32 1.0, %v471_v35  ;;  %v547_v3 = vsel %vm544_vm10, %v471_v35, 0.0 }
 0x12f   : > { %v536_v9 = vsel %vm535_vm9, %v505_v47, 0.0 }
 0x130   : > { %v553_v5 = vadd.f32 %v545_v13, %v536_v9 }
 0x134   : > { %v737_v51 = vpop.xlane.xlu0 %736 }
 0x135   : > { %v511_v63 = vpop.xlane.xlu1 %510  ;;  %v755_v36 = vadd.f32 %v737_v51, %v529_v19 }
 0x136   : > { %v955_v24 = vpop.xlane.xlu2 %954  ;;  %v538_v55 = vsel %vm535_vm9, %v511_v63, 0.0 }
 0x137   : > { %v555_v44 = vadd.f32 %v547_v3, %v538_v55  ;;  %v764_v0 = vsel %vm761_vm2, %v755_v36, 0.0  ;;  %v973_v31 = vadd.f32 %v955_v24, %v529_v19 }
 0x139   : > { %v772_v38 = vadd.f32 %v764_v0, %v555_v44  ;;  %v982_v45 = vsel %vm979_vm11, %v973_v31, 0.0 }
 0x13b   : > { %v990_v6 = vadd.f32 %v982_v45, %v772_v38 }
 0x13c   : > { %v949_v42 = vpop.xlane.xlu0 %948 }
 0x13d   : > { %v731_v4 = vpop.xlane.xlu1 %730  ;;  %v971_v57 = vadd.f32 %v949_v42, %v527_v23 }
 0x13e   : > { %v753_v20 = vadd.f32 %v731_v4, %v527_v23  ;;  %v1167_v53 = vpop.xlane.xlu2 %1166 }
 0x13f   : > { %v1189_v33 = vadd.f32 %v1167_v53, %v527_v23  ;;  %v980_v37 = vsel %vm979_vm11, %v971_v57, 0.0 }
 0x140   : > { %v762_v32 = vsel %vm761_vm2, %v753_v20, 0.0 }
 0x141   : > { %v770_v7 = vadd.f32 %v762_v32, %v553_v5  ;;  %v1198_v48 = vsel %vm1197_vm12, %v1189_v33, 0.0 }
 0x143   : > { %v988_v12 = vadd.f32 %v980_v37, %v770_v7 }
 0x144   : > { %v2534_v58 = vpop.xlane.xlu0 %482 }
 0x145   : > { %v1206_v18 = vadd.f32 %v1198_v48, %v988_v12  ;;  %v1173_v60 = vpop.xlane.xlu1 %1172 }
 0x146   : > { %v1191_v62 = vadd.f32 %v1173_v60, %v529_v19  ;;  %v477_v30 = vpop.xlane.xlu2 %476 }
 0x147   : > { %1215 = vst.msk [vmem:[%s2530_s7] sm:$0xff] %vm1214_vm13, %v1206_v18  ;;  %v531_v49 = vsub.f32 1.0, %v477_v30  ;;  %v549_v46 = vsel %vm544_vm10, %v477_v30, 0.0 }
 0x148   : > { %v1200_v61 = vsel %vm1197_vm12, %v1191_v62, 0.0 }
 0x149   : > { %v1208_v39 = vadd.f32 %v1200_v61, %v990_v6  ;;  %v533_v61 = vsub.f32 1.0, %v2534_v58 }
 0x14b   : > { %1217 = vst.msk [vmem:[%s2530_s7 + $0x10] sm:$0xff] %vm1214_vm13, %v1208_v39 }
 0x14c   : > { %v468_v8 = vpop.xlane.xlu0 %467 }
 0x14d   : > { %v474_v11 = vpop.xlane.xlu1 %473  ;;  %v528_v19 = vsub.f32 1.0, %v468_v8  ;;  %v546_v4 = vsel %vm544_vm10, %v468_v8, 0.0 }
 0x14e   : > { %v2542_v10 = vpop.xlane.xlu2 %522  ;;  %v530_v35 = vsub.f32 1.0, %v474_v11  ;;  %v548_v23 = vsel %vm544_vm10, %v474_v11, 0.0 }
 0x154   : > { %v517_v25 = vpop.xlane.xlu0 %516 }
 0x155   : > { %v749_v14 = vpop.xlane.xlu1 %748  ;;  %v540_v17 = vsel %vm535_vm9, %v517_v25, 0.0 }
 0x156   : > { %v743_v27 = vpop.xlane.xlu2 %742  ;;  %v557_v26 = vadd.f32 %v549_v46, %v540_v17  ;;  %v759_v11 = vadd.f32 %v749_v14, %v533_v61 }
 0x157   : > { %v757_v54 = vadd.f32 %v743_v27, %v531_v49 }
 0x159   : > { %v766_v40 = vsel %vm761_vm2, %v757_v54, 0.0 }
 0x15a   : > { %v774_v15 = vadd.f32 %v766_v40, %v557_v26 }
 0x15c   : > { %v967_v43 = vpop.xlane.xlu0 %966 }
 0x15d   : > { %v961_v41 = vpop.xlane.xlu1 %960  ;;  %v977_v27 = vadd.f32 %v967_v43, %v533_v61 }
 0x15e   : > { %v514_v22 = vpop.xlane.xlu2 %513  ;;  %v975_v59 = vadd.f32 %v961_v41, %v531_v49  ;;  %v551_v41 = vsel %vm544_vm10, %v2534_v58, 0.0 }
 0x15f   : > { %v539_v24 = vsel %vm535_vm9, %v514_v22, 0.0  ;;  %v768_v22 = vsel %vm761_vm2, %v759_v11, 0.0 }
 0x160   : > { %v984_v34 = vsel %vm979_vm11, %v975_v59, 0.0  ;;  %v556_v36 = vadd.f32 %v548_v23, %v539_v24 }
 0x161   : > { %v992_v1 = vadd.f32 %v984_v34, %v774_v15 }
 0x164   : > { %v1179_v50 = vpop.xlane.xlu0 %1178 }
 0x165   : > { %v1193_v52 = vadd.f32 %v1179_v50, %v531_v49  ;;  %v740_v28 = vpop.xlane.xlu1 %739  ;;  %v542_v49 = vsel %vm535_vm9, %v2542_v10, 0.0  ;;  %v986_v10 = vsel %vm979_vm11, %v977_v27, 0.0 }
 0x166   : > { %v734_v29 = vpop.xlane.xlu2 %733  ;;  %v756_v63 = vadd.f32 %v740_v28, %v530_v35  ;;  %v559_v46 = vadd.f32 %v551_v41, %v542_v49 }
 0x167   : > { %v1202_v16 = vsel %vm1197_vm12, %v1193_v52, 0.0  ;;  %v754_v3 = vadd.f32 %v734_v29, %v528_v19 }
 0x168   : > { %v1210_v21 = vadd.f32 %v1202_v16, %v992_v1  ;;  %v765_v9 = vsel %vm761_vm2, %v756_v63, 0.0  ;;  %v776_v52 = vadd.f32 %v768_v22, %v559_v46 }
 0x169   : > { %v773_v53 = vadd.f32 %v765_v9, %v556_v36  ;;  %v763_v32 = vsel %vm761_vm2, %v754_v3, 0.0 }
 0x16a   : > { %1219 = vst.msk [vmem:[%s2530_s7 + $0x20] sm:$0xff] %vm1214_vm13, %v1210_v21 }
 0x16c   : > { %v508_v56 = vpop.xlane.xlu0 %507 }
 0x16d   : > { %v952_v47 = vpop.xlane.xlu1 %951  ;;  %v537_v55 = vsel %vm535_vm9, %v508_v56, 0.0 }
 0x16e   : > { %v1176_v51 = vpop.xlane.xlu2 %1175  ;;  %v554_v5 = vadd.f32 %v546_v4, %v537_v55  ;;  %v972_v33 = vadd.f32 %v952_v47, %v528_v19 }
 0x16f   : > { %v1192_v13 = vadd.f32 %v1176_v51, %v530_v35 }
 0x170   : > { %v771_v37 = vadd.f32 %v763_v32, %v554_v5  ;;  %v981_v45 = vsel %vm979_vm11, %v972_v33, 0.0 }
 0x171   : > { %v1201_v7 = vsel %vm1197_vm12, %v1192_v13, 0.0 }
 0x172   : > { %v989_v60 = vadd.f32 %v981_v45, %v771_v37 }
 0x174   : > { %v958_v42 = vpop.xlane.xlu0 %957 }
 0x175   : > { %v974_v57 = vadd.f32 %v958_v42, %v530_v35  ;;  %v486_v20 = vpop.xlane.xlu1 %485  ;;  %v994_v35 = vadd.f32 %v986_v10, %v776_v52 }
 0x176   : > { %v480_v44 = vpop.xlane.xlu2 %479  ;;  %v534_v54 = vsub.f32 1.0, %v486_v20  ;;  %v552_v58 = vsel %vm544_vm10, %v486_v20, 0.0 }
 0x177   : > { %v983_v0 = vsel %vm979_vm11, %v974_v57, 0.0  ;;  %v532_v17 = vsub.f32 1.0, %v480_v44  ;;  %v550_v59 = vsel %vm544_vm10, %v480_v44, 0.0 }
 0x178   : > { %v991_v31 = vadd.f32 %v983_v0, %v773_v53 }
 0x17a   : > { %v1209_v38 = vadd.f32 %v1201_v7, %v991_v31 }
 0x17c   : > { %1218 = vst.msk [vmem:[%s2530_s7 + $0x18] sm:$0xff] %vm1214_vm13, %v1209_v38  ;;  %v1170_v12 = vpop.xlane.xlu0 %1169 }
 0x17d   : > { %v1190_v48 = vadd.f32 %v1170_v12, %v528_v19  ;;  %v520_v18 = vpop.xlane.xlu1 %519 }
 0x17e   : > { %v752_v62 = vpop.xlane.xlu2 %751  ;;  %v541_v14 = vsel %vm535_vm9, %v520_v18, 0.0 }
 0x17f   : > { %v1199_v30 = vsel %vm1197_vm12, %v1190_v48, 0.0  ;;  %v760_v26 = vadd.f32 %v752_v62, %v534_v54  ;;  %v558_v28 = vadd.f32 %v550_v59, %v541_v14 }
 0x180   : > { %v1207_v6 = vadd.f32 %v1199_v30, %v989_v60 }
 0x181   : > { %v769_v51 = vsel %vm761_vm2, %v760_v26, 0.0 }
 0x182   : > { %1216 = vst.msk [vmem:[%s2530_s7 + $0x8] sm:$0xff] %vm1214_vm13, %v1207_v6 }
 0x184   : > { %v526_v39 = vpop.xlane.xlu0 %525 }
 0x185   : > { %v970_v8 = vpop.xlane.xlu1 %969  ;;  %v543_v43 = vsel %vm535_vm9, %v526_v39, 0.0 }
 0x186   : > { %v964_v25 = vpop.xlane.xlu2 %963  ;;  %v560_v1 = vadd.f32 %v552_v58, %v543_v43  ;;  %v978_v63 = vadd.f32 %v970_v8, %v534_v54 }
 0x187   : > { %v976_v34 = vadd.f32 %v964_v25, %v532_v17 }
 0x188   : > { %v777_v23 = vadd.f32 %v769_v51, %v560_v1  ;;  %v987_v3 = vsel %vm979_vm11, %v978_v63, 0.0 }
 0x189   : > { %v985_v24 = vsel %vm979_vm11, %v976_v34, 0.0 }
 0x18a   : > { %v995_v57 = vadd.f32 %v987_v3, %v777_v23 }
 0x18c   : > { %v746_v40 = vpop.xlane.xlu0 %745 }
 0x18d   : > { %v758_v15 = vadd.f32 %v746_v40, %v532_v17  ;;  %v1182_v50 = vpop.xlane.xlu1 %1181 }
 0x18e   : > { %v1185_v29 = vpop.xlane.xlu2 %1184  ;;  %v1194_v21 = vadd.f32 %v1182_v50, %v532_v17 }
 0x18f   : > { %v767_v16 = vsel %vm761_vm2, %v758_v15, 0.0  ;;  %v1195_v56 = vadd.f32 %v1185_v29, %v533_v61 }
 0x190   : > { %v775_v47 = vadd.f32 %v767_v16, %v558_v28  ;;  %v1203_v36 = vsel %vm1197_vm12, %v1194_v21, 0.0 }
 0x191   : > { %v1204_v19 = vsel %vm1197_vm12, %v1195_v56, 0.0 }
 0x192   : > { %v993_v9 = vadd.f32 %v985_v24, %v775_v47  ;;  %v1212_v55 = vadd.f32 %v1204_v19, %v994_v35 }
 0x194   : > { %v1211_v42 = vadd.f32 %v1203_v36, %v993_v9  ;;  %1221 = vst.msk [vmem:[%s2530_s7 + $0x30] sm:$0xff] %vm1214_vm13, %v1212_v55  ;;  %v1188_v4 = vpop.xlane.xlu0 %1187 }
 0x195   : > { %v1196_v13 = vadd.f32 %v1188_v4, %v534_v54 }
 0x196   : > { %1220 = vst.msk [vmem:[%s2530_s7 + $0x28] sm:$0xff] %vm1214_vm13, %v1211_v42 }
 0x197   : > { %v1205_v20 = vsel %vm1197_vm12, %v1196_v13, 0.0 }
 0x198   : > { %v1213_v53 = vadd.f32 %v1205_v20, %v995_v57 }
 0x19a   : > { %1222 = vst.msk [vmem:[%s2530_s7 + $0x38] sm:$0xff] %vm1214_vm13, %v1213_v53 }
 0x19b PF: > { %s14_s15 = sadd.s32 1, %s1552_s15  }
 0x19c   : > { %p11_p4 = scmp.ge.s32.totalorder %s14_s15, 4  }
 0x19e   :  { %13 = sbr.rel (!%p11_p4) target bundleno = 1 (0x1), region = 77 }

</bundles_post_ra>
